<compile_context>
chip_gen: v7x
topology: tpu7x:2x2x1
jax: 0.10.0
libtpu: 0.0.40
codegen_flags: <defaults>
</compile_context>

<pallas_src>
import math
import numpy as np
import jax
import jax.numpy as jnp
from jax.experimental import pallas as pl
from jax.experimental.pallas import tpu as pltpu


def _round_up(x, m):
    return ((x + m - 1) // m) * m


def _phase_for(fn):
    """Map a periodic fn to a phase so that fn(t) == sin(t + phase)."""
    name = fn if isinstance(fn, str) else getattr(fn, "__name__", "")
    name = name.lower()
    if name == "sin":
        return 0.0
    if name == "cos":
        return math.pi / 2.0
    # TODO(synk): periodic_fns other than sin/cos are not supported by the
    # fused single-transcendental kernel.
    raise NotImplementedError(f"periodic_fn {fn!r} not supported (sin/cos only)")


def make_embedder(*, input_dims, num_freqs, max_freq_log2,
                  include_input=True, log_sampling=True,
                  periodic_fns=(jnp.sin, jnp.cos), end_barf=-1,
                  lane_tile=8192, out_dtype=jnp.float32,
                  vmem_limit_bytes=None):
    """Returns (forward_fn, out_dim) mirroring the PyTorch Embedder.

    forward(inputs, step=None, transpose_output=True):
      * transpose_output=True  -> (N, out_dim)   (torch layout, default)
      * transpose_output=False -> (out_dim, N)   (lane-dense slab for matmuls)
    """
    d = input_dims
    n_fns = len(periodic_fns)
    phases = [_phase_for(fn) for fn in periodic_fns]
    assert lane_tile % 128 == 0 and lane_tile >= 128, \
        "lane_tile must be a multiple of 128"

    # Static frequency bands (same as the torch.linspace construction).
    if log_sampling:
        freq_bands = np.asarray(
            2.0 ** np.linspace(0.0, max_freq_log2, num_freqs), np.float32)
    else:
        freq_bands = np.asarray(
            np.linspace(2.0 ** 0.0, 2.0 ** max_freq_log2, num_freqs),
            np.float32)

    d_off = d if include_input else 0
    n_periodic = num_freqs * n_fns * d
    out_dim = d_off + n_periodic
    n_groups = out_dim // d            # raw-input group (if any) + freq/fn groups
    Rp = _round_up(out_dim, 8)         # sublane-aligned row count of the tile
    rpad = Rp - out_dim
    L = num_freqs

    # Per-row scale/phase columns so that one jnp.sin over the stacked tile
    # produces [x(*1+0 -> fixed up later), sin(f0 x), cos(f0 x), sin(f1 x), ...].
    scale_np = np.zeros((Rp, 1), np.float32)
    phase_np = np.zeros((Rp, 1), np.float32)
    if include_input:
        scale_np[:d] = 1.0
    r = d_off
    for f in freq_bands:
        for ph in phases:
            scale_np[r:r + d] = float(f)
            phase_np[r:r + d] = float(ph)
            r += d
    # pad rows keep scale=0, phase=0 -> sin(0)=0 (and are sliced off anyway).

    # --------------------------- kernel factory ----------------------------
    def _make_kernel(lt, use_mask, transposed_store):
        def kernel(*refs):
            if use_mask:
                x_ref, scale_ref, phase_ref, w_ref, o_ref, buf_ref = refs
            else:
                x_ref, scale_ref, phase_ref, o_ref, buf_ref = refs

            x = x_ref[...]                                # (d, lt) f32
            # Replicate x into every d-row group of the (Rp, lt) scratch so a
            # single transcendental pass covers all freqs at full 8-sublane
            # vreg occupancy.
            for g in range(n_groups):                     # static unroll
                buf_ref[pl.ds(g * d, d), :] = x
            if rpad:
                buf_ref[pl.ds(out_dim, rpad), :] = jnp.zeros((rpad, lt),
                                                             jnp.float32)
            arr = buf_ref[...]                            # (Rp, lt)

            # cos(t) == sin(t + pi/2): one EUP pass for all freqs/fns.
            enc = jnp.sin(arr * scale_ref[...] + phase_ref[...])
            if use_mask:
                enc = enc * w_ref[...]                    # (Rp,1) BARF weights

            if include_input:
                row = jax.lax.broadcasted_iota(jnp.int32, (Rp, lt), 0)
                tile = jnp.where(row < d, arr, enc)       # keep raw x rows
            else:
                tile = enc

            if transposed_store:
                # (Rp, lt) -> (lt, Rp) on the XLU, drop pad lanes, and store
                # directly in the torch (N, out_dim) layout: no XLA transpose.
                o_ref[...] = tile.T[:, :out_dim].astype(o_ref.dtype)
            else:
                o_ref[...] = tile[:out_dim, :].astype(o_ref.dtype)
        return kernel

    # --------------------------- BARF row weights --------------------------
    def _barf_weight_col(step):
        # Reproduces barf_mask(...view(-1, L) * weight): masked column j gets
        # weight[j % L] (same layout quirk as the PyTorch reference).
        alpha = (jnp.asarray(step, jnp.float32) - 0.0) / float(end_barf) * L
        k = jnp.arange(L, dtype=jnp.float32)
        w_L = (1.0 - jnp.cos(jnp.clip(alpha - k, 0.0, 1.0) * math.pi)) / 2.0
        w_periodic = w_L[jnp.arange(n_periodic) % L]
        parts = []
        if include_input:
            parts.append(jnp.ones((d,), jnp.float32))     # raw rows unmasked
        parts.append(w_periodic)
        if rpad:
            parts.append(jnp.zeros((rpad,), jnp.float32))
        return jnp.concatenate(parts).reshape(Rp, 1)

    # ------------------------------ pallas call ----------------------------
    def _pallas(x_t, w, lt, n_blocks, transposed_store):
        use_mask = w is not None
        kernel = _make_kernel(lt, use_mask, transposed_store)
        Np = n_blocks * lt

        x_spec = pl.BlockSpec((d, lt), lambda i: (0, i))
        col_spec = pl.BlockSpec((Rp, 1), lambda i: (0, 0))
        in_specs = [x_spec, col_spec, col_spec]
        args = [x_t, jnp.asarray(scale_np), jnp.asarray(phase_np)]
        if use_mask:
            in_specs.append(col_spec)
            args.append(w)

        if transposed_store:
            out_specs = pl.BlockSpec((lt, out_dim), lambda i: (i, 0))
            out_shape = jax.ShapeDtypeStruct((Np, out_dim), out_dtype)
        else:
            out_specs = pl.BlockSpec((out_dim, lt), lambda i: (0, i))
            out_shape = jax.ShapeDtypeStruct((out_dim, Np), out_dtype)

        cp_kwargs = dict(dimension_semantics=("parallel",))
        if vmem_limit_bytes is not None:      # set explicitly for huge tiles
            cp_kwargs["vmem_limit_bytes"] = vmem_limit_bytes

        return pl.pallas_call(
            kernel,
            out_shape=out_shape,
            grid_spec=pltpu.PrefetchScalarGridSpec(
                num_scalar_prefetch=0,
                grid=(n_blocks,),
                in_specs=in_specs,
                out_specs=out_specs,
                scratch_shapes=[pltpu.VMEM((Rp, lt), jnp.float32)]),
            compiler_params=pltpu.CompilerParams(**cp_kwargs),
        )(*args)

    state = {"fused_transpose_ok": True}
    MIN_BLOCKS = 8   # keep several blocks so v7x's 2 TCs both get work

    # ------------------------------- forward --------------------------------
    def forward(inputs, step=None, transpose_output=True):
        inputs = jnp.asarray(inputs, jnp.float32)
        N = inputs.shape[0]
        assert inputs.shape == (N, d)

        # Tile selection: lane_tile is a cap; keep >= MIN_BLOCKS blocks when
        # N is large enough, never tile beyond what N needs.
        lt = min(lane_tile, _round_up(max(N, 1), 128))
        if N > MIN_BLOCKS * 128 and pl.cdiv(N, lt) < MIN_BLOCKS:
            lt = min(lane_tile, max(128, _round_up(pl.cdiv(N, MIN_BLOCKS), 128)))
        n_blocks = pl.cdiv(N, lt)
        Np = n_blocks * lt

        # Input is only ~1/out_dim of the output traffic; transpose+pad here
        # is cheap (a producer emitting (d, N) directly could skip it).
        x_t = inputs.T                                    # (d, N), lane-dense
        if Np != N:
            x_t = jnp.pad(x_t, ((0, 0), (0, Np - N)))     # zero-pad tail

        use_mask = (step is not None) and (end_barf != -1)
        w = _barf_weight_col(step) if use_mask else None

        if transpose_output:
            if state["fused_transpose_ok"]:
                try:
                    out = _pallas(x_t, w, lt, n_blocks, True)
                    return out if Np == N else out[:N]
                except Exception:
                    # In-kernel transpose unsupported on this Mosaic build:
                    # degrade to lane-dense store + XLA transpose (old path).
                    state["fused_transpose_ok"] = False
            out_t = _pallas(x_t, w, lt, n_blocks, False)
            out = out_t.T
            return out if Np == N else out[:N]
        else:
            out_t = _pallas(x_t, w, lt, n_blocks, False)  # (out_dim, Np)
            return out_t if Np == N else out_t[:, :N]

    return forward, out_dim


def _reference(inputs, *, input_dims, num_freqs, max_freq_log2, include_input,
               log_sampling, end_barf, step):
    """Pure-numpy reference mirroring the PyTorch forward exactly."""
    x = np.asarray(inputs, np.float32)
    d = input_dims
    if log_sampling:
        freq_bands = (2.0 ** np.linspace(0.0, max_freq_log2, num_freqs))
    else:
        freq_bands = np.linspace(2.0 ** 0.0, 2.0 ** max_freq_log2, num_freqs)
    freq_bands = freq_bands.astype(np.float32)
    enc = []
    if include_input:
        enc.append(x)
    for f in freq_bands:
        enc.append(np.sin(x * f))
        enc.append(np.cos(x * f))
    enc = np.concatenate(enc, -1)
    if step is None or end_barf == -1:
        return enc
    L = num_freqs
    alpha = (step - 0.0) / (end_barf - 0.0) * L
    k = np.arange(L, dtype=np.float32)
    weight = (1 - np.cos(np.clip(alpha - k, 0, 1) * np.pi)) / 2
    masked = enc[:, d:] if include_input else enc
    shape = masked.shape
    masked = (masked.reshape(-1, L) * weight).reshape(shape)
    if include_input:
        return np.concatenate([enc[:, :d], masked], 1).astype(np.float32)
    return masked.astype(np.float32)


if __name__ == "__main__":
    key = jax.random.PRNGKey(0)

    # Config 1: NeRF-like, include_input, BARF mask active.
    cfg = dict(input_dims=4, num_freqs=4, max_freq_log2=3,
               include_input=True, log_sampling=True, end_barf=100)
    forward, out_dim = make_embedder(**cfg)

    N = 300   # not a multiple of 128 -> exercises wrapper padding + tail slice
    x = jax.random.normal(key, (N, cfg["input_dims"]), dtype=jnp.float32)
    step = 30

    out = jax.block_until_ready(forward(x, step=step))
    ref = _reference(np.asarray(x), step=step, **cfg)
    assert out.shape == (N, out_dim)
    np.testing.assert_allclose(np.asarray(out), ref, rtol=1e-5, atol=2e-5)

    # step=None path (un-masked kernel variant: no weight input / multiply).
    out2 = jax.block_until_ready(forward(x, step=None))
    ref2 = _reference(np.asarray(x), step=None, **cfg)
    np.testing.assert_allclose(np.asarray(out2), ref2, rtol=1e-5, atol=2e-5)

    # Lane-dense (out_dim, N) slab for matmul consumers.
    out_dn = jax.block_until_ready(forward(x, step=step, transpose_output=False))
    assert out_dn.shape == (out_dim, N)
    np.testing.assert_allclose(np.asarray(out_dn), ref.T, rtol=1e-5, atol=2e-5)

    # Config 2: no include_input, linear sampling, multi-block grid (8 blocks).
    cfg2 = dict(input_dims=3, num_freqs=5, max_freq_log2=3,
                include_input=False, log_sampling=False, end_barf=50)
    forward2, out_dim2 = make_embedder(**cfg2, lane_tile=256)
    N2 = 2048
    x2 = jax.random.normal(jax.random.PRNGKey(0), (N2, cfg2["input_dims"]),
                           dtype=jnp.float32)
    out3 = jax.block_until_ready(forward2(x2, step=17))
    ref3 = _reference(np.asarray(x2), step=17, **cfg2)
    assert out3.shape == (N2, out_dim2)
    np.testing.assert_allclose(np.asarray(out3), ref3, rtol=1e-5, atol=2e-5)

    print("KERNEL_OK")
</pallas_src>

<mosaic_0001>
module attributes {stable_mosaic.version = 11 : i64} {
  func.func @kernel(%arg0: i32, %arg1: memref<4x384xf32, #tpu.memory_space<vmem>>, %arg2: memref<40x1xf32, #tpu.memory_space<vmem>>, %arg3: memref<40x1xf32, #tpu.memory_space<vmem>>, %arg4: memref<40x1xf32, #tpu.memory_space<vmem>>, %arg5: memref<384x36xf32, #tpu.memory_space<vmem>>, %arg6: memref<40x384xf32, #tpu.memory_space<vmem>>) attributes {dimension_semantics = [#tpu.dimension_semantics<parallel>], iteration_bounds = array<i64: 1>, scalar_prefetch = 0 : i64, scratch_operands = 1 : i64, tpu.core_type = #tpu.core_type<tc>, window_params = [{transform_indices = @transform_0, window_bounds = array<i64: 4, 384>}, {pipeline_mode = #tpu.pipeline_mode<synchronous>, transform_indices = @transform_1, window_bounds = array<i64: 40, 1>}, {pipeline_mode = #tpu.pipeline_mode<synchronous>, transform_indices = @transform_2, window_bounds = array<i64: 40, 1>}, {pipeline_mode = #tpu.pipeline_mode<synchronous>, transform_indices = @transform_3, window_bounds = array<i64: 40, 1>}, {transform_indices = @transform_4, window_bounds = array<i64: 384, 36>}]} {
    %c0 = arith.constant 0 : index
    %c0_0 = arith.constant 0 : index
    %0 = vector.load %arg1[%c0, %c0_0] : memref<4x384xf32, #tpu.memory_space<vmem>>, vector<4x384xf32>
    %c0_1 = arith.constant 0 : index
    %c0_2 = arith.constant 0 : index
    %1 = vector.load %arg6[%c0_1, %c0_2] : memref<40x384xf32, #tpu.memory_space<vmem>>, vector<4x384xf32>
    tpu.vector_store %arg6[%c0_1, %c0_2], %0 {strides = array<i32>} : memref<40x384xf32, #tpu.memory_space<vmem>>, vector<4x384xf32>,
    %c4 = arith.constant 4 : index
    %c0_3 = arith.constant 0 : index
    %2 = vector.load %arg6[%c4, %c0_3] : memref<40x384xf32, #tpu.memory_space<vmem>>, vector<4x384xf32>
    tpu.vector_store %arg6[%c4, %c0_3], %0 {strides = array<i32>} : memref<40x384xf32, #tpu.memory_space<vmem>>, vector<4x384xf32>,
    %c8 = arith.constant 8 : index
    %c0_4 = arith.constant 0 : index
    %3 = vector.load %arg6[%c8, %c0_4] : memref<40x384xf32, #tpu.memory_space<vmem>>, vector<4x384xf32>
    tpu.vector_store %arg6[%c8, %c0_4], %0 {strides = array<i32>} : memref<40x384xf32, #tpu.memory_space<vmem>>, vector<4x384xf32>,
    %c12 = arith.constant 12 : index
    %c0_5 = arith.constant 0 : index
    %4 = vector.load %arg6[%c12, %c0_5] : memref<40x384xf32, #tpu.memory_space<vmem>>, vector<4x384xf32>
    tpu.vector_store %arg6[%c12, %c0_5], %0 {strides = array<i32>} : memref<40x384xf32, #tpu.memory_space<vmem>>, vector<4x384xf32>,
    %c16 = arith.constant 16 : index
    %c0_6 = arith.constant 0 : index
    %5 = vector.load %arg6[%c16, %c0_6] : memref<40x384xf32, #tpu.memory_space<vmem>>, vector<4x384xf32>
    tpu.vector_store %arg6[%c16, %c0_6], %0 {strides = array<i32>} : memref<40x384xf32, #tpu.memory_space<vmem>>, vector<4x384xf32>,
    %c20 = arith.constant 20 : index
    %c0_7 = arith.constant 0 : index
    %6 = vector.load %arg6[%c20, %c0_7] : memref<40x384xf32, #tpu.memory_space<vmem>>, vector<4x384xf32>
    tpu.vector_store %arg6[%c20, %c0_7], %0 {strides = array<i32>} : memref<40x384xf32, #tpu.memory_space<vmem>>, vector<4x384xf32>,
    %c24 = arith.constant 24 : index
    %c0_8 = arith.constant 0 : index
    %7 = vector.load %arg6[%c24, %c0_8] : memref<40x384xf32, #tpu.memory_space<vmem>>, vector<4x384xf32>
    tpu.vector_store %arg6[%c24, %c0_8], %0 {strides = array<i32>} : memref<40x384xf32, #tpu.memory_space<vmem>>, vector<4x384xf32>,
    %c28 = arith.constant 28 : index
    %c0_9 = arith.constant 0 : index
    %8 = vector.load %arg6[%c28, %c0_9] : memref<40x384xf32, #tpu.memory_space<vmem>>, vector<4x384xf32>
    tpu.vector_store %arg6[%c28, %c0_9], %0 {strides = array<i32>} : memref<40x384xf32, #tpu.memory_space<vmem>>, vector<4x384xf32>,
    %c32 = arith.constant 32 : index
    %c0_10 = arith.constant 0 : index
    %9 = vector.load %arg6[%c32, %c0_10] : memref<40x384xf32, #tpu.memory_space<vmem>>, vector<4x384xf32>
    tpu.vector_store %arg6[%c32, %c0_10], %0 {strides = array<i32>} : memref<40x384xf32, #tpu.memory_space<vmem>>, vector<4x384xf32>,
    %cst = arith.constant 0.000000e+00 : f32
    %10 = vector.broadcast %cst : f32 to vector<4x384xf32>
    %c36 = arith.constant 36 : index
    %c0_11 = arith.constant 0 : index
    %11 = vector.load %arg6[%c36, %c0_11] : memref<40x384xf32, #tpu.memory_space<vmem>>, vector<4x384xf32>
    tpu.vector_store %arg6[%c36, %c0_11], %10 {strides = array<i32>} : memref<40x384xf32, #tpu.memory_space<vmem>>, vector<4x384xf32>,
    %c0_12 = arith.constant 0 : index
    %c0_13 = arith.constant 0 : index
    %12 = vector.load %arg6[%c0_12, %c0_13] : memref<40x384xf32, #tpu.memory_space<vmem>>, vector<40x384xf32>
    %c0_14 = arith.constant 0 : index
    %c0_15 = arith.constant 0 : index
    %13 = vector.load %arg2[%c0_14, %c0_15] : memref<40x1xf32, #tpu.memory_space<vmem>>, vector<40x1xf32>
    %14 = vector.broadcast %13 : vector<40x1xf32> to vector<40x384xf32>
    %15 = arith.mulf %12, %14 : vector<40x384xf32>
    %c0_16 = arith.constant 0 : index
    %c0_17 = arith.constant 0 : index
    %16 = vector.load %arg3[%c0_16, %c0_17] : memref<40x1xf32, #tpu.memory_space<vmem>>, vector<40x1xf32>
    %17 = vector.broadcast %16 : vector<40x1xf32> to vector<40x384xf32>
    %18 = arith.addf %15, %17 : vector<40x384xf32>
    %19 = math.sin %18 : vector<40x384xf32>
    %c0_18 = arith.constant 0 : index
    %c0_19 = arith.constant 0 : index
    %20 = vector.load %arg4[%c0_18, %c0_19] : memref<40x1xf32, #tpu.memory_space<vmem>>, vector<40x1xf32>
    %21 = vector.broadcast %20 : vector<40x1xf32> to vector<40x384xf32>
    %22 = arith.mulf %19, %21 : vector<40x384xf32>
    %23 = tpu.iota {dimensions = array<i32: 0>} : vector<40x384xi32>
    %c4_i32 = arith.constant 4 : i32
    %24 = vector.broadcast %c4_i32 : i32 to vector<40x384xi32>
    %25 = arith.cmpi slt, %23, %24 : vector<40x384xi32>
    %26 = arith.select %25, %12, %22 : vector<40x384xi1>, vector<40x384xf32>
    %27 = tpu.transpose %26, [1, 0] : vector<40x384xf32> -> vector<384x40xf32>
    %28 = vector.extract_strided_slice %27 {offsets = [0, 0], sizes = [384, 36], strides = [1, 1]} : vector<384x40xf32> to vector<384x36xf32>
    %c0_20 = arith.constant 0 : index
    %c0_21 = arith.constant 0 : index
    %29 = vector.load %arg5[%c0_20, %c0_21] : memref<384x36xf32, #tpu.memory_space<vmem>>, vector<384x36xf32>
    tpu.vector_store %arg5[%c0_20, %c0_21], %28 {strides = array<i32>} : memref<384x36xf32, #tpu.memory_space<vmem>>, vector<384x36xf32>,
    return
  }
  func.func @transform_0(%arg0: i32) -> (i32, i32) {
    %c0_i32 = arith.constant 0 : i32
    %c0_i32_0 = arith.constant 0 : i32
    return %c0_i32, %arg0 : i32, i32
  }
  func.func @transform_1(%arg0: i32) -> (i32, i32) {
    %c0_i32 = arith.constant 0 : i32
    %c0_i32_0 = arith.constant 0 : i32
    %c0_i32_1 = arith.constant 0 : i32
    return %c0_i32, %c0_i32_0 : i32, i32
  }
  func.func @transform_2(%arg0: i32) -> (i32, i32) {
    %c0_i32 = arith.constant 0 : i32
    %c0_i32_0 = arith.constant 0 : i32
    %c0_i32_1 = arith.constant 0 : i32
    return %c0_i32, %c0_i32_0 : i32, i32
  }
  func.func @transform_3(%arg0: i32) -> (i32, i32) {
    %c0_i32 = arith.constant 0 : i32
    %c0_i32_0 = arith.constant 0 : i32
    %c0_i32_1 = arith.constant 0 : i32
    return %c0_i32, %c0_i32_0 : i32, i32
  }
  func.func @transform_4(%arg0: i32) -> (i32, i32) {
    %c0_i32 = arith.constant 0 : i32
    %c0_i32_0 = arith.constant 0 : i32
    return %arg0, %c0_i32 : i32, i32
  }
}

module attributes {stable_mosaic.version = 11 : i64} {
  func.func @kernel(%arg0: i32, %arg1: memref<4x384xf32, #tpu.memory_space<vmem>>, %arg2: memref<40x1xf32, #tpu.memory_space<vmem>>, %arg3: memref<40x1xf32, #tpu.memory_space<vmem>>, %arg4: memref<40x1xf32, #tpu.memory_space<vmem>>, %arg5: memref<36x384xf32, #tpu.memory_space<vmem>>, %arg6: memref<40x384xf32, #tpu.memory_space<vmem>>) attributes {dimension_semantics = [#tpu.dimension_semantics<parallel>], iteration_bounds = array<i64: 1>, scalar_prefetch = 0 : i64, scratch_operands = 1 : i64, tpu.core_type = #tpu.core_type<tc>, window_params = [{transform_indices = @transform_0, window_bounds = array<i64: 4, 384>}, {pipeline_mode = #tpu.pipeline_mode<synchronous>, transform_indices = @transform_1, window_bounds = array<i64: 40, 1>}, {pipeline_mode = #tpu.pipeline_mode<synchronous>, transform_indices = @transform_2, window_bounds = array<i64: 40, 1>}, {pipeline_mode = #tpu.pipeline_mode<synchronous>, transform_indices = @transform_3, window_bounds = array<i64: 40, 1>}, {transform_indices = @transform_4, window_bounds = array<i64: 36, 384>}]} {
    %c0 = arith.constant 0 : index
    %c0_0 = arith.constant 0 : index
    %0 = vector.load %arg1[%c0, %c0_0] : memref<4x384xf32, #tpu.memory_space<vmem>>, vector<4x384xf32>
    %c0_1 = arith.constant 0 : index
    %c0_2 = arith.constant 0 : index
    %1 = vector.load %arg6[%c0_1, %c0_2] : memref<40x384xf32, #tpu.memory_space<vmem>>, vector<4x384xf32>
    tpu.vector_store %arg6[%c0_1, %c0_2], %0 {strides = array<i32>} : memref<40x384xf32, #tpu.memory_space<vmem>>, vector<4x384xf32>,
    %c4 = arith.constant 4 : index
    %c0_3 = arith.constant 0 : index
    %2 = vector.load %arg6[%c4, %c0_3] : memref<40x384xf32, #tpu.memory_space<vmem>>, vector<4x384xf32>
    tpu.vector_store %arg6[%c4, %c0_3], %0 {strides = array<i32>} : memref<40x384xf32, #tpu.memory_space<vmem>>, vector<4x384xf32>,
    %c8 = arith.constant 8 : index
    %c0_4 = arith.constant 0 : index
    %3 = vector.load %arg6[%c8, %c0_4] : memref<40x384xf32, #tpu.memory_space<vmem>>, vector<4x384xf32>
    tpu.vector_store %arg6[%c8, %c0_4], %0 {strides = array<i32>} : memref<40x384xf32, #tpu.memory_space<vmem>>, vector<4x384xf32>,
    %c12 = arith.constant 12 : index
    %c0_5 = arith.constant 0 : index
    %4 = vector.load %arg6[%c12, %c0_5] : memref<40x384xf32, #tpu.memory_space<vmem>>, vector<4x384xf32>
    tpu.vector_store %arg6[%c12, %c0_5], %0 {strides = array<i32>} : memref<40x384xf32, #tpu.memory_space<vmem>>, vector<4x384xf32>,
    %c16 = arith.constant 16 : index
    %c0_6 = arith.constant 0 : index
    %5 = vector.load %arg6[%c16, %c0_6] : memref<40x384xf32, #tpu.memory_space<vmem>>, vector<4x384xf32>
    tpu.vector_store %arg6[%c16, %c0_6], %0 {strides = array<i32>} : memref<40x384xf32, #tpu.memory_space<vmem>>, vector<4x384xf32>,
    %c20 = arith.constant 20 : index
    %c0_7 = arith.constant 0 : index
    %6 = vector.load %arg6[%c20, %c0_7] : memref<40x384xf32, #tpu.memory_space<vmem>>, vector<4x384xf32>
    tpu.vector_store %arg6[%c20, %c0_7], %0 {strides = array<i32>} : memref<40x384xf32, #tpu.memory_space<vmem>>, vector<4x384xf32>,
    %c24 = arith.constant 24 : index
    %c0_8 = arith.constant 0 : index
    %7 = vector.load %arg6[%c24, %c0_8] : memref<40x384xf32, #tpu.memory_space<vmem>>, vector<4x384xf32>
    tpu.vector_store %arg6[%c24, %c0_8], %0 {strides = array<i32>} : memref<40x384xf32, #tpu.memory_space<vmem>>, vector<4x384xf32>,
    %c28 = arith.constant 28 : index
    %c0_9 = arith.constant 0 : index
    %8 = vector.load %arg6[%c28, %c0_9] : memref<40x384xf32, #tpu.memory_space<vmem>>, vector<4x384xf32>
    tpu.vector_store %arg6[%c28, %c0_9], %0 {strides = array<i32>} : memref<40x384xf32, #tpu.memory_space<vmem>>, vector<4x384xf32>,
    %c32 = arith.constant 32 : index
    %c0_10 = arith.constant 0 : index
    %9 = vector.load %arg6[%c32, %c0_10] : memref<40x384xf32, #tpu.memory_space<vmem>>, vector<4x384xf32>
    tpu.vector_store %arg6[%c32, %c0_10], %0 {strides = array<i32>} : memref<40x384xf32, #tpu.memory_space<vmem>>, vector<4x384xf32>,
    %cst = arith.constant 0.000000e+00 : f32
    %10 = vector.broadcast %cst : f32 to vector<4x384xf32>
    %c36 = arith.constant 36 : index
    %c0_11 = arith.constant 0 : index
    %11 = vector.load %arg6[%c36, %c0_11] : memref<40x384xf32, #tpu.memory_space<vmem>>, vector<4x384xf32>
    tpu.vector_store %arg6[%c36, %c0_11], %10 {strides = array<i32>} : memref<40x384xf32, #tpu.memory_space<vmem>>, vector<4x384xf32>,
    %c0_12 = arith.constant 0 : index
    %c0_13 = arith.constant 0 : index
    %12 = vector.load %arg6[%c0_12, %c0_13] : memref<40x384xf32, #tpu.memory_space<vmem>>, vector<40x384xf32>
    %c0_14 = arith.constant 0 : index
    %c0_15 = arith.constant 0 : index
    %13 = vector.load %arg2[%c0_14, %c0_15] : memref<40x1xf32, #tpu.memory_space<vmem>>, vector<40x1xf32>
    %14 = vector.broadcast %13 : vector<40x1xf32> to vector<40x384xf32>
    %15 = arith.mulf %12, %14 : vector<40x384xf32>
    %c0_16 = arith.constant 0 : index
    %c0_17 = arith.constant 0 : index
    %16 = vector.load %arg3[%c0_16, %c0_17] : memref<40x1xf32, #tpu.memory_space<vmem>>, vector<40x1xf32>
    %17 = vector.broadcast %16 : vector<40x1xf32> to vector<40x384xf32>
    %18 = arith.addf %15, %17 : vector<40x384xf32>
    %19 = math.sin %18 : vector<40x384xf32>
    %c0_18 = arith.constant 0 : index
    %c0_19 = arith.constant 0 : index
    %20 = vector.load %arg4[%c0_18, %c0_19] : memref<40x1xf32, #tpu.memory_space<vmem>>, vector<40x1xf32>
    %21 = vector.broadcast %20 : vector<40x1xf32> to vector<40x384xf32>
    %22 = arith.mulf %19, %21 : vector<40x384xf32>
    %23 = tpu.iota {dimensions = array<i32: 0>} : vector<40x384xi32>
    %c4_i32 = arith.constant 4 : i32
    %24 = vector.broadcast %c4_i32 : i32 to vector<40x384xi32>
    %25 = arith.cmpi slt, %23, %24 : vector<40x384xi32>
    %26 = arith.select %25, %12, %22 : vector<40x384xi1>, vector<40x384xf32>
    %27 = vector.extract_strided_slice %26 {offsets = [0, 0], sizes = [36, 384], strides = [1, 1]} : vector<40x384xf32> to vector<36x384xf32>
    %c0_20 = arith.constant 0 : index
    %c0_21 = arith.constant 0 : index
    %28 = vector.load %arg5[%c0_20, %c0_21] : memref<36x384xf32, #tpu.memory_space<vmem>>, vector<36x384xf32>
    tpu.vector_store %arg5[%c0_20, %c0_21], %27 {strides = array<i32>} : memref<36x384xf32, #tpu.memory_space<vmem>>, vector<36x384xf32>,
    return
  }
  func.func @transform_0(%arg0: i32) -> (i32, i32) {
    %c0_i32 = arith.constant 0 : i32
    %c0_i32_0 = arith.constant 0 : i32
    return %c0_i32, %arg0 : i32, i32
  }
  func.func @transform_1(%arg0: i32) -> (i32, i32) {
    %c0_i32 = arith.constant 0 : i32
    %c0_i32_0 = arith.constant 0 : i32
    %c0_i32_1 = arith.constant 0 : i32
    return %c0_i32, %c0_i32_0 : i32, i32
  }
  func.func @transform_2(%arg0: i32) -> (i32, i32) {
    %c0_i32 = arith.constant 0 : i32
    %c0_i32_0 = arith.constant 0 : i32
    %c0_i32_1 = arith.constant 0 : i32
    return %c0_i32, %c0_i32_0 : i32, i32
  }
  func.func @transform_3(%arg0: i32) -> (i32, i32) {
    %c0_i32 = arith.constant 0 : i32
    %c0_i32_0 = arith.constant 0 : i32
    %c0_i32_1 = arith.constant 0 : i32
    return %c0_i32, %c0_i32_0 : i32, i32
  }
  func.func @transform_4(%arg0: i32) -> (i32, i32) {
    %c0_i32 = arith.constant 0 : i32
    %c0_i32_0 = arith.constant 0 : i32
    return %c0_i32, %arg0 : i32, i32
  }
}

</mosaic_0001>

<bundles_post_ra>
// kernel: tpu_custom_call.1
= control target key start
LH: loop header
LB: loop body
LE: loop exit
PB: predicated region body
PF: predicated region fallthrough
CT: control target
= control target key end

     0   :  { %v2138_v0 = vmov 0   ;;  %v2139_v18 = vmov 0.0   ;;  %s4508_s1 = inlined_call_operand.vmem [shape: f32[40,1], index: 1, kind: input, shape index: {}]   ;;  %s4509_s2 = inlined_call_operand.vmem [shape: f32[40,1], index: 2, kind: input, shape index: {}]   ;;  %s4510_s0 = inlined_call_operand.vmem [shape: f32[4,384], index: 0, kind: input, shape index: {}]   ;;  %s4511_s3 = inlined_call_operand.vmem [shape: f32[40,1], index: 3, kind: input, shape index: {}]   ;;  %s4512_s4 = inlined_call_operand.vmem [shape: f32[384,36], index: 4, kind: output, shape index: {}]  }
   0x1   :  { %2071 = vset.pattern.permute.xlu1 %v2138_v0  ;;  %2070 = vset.pattern.permute.xlu0 %v2138_v0  ;;  %v73_v1 = vld [vmem:[%s4508_s1 + $0x8] sm:$0xff]  ;;  %v72_v2 = vld [vmem:[%s4508_s1] sm:$0xff]  ;;  %v74_v3 = vld [vmem:[%s4508_s1 + $0x10] sm:$0xff]  ;;  %54 = vst [vmem:[#allocation2 + $0x60] sm:$0xf0] %v2139_v18 }
   0x2   :  { %84 = vperm.xlu1 %2071, %v73_v1   ;;  %79 = vperm.xlu0 %2070, %v72_v2   ;;  %v117_v4 = vld [vmem:[%s4509_s2] sm:$0xff]  ;;  %v18_v6 = vld [vmem:[%s4510_s0 + $0x8] sm:$0xf]  ;;  %v75_v7 = vld [vmem:[%s4508_s1 + $0x18] sm:$0xff]  ;;  %55 = vst [vmem:[#allocation2 + $0x68] sm:$0xf0] %v2139_v18 }
   0x3   :  { %v17_v5 = vld [vmem:[%s4510_s0] sm:$0xff]  ;;  %v118_v8 = vld [vmem:[%s4509_s2 + $0x8] sm:$0xff]  ;;  %v27_v11 = vcombine.low %v18_v6, %v18_v6  ;;  %35 = vst [vmem:[#allocation2 + $0x28] sm:$0xf] %v18_v6  ;;  %25 = vst [vmem:[#allocation2 + $0x10] sm:$0xf] %v18_v6 }
   0x4   :  { %v21_v9 = vcombine.high %v17_v5, %v17_v5  ;;  %v26_v10 = vcombine.low %v17_v5, %v17_v5  ;;  %33 = vst [vmem:[#allocation2 + $0x18] sm:$0xf] %v17_v5  ;;  %37 = vst [vmem:[#allocation2 + $0x20] sm:$0xf0] %v17_v5  ;;  %v76_v12 = vld [vmem:[%s4508_s1 + $0x20] sm:$0xff]  ;;  %v119_v13 = vld [vmem:[%s4509_s2 + $0x10] sm:$0xff] }
   0x5   :  { %23 = vst [vmem:[#allocation2] sm:$0xf] %v17_v5  ;;  %31 = vst [vmem:[#allocation2 + $0x8] sm:$0xf0] %v17_v5  ;;  %v121_v14 = vld [vmem:[%s4509_s2 + $0x20] sm:$0xff]  ;;  %v120_v15 = vld [vmem:[%s4509_s2 + $0x18] sm:$0xff] }
   0x6   :  { %89 = vperm.xlu1 %2071, %v74_v3   ;;  %124 = vperm.xlu0 %2070, %v117_v4   ;;  %39 = vst [vmem:[#allocation2 + $0x30] sm:$0xf] %v17_v5  ;;  %41 = vst [vmem:[#allocation2 + $0x40] sm:$0xf] %v18_v6  ;;  %v1723_v16 = vld [vmem:[%s4511_s3 + $0x8] sm:$0xff]  ;;  %v1722_v17 = vld [vmem:[%s4511_s3] sm:$0xff] }
   0x7   :  { %43 = vst [vmem:[#allocation2 + $0x38] sm:$0xf0] %v17_v5  ;;  %45 = vst [vmem:[#allocation2 + $0x48] sm:$0xf] %v17_v5  ;;  %v1725_v19 = vld [vmem:[%s4511_s3 + $0x18] sm:$0xff]  ;;  %v1724_v20 = vld [vmem:[%s4511_s3 + $0x10] sm:$0xff] }
   0x8   :  { %47 = vst [vmem:[#allocation2 + $0x58] sm:$0xf] %v18_v6  ;;  %49 = vst [vmem:[#allocation2 + $0x50] sm:$0xf0] %v17_v5  ;;  %v1726_v21 = vld [vmem:[%s4511_s3 + $0x20] sm:$0xff] }
   0x9   :  { %51 = vst [vmem:[#allocation2 + $0x60] sm:$0xf] %v17_v5  ;;  %53 = vst [vmem:[#allocation2 + $0x70] sm:$0xf] %v18_v6 }
   0xa   :  { %34 = vst [vmem:[#allocation2 + $0x20] sm:$0xf] %v21_v9  ;;  %36 = vst [vmem:[#allocation2 + $0x18] sm:$0xf0] %v26_v10  ;;  %94 = vperm.xlu1 %2071, %v75_v7   ;;  %129 = vperm.xlu0 %2070, %v118_v8  }
   0xb   :  { %38 = vst [vmem:[#allocation2 + $0x28] sm:$0xf0] %v27_v11  ;;  %24 = vst [vmem:[#allocation2 + $0x8] sm:$0xf] %v21_v9 }
   0xc   :  { %30 = vst [vmem:[#allocation2] sm:$0xf0] %v26_v10  ;;  %32 = vst [vmem:[#allocation2 + $0x10] sm:$0xf0] %v27_v11 }
   0xd   :  { %40 = vst [vmem:[#allocation2 + $0x38] sm:$0xf] %v21_v9  ;;  %42 = vst [vmem:[#allocation2 + $0x30] sm:$0xf0] %v26_v10 }
   0xe   :  { %44 = vst [vmem:[#allocation2 + $0x40] sm:$0xf0] %v27_v11  ;;  %46 = vst [vmem:[#allocation2 + $0x50] sm:$0xf] %v21_v9  ;;  %99 = vperm.xlu1 %2071, %v76_v12   ;;  %134 = vperm.xlu0 %2070, %v119_v13  }
   0xf   :  { %48 = vst [vmem:[#allocation2 + $0x48] sm:$0xf0] %v26_v10  ;;  %50 = vst [vmem:[#allocation2 + $0x58] sm:$0xf0] %v27_v11 }
  0x10   :  { %52 = vst [vmem:[#allocation2 + $0x68] sm:$0xf] %v21_v9  ;;  %56 = vst [vmem:[#allocation2 + $0x70] sm:$0xf0] %v2139_v18 }
  0x11   :  { %v60_v48 = vld [vmem:[#allocation2 + $0x18] sm:$0xff]  ;;  %v61_v52 = vld [vmem:[#allocation2 + $0x20] sm:$0xff] }
  0x12   :  { %144 = vperm.xlu1 %2071, %v121_v14   ;;  %139 = vperm.xlu0 %2070, %v120_v15   ;;  %v62_v24 = vld [vmem:[#allocation2 + $0x28] sm:$0xff] }
  0x13   :  { %v59_v23 = vld [vmem:[#allocation2 + $0x10] sm:$0xff]  ;;  %v57_v38 = vld [vmem:[#allocation2] sm:$0xff]  ;;  %v58_v39 = vld [vmem:[#allocation2 + $0x8] sm:$0xff] }
  0x14   :  { %v63_v63 = vld [vmem:[#allocation2 + $0x30] sm:$0xff]  ;;  %v64_v12 = vld [vmem:[#allocation2 + $0x38] sm:$0xff] }
  0x15   :  { %v65_v33 = vld [vmem:[#allocation2 + $0x40] sm:$0xff] }
  0x16   :  { %1734 = vperm.xlu1 %2071, %v1723_v16   ;;  %1729 = vperm.xlu0 %2070, %v1722_v17   ;;  %v68_v9 = vld [vmem:[#allocation2 + $0x58] sm:$0xff] }
  0x17   :  { %v71_v44 = vld [vmem:[#allocation2 + $0x70] sm:$0xff] }
  0x1a   :  { %1744 = vperm.xlu1 %2071, %v1725_v19   ;;  %1739 = vperm.xlu0 %2070, %v1724_v20  }
  0x1e   :  { %1749 = vperm.xlu0 %2070, %v1726_v21   ;;  %v66_v21 = vld [vmem:[#allocation2 + $0x48] sm:$0xff] }
  0x81   :  { %v80_v22 = vpop.permute.xlu0 %79  ;;  %v85_v27 = vpop.permute.xlu1 %84 }
  0x82   :  { %v104_v25 = vmul.f32 %v80_v22, %v59_v23  ;;  %v107_v29 = vmul.f32 %v85_v27, %v62_v24  ;;  %v102_v41 = vmul.f32 %v80_v22, %v57_v38  ;;  %v103_v42 = vmul.f32 %v80_v22, %v58_v39  ;;  %v70_v38 = vld [vmem:[#allocation2 + $0x68] sm:$0xff] }
  0x83   :  { %v105_v53 = vmul.f32 %v85_v27, %v60_v48  ;;  %v106_v56 = vmul.f32 %v85_v27, %v61_v52  ;;  %v67_v27 = vld [vmem:[#allocation2 + $0x50] sm:$0xff] }
  0x85   :  { %v125_v26 = vpop.permute.xlu0 %124  ;;  %v90_v32 = vpop.permute.xlu1 %89 }
  0x86   :  { %v2222_v28 = vadd.f32 %v125_v26, %v104_v25  ;;  %v110_v36 = vmul.f32 %v90_v32, %v65_v33  ;;  %v2235_v43 = vadd.f32 %v125_v26, %v102_v41  ;;  %v2237_v45 = vadd.f32 %v125_v26, %v103_v42 }
  0x87   :  { %v108_v5 = vmul.f32 %v90_v32, %v63_v63  ;;  %v109_v20 = vmul.f32 %v90_v32, %v64_v12 }
  0x88   :  { %4641 = vst [vmem:[#allocation3_spill] sm:$0xff] %v2222_v28  ;;  %4644 = vst [vmem:[#allocation6_spill] sm:$0xff] %v2235_v43  ;;  %v165_v49 = vand.u32 2139095040, %v2235_v43  ;;  %v269_v50 = vand.u32 2139095040, %v2237_v45  ;;  %v373_v54 = vand.u32 2139095040, %v2222_v28 }
  0x89   :  { %v130_v30 = vpop.permute.xlu0 %129  ;;  %v2226_v34 = vpop.permute.xlu1 %94  ;;  %4645 = vst [vmem:[#allocation7_spill] sm:$0xff] %v2237_v45  ;;  %v4513_v24 = vand.u32 2147483647, %v2235_v43  ;;  %v4679_v28 = vmov 2131351028  }
  0x8a   :  { %v2224_v31 = vadd.f32 %v130_v30, %v107_v29  ;;  %v166_v55 = vshrl.u32 %v165_v49, 23  ;;  %v270_v57 = vshrl.u32 %v269_v50, 23  ;;  %v374_v58 = vshrl.u32 %v373_v54, 23 }
  0x8b   :  { %v2248_v59 = vadd.f32 %v130_v30, %v105_v53  ;;  %v2250_v62 = vadd.f32 %v130_v30, %v106_v56  ;;  %v113_v16 = vmul.f32 %v2226_v34, %v68_v9  ;;  %v2274_v32 = vmul.f32 %v2226_v34, %v66_v21 }
  0x8c   :  { %4642 = vst [vmem:[#allocation4_spill] sm:$0xff] %v2224_v31  ;;  %v1942_v60 = vadd.s32 4294967169, %v166_v55  ;;  %v1946_v61 = vadd.s32 4294967169, %v270_v57  ;;  %v1950_v0 = vadd.s32 4294967169, %v374_v58  ;;  %v685_v6 = vand.u32 2139095040, %v2224_v31 }
  0x8d   :  { %v2228_v35 = vpop.permute.xlu0 %134  ;;  %v2233_v40 = vpop.permute.xlu1 %99  ;;  %v477_v1 = vand.u32 2139095040, %v2248_v59  ;;  %v581_v4 = vand.u32 2139095040, %v2250_v62  ;;  %v2283_v48 = vand.u32 8388607, %v4513_v24 }
  0x8e   :  { %v2231_v37 = vadd.f32 %v2228_v35, %v110_v36  ;;  %v116_v47 = vmul.f32 %v2233_v40, %v71_v44  ;;  %v172_v2 = vadd.s32 1, %v1942_v60  ;;  %v276_v3 = vadd.s32 1, %v1946_v61  ;;  %v69_v36 = vld [vmem:[#allocation2 + $0x60] sm:$0xff] }
  0x8f   :  { %v380_v7 = vadd.s32 1, %v1950_v0  ;;  %v478_v8 = vshrl.u32 %v477_v1, 23  ;;  %v2256_v10 = vadd.f32 %v2228_v35, %v108_v5  ;;  %v582_v11 = vshrl.u32 %v581_v4, 23 }
  0x90   :  { %4643 = vst [vmem:[#allocation5_spill] sm:$0xff] %v2231_v37  ;;  %vm173_vm0 = vcmp.gt.s32.totalorder %v172_v2, 0  ;;  %vm277_vm1 = vcmp.gt.s32.totalorder %v276_v3, 0  ;;  %v686_v13 = vshrl.u32 %v685_v6, 23  ;;  %v2271_v39 = vadd.f32 %v2228_v35, %v109_v20 }
  0x91   :  { %v2239_v46 = vpop.permute.xlu1 %144  ;;  %4647 = vst [vmem:[#allocation9_spill] sm:$0xff] %v2256_v10  ;;  %v2258_v14 = vpop.permute.xlu0 %139  ;;  %v174_v15 = vsel %vm173_vm0, %v172_v2, 0  ;;  %vm381_vm2 = vcmp.gt.s32.totalorder %v380_v7, 0  ;;  %v1954_v17 = vadd.s32 4294967169, %v478_v8  ;;  %v278_v18 = vsel %vm277_vm1, %v276_v3, 0 }
  0x92   :  { %v2245_v51 = vadd.f32 %v2239_v46, %v116_v47  ;;  %v789_v19 = vand.u32 2139095040, %v2256_v10  ;;  %v1958_v22 = vadd.s32 4294967169, %v582_v11  ;;  %v2263_v23 = vadd.f32 %v2258_v14, %v113_v16  ;;  %4649 = vst [vmem:[#allocation11_spill] sm:$0xff] %v2271_v39 }
  0x93   :  { %v2266_v25 = vand.u32 31, %v174_v15  ;;  %v382_v26 = vsel %vm381_vm2, %v380_v7, 0  ;;  %v1962_v29 = vadd.s32 4294967169, %v686_v13  ;;  %v2268_v30 = vand.u32 31, %v278_v18 }
  0x94   :  { %4646 = vst [vmem:[#allocation8_spill] sm:$0xff] %v2245_v51  ;;  %4648 = vst [vmem:[#allocation10_spill] sm:$0xff] %v2263_v23  ;;  %v484_v33 = vadd.s32 1, %v1954_v17  ;;  %v790_v41 = vshrl.u32 %v789_v19, 23  ;;  %v2276_v42 = vand.u32 31, %v382_v26  ;;  %v2279_v44 = vmul.f32 %v2226_v34, %v67_v27 }
  0x95   :  { %v588_v47 = vadd.s32 1, %v1958_v22  ;;  %v2286_v49 = vsub.s32 32, %v2266_v25  ;;  %v692_v50 = vadd.s32 1, %v1962_v29  ;;  %v114_v35 = vmul.f32 %v2233_v40, %v69_v36 }
  0x96   :  { %4650 = vst [vmem:[#allocation12_spill] sm:$0xff] %v2276_v42  ;;  %v2290_v52 = vmul.f32 %v2233_v40, %v70_v38  ;;  %v2292_v53 = vshrl.u32 %v174_v15, 5  ;;  %v2295_v54 = vsub.s32 32, %v2268_v30  ;;  %vm485_vm3 = vcmp.gt.s32.totalorder %v484_v33, 0 }
  0x97   :  { %v893_v34 = vand.u32 2139095040, %v2271_v39  ;;  %v2298_v55 = vshrl.u32 %v278_v18, 5  ;;  %v2300_v56 = vshrl.u32 %v382_v26, 5  ;;  %v1966_v57 = vadd.s32 4294967169, %v790_v41 }
  0x98   :  { %v997_v58 = vand.u32 2139095040, %v2231_v37  ;;  %v4529_v60 = vmov 2102212464   ;;  %v4524_v61 = vmov 920167782   ;;  %v2308_v0 = vsub.s32 32, %v2276_v42 }
  0x99   :  { %4651 = vst [vmem:[#allocation13_spill] sm:$0xff] %v2300_v56  ;;  %v188_v40 = vshll.u32 %v4529_v60, %v2266_v25  ;;  %v191_v63 = vshll.u32 %v4524_v61, %v2266_v25  ;;  %vm589_vm4 = vcmp.gt.s32.totalorder %v588_v47, 0  ;;  %v189_v1 = vshrl.u32 %v4524_v61, %v2286_v49 }
  0x9a   :  { %4652 = vst [vmem:[#allocation14_spill] sm:$0xff] %v2308_v0  ;;  %v4531_v2 = vmov 1326507024   ;;  %v486_v4 = vsel %vm485_vm3, %v484_v33, 0  ;;  %vm693_vm5 = vcmp.gt.s32.totalorder %v692_v50, 0  ;;  %vm197_vm6 = vcmp.lt.s32.totalorder %v2292_v53, 4 }
  0x9b   :  { %v192_v3 = vshrl.u32 %v4531_v2, %v2286_v49  ;;  %v292_v5 = vshll.u32 %v4529_v60, %v2268_v30  ;;  %v293_v6 = vshrl.u32 %v4524_v61, %v2295_v54  ;;  %v894_v7 = vshrl.u32 %v893_v34, 23 }
  0x9c   :  { %v296_v8 = vshrl.u32 %v4531_v2, %v2295_v54  ;;  %v590_v9 = vsel %vm589_vm4, %v588_v47, 0  ;;  %v796_v11 = vadd.s32 1, %v1966_v57  ;;  %v998_v12 = vshrl.u32 %v997_v58, 23 }
  0x9d   :  { %v397_v13 = vshrl.u32 %v4524_v61, %v2308_v0  ;;  %v400_v15 = vshrl.u32 %v4531_v2, %v2308_v0  ;;  %v2325_v16 = vand.u32 31, %v486_v4  ;;  %v694_v17 = vsel %vm693_vm5, %v692_v50, 0 }
  0x9e   :  { %v2327_v18 = vor.u32 %v189_v1, %v188_v40  ;;  %v193_v19 = vor.u32 %v192_v3, %v191_v63  ;;  %v295_v20 = vshll.u32 %v4524_v61, %v2268_v30  ;;  %v396_v21 = vshll.u32 %v4529_v60, %v2276_v42 }
  0x9f   :  { %v2333_v22 = vor.u32 %v293_v6, %v292_v5  ;;  %v399_v26 = vshll.u32 %v4524_v61, %v2276_v42  ;;  %v2337_v27 = vand.u32 31, %v590_v9  ;;  %v1970_v29 = vadd.s32 4294967169, %v894_v7 }
  0xa0   :  { %v297_v33 = vor.u32 %v296_v8, %v295_v20  ;;  %v2339_v36 = vand.u32 31, %v694_v17  ;;  %vm797_vm7 = vcmp.gt.s32.totalorder %v796_v11, 0  ;;  %v1974_v38 = vadd.s32 4294967169, %v998_v12 }
  0xa1   :  { %4653 = vst [vmem:[#allocation15_spill] sm:$0xff] %v2333_v22  ;;  %vm301_vm8 = vcmp.lt.s32.totalorder %v2298_v55, 4  ;;  %v2342_v41 = vor.u32 %v397_v13, %v396_v21  ;;  %v401_v47 = vor.u32 %v400_v15, %v399_v26  ;;  %v2345_v50 = vsub.s32 32, %v2325_v16 }
  0xa2   :  { %4654 = vst [vmem:[#allocation16_spill] sm:$0xff] %v2339_v36  ;;  %v2350_v34 = vsel %vm197_vm6, %v2327_v18, 920167782  ;;  %v2354_v57 = vsel %vm197_vm6, %v193_v19, 1326507024  ;;  %vm405_vm9 = vcmp.lt.s32.totalorder %v2300_v56, 4  ;;  %v2390_v13 = vadd.f32 %v2239_v46, %v2290_v52 }
  0xa3   :  { %4655 = vst [vmem:[#allocation17_spill] sm:$0xff] %v2342_v41  ;;  %v2357_v58 = vshrl.u32 %v486_v4, 5  ;;  %v2362_v40 = vsel %vm301_vm8, %v2333_v22, 920167782  ;;  %v2365_v63 = vsub.s32 32, %v2337_v27  ;;  %v798_v1 = vsel %vm797_vm7, %v796_v11, 0 }
  0xa4   :  { %v900_v3 = vadd.s32 1, %v1970_v29  ;;  %v2369_v5 = vsel %vm301_vm8, %v297_v33, 1326507024  ;;  %v2372_v6 = vsub.s32 32, %v2339_v36  ;;  %v1004_v7 = vadd.s32 1, %v1974_v38  ;;  %4661 = vst [vmem:[#allocation23_spill] sm:$0xff] %v2390_v13 }
  0xa5   :  { %4656 = vst [vmem:[#allocation18_spill] sm:$0xff] %v2369_v5  ;;  %v2375_v4 = vadd.f32 %v2239_v46, %v114_v35  ;;  %v2380_v8 = vsel %vm405_vm9, %v2342_v41, 920167782  ;;  %v2384_v11 = vsel %vm405_vm9, %v401_v47, 1326507024  ;;  %v501_v12 = vshrl.u32 %v4524_v61, %v2345_v50 }
  0xa6   :  { %4657 = vst [vmem:[#allocation19_spill] sm:$0xff] %v2372_v6  ;;  %4659 = vst [vmem:[#allocation21_spill] sm:$0xff] %v2380_v8  ;;  %v500_v35 = vshll.u32 %v4529_v60, %v2325_v16  ;;  %v503_v15 = vshll.u32 %v4524_v61, %v2325_v16  ;;  %vm509_vm10 = vcmp.lt.s32.totalorder %v2357_v58, 4  ;;  %v2397_v19 = vand.u32 31, %v798_v1 }
  0xa7   :  { %4658 = vst [vmem:[#allocation20_spill] sm:$0xff] %v2375_v4  ;;  %4660 = vst [vmem:[#allocation22_spill] sm:$0xff] %v2384_v11  ;;  %v504_v20 = vshrl.u32 %v4531_v2, %v2345_v50  ;;  %v2401_v21 = vshrl.u32 %v590_v9, 5  ;;  %v605_v26 = vshrl.u32 %v4524_v61, %v2365_v63  ;;  %vm901_vm11 = vcmp.gt.s32.totalorder %v900_v3, 0 }
  0xa8   :  { %4662 = vst [vmem:[#allocation24_spill] sm:$0xff] %v2397_v19  ;;  %v608_v46 = vshrl.u32 %v4531_v2, %v2365_v63  ;;  %v709_v52 = vshrl.u32 %v4524_v61, %v2372_v6  ;;  %vm1005_vm12 = vcmp.gt.s32.totalorder %v1004_v7, 0  ;;  %v1413_v29 = vand.u32 2139095040, %v2375_v4 }
  0xa9   :  { %v2410_v33 = vor.u32 %v501_v12, %v500_v35  ;;  %v604_v38 = vshll.u32 %v4529_v60, %v2337_v27  ;;  %v607_v9 = vshll.u32 %v4524_v61, %v2337_v27  ;;  %v1517_v47 = vand.u32 2139095040, %v2390_v13 }
  0xaa   :  { %v708_v24 = vshll.u32 %v4529_v60, %v2339_v36  ;;  %v712_v37 = vshrl.u32 %v4531_v2, %v2372_v6  ;;  %v2422_v39 = vsub.s32 32, %v2397_v19  ;;  %v902_v4 = vsel %vm901_vm11, %v900_v3, 0 }
  0xab   :  { %v505_v12 = vor.u32 %v504_v20, %v503_v15  ;;  %v2424_v35 = vor.u32 %v605_v26, %v604_v38  ;;  %v2426_v10 = vshrl.u32 %v694_v17, 5  ;;  %v1006_v43 = vsel %vm1005_vm12, %v1004_v7, 0 }
  0xac   :  { %4663 = vst [vmem:[#allocation25_spill] sm:$0xff] %v2422_v39  ;;  %v609_v8 = vor.u32 %v608_v46, %v607_v9  ;;  %v2428_v61 = vor.u32 %v709_v52, %v708_v24  ;;  %v4666_v13 = vmov 920167782   ;;  %v1414_v60 = vshrl.u32 %v1413_v29, 23 }
  0xad   :  { %4664 = vst [vmem:[#allocation26_spill] sm:$0xff] %v2426_v10  ;;  %v711_v41 = vshll.u32 %v4666_v13, %v2339_v36  ;;  %v2435_v2 = vsel %vm509_vm10, %v2410_v33, 920167782  ;;  %vm613_vm13 = vcmp.lt.s32.totalorder %v2401_v21, 4  ;;  %v2438_v3 = vand.u32 31, %v902_v4 }
  0xae   :  { %4665 = vst [vmem:[#allocation27_spill] sm:$0xff] %v2428_v61  ;;  %v1518_v15 = vshrl.u32 %v1517_v47, 23  ;;  %v2440_v20 = vshrl.u32 %v798_v1, 5  ;;  %v813_v24 = vshrl.u32 %v4666_v13, %v2422_v39  ;;  %v2444_v7 = vand.u32 31, %v1006_v43 }
  0xaf   :  { %4667 = vst [vmem:[#allocation28_spill] sm:$0xff] %v2438_v3  ;;  %v713_v17 = vor.u32 %v712_v37, %v711_v41  ;;  %v519_v26 = vsel %vm509_vm10, %v505_v12, 1326507024  ;;  %v2451_v46 = vsel %vm613_vm13, %v2424_v35, 920167782  ;;  %vm717_vm14 = vcmp.lt.s32.totalorder %v2426_v10, 4 }
  0xb0   :  { %4668 = vst [vmem:[#allocation29_spill] sm:$0xff] %v2440_v20  ;;  %4669 = vst [vmem:[#allocation30_spill] sm:$0xff] %v2444_v7  ;;  %v4670_v52 = vmov 1326507024   ;;  %v2458_v41 = vsel %vm613_vm13, %v609_v8, 1326507024  ;;  %v815_v47 = vshll.u32 %v4666_v13, %v2397_v19  ;;  %v497_v36 = vshll.u32 %v4679_v28, %v2325_v16 }
  0xb1   :  { %v816_v37 = vshrl.u32 %v4670_v52, %v2422_v39  ;;  %v2463_v1 = vsel %vm717_vm14, %v2428_v61, 920167782  ;;  %v4672_v29 = vmov 2102212464   ;;  %v1990_v9 = vadd.s32 4294967169, %v1414_v60 }
  0xb2   :  { %4671 = vst [vmem:[#allocation31_spill] sm:$0xff] %v2463_v1  ;;  %v812_v38 = vshll.u32 %v4672_v29, %v2397_v19  ;;  %v2469_v12 = vshrl.u32 %v902_v4, 5  ;;  %v2472_v39 = vsub.s32 32, %v2438_v3  ;;  %v1994_v11 = vadd.s32 4294967169, %v1518_v15 }
  0xb3   :  { %v2476_v8 = vsel %vm717_vm14, %v713_v17, 1326507024  ;;  %vm821_vm15 = vcmp.lt.s32.totalorder %v2440_v20, 4  ;;  %v2482_v61 = vsub.s32 32, %v2444_v7  ;;  %v817_v60 = vor.u32 %v816_v37, %v815_v47 }
  0xb4   :  { %4673 = vst [vmem:[#allocation32_spill] sm:$0xff] %v2469_v12  ;;  %4674 = vst [vmem:[#allocation33_spill] sm:$0xff] %v2472_v39  ;;  %v2478_v56 = vor.u32 %v813_v24, %v812_v38  ;;  %v916_v4 = vshll.u32 %v4672_v29, %v2438_v3  ;;  %v919_v19 = vshll.u32 %v4666_v13, %v2438_v3  ;;  %v1420_v1 = vadd.s32 1, %v1990_v9 }
  0xb5   :  { %4675 = vst [vmem:[#allocation34_spill] sm:$0xff] %v2476_v8  ;;  %4677 = vst [vmem:[#allocation36_spill] sm:$0xff] %v2482_v61  ;;  %v4544_v10 = vmov 2475754826   ;;  %v4546_v24 = vmov 2131351028   ;;  %v498_v37 = vshrl.u32 %v4672_v29, %v2345_v50  ;;  %v917_v47 = vshrl.u32 %v4666_v13, %v2472_v39 }
  0xb6   :  { %4676 = vst [vmem:[#allocation35_spill] sm:$0xff] %v2478_v56  ;;  %v492_v17 = vshrl.u32 %v4544_v10, %v2345_v50  ;;  %v495_v38 = vshrl.u32 %v4546_v24, %v2345_v50  ;;  %v920_v3 = vshrl.u32 %v4670_v52, %v2472_v39  ;;  %vm925_vm0 = vcmp.lt.s32.totalorder %v2469_v12, 4 }
  0xb7   :  { %v1524_v9 = vadd.s32 1, %v1994_v11  ;;  %v1621_v15 = vand.u32 2139095040, %v2245_v51  ;;  %v1021_v10 = vshrl.u32 %v4666_v13, %v2482_v61  ;;  %v4560_v8 = vmov 683565275  }
  0xb8   :  { %v491_v24 = vshll.u32 %v4560_v8, %v2325_v16  ;;  %v4678_v42 = vmov 2475754826   ;;  %v2512_v39 = vsel %vm821_vm15, %v2478_v56, 920167782  ;;  %v2516_v11 = vsel %vm821_vm15, %v817_v60, 1326507024 }
  0xb9   :  { %v494_v0 = vshll.u32 %v4678_v42, %v2325_v16  ;;  %4680 = vst [vmem:[#allocation37_spill] sm:$0xff] %v2512_v39  ;;  %4681 = vst [vmem:[#allocation38_spill] sm:$0xff] %v2516_v11  ;;  %v1020_v51 = vshll.u32 %v4672_v29, %v2444_v7  ;;  %v4682_v8 = vand.u32 2147483647, %v2248_v59  ;;  %vm1421_vm1 = vcmp.gt.s32.totalorder %v1420_v1, 0 }
  0xba   :  { %v2522_v31 = vor.u32 %v492_v17, %v491_v24  ;;  %v499_v16 = vor.u32 %v498_v37, %v497_v36  ;;  %v2526_v5 = vor.u32 %v917_v47, %v916_v4  ;;  %v2528_v56 = vshrl.u32 %v1006_v43, 5 }
  0xbb   :  { %v481_v6 = vand.u32 8388607, %v4682_v8  ;;  %v2524_v22 = vor.u32 %v495_v38, %v494_v0  ;;  %v1023_v60 = vshll.u32 %v4666_v13, %v2444_v7  ;;  %v1622_v39 = vshrl.u32 %v1621_v15, 23 }
  0xbc   :  { %4683 = vst [vmem:[#allocation39_spill] sm:$0xff] %v2526_v5  ;;  %4684 = vst [vmem:[#allocation40_spill] sm:$0xff] %v2528_v56  ;;  %v921_v11 = vor.u32 %v920_v3, %v919_v19  ;;  %v2532_v20 = vor.u32 %v1021_v10, %v1020_v51  ;;  %v1024_v8 = vshrl.u32 %v4670_v52, %v2482_v61  ;;  %vm1525_vm2 = vcmp.gt.s32.totalorder %v1524_v9, 0 }
  0xbd   :  { %v1422_v17 = vsel %vm1421_vm1, %v1420_v1, 0  ;;  %v482_v24 = vor.u32 8388608, %v481_v6  ;;  %vm506_vm3 = vcmp.lt.s32.totalorder %v2357_v58, 1  ;;  %vm508_vm4 = vcmp.lt.s32.totalorder %v2357_v58, 3 }
  0xbe   :  { %4685 = vst [vmem:[#allocation41_spill] sm:$0xff] %v2532_v20  ;;  %v514_v43 = vsel %vm506_vm3, %v2522_v31, %v2524_v22  ;;  %v516_v51 = vsel %vm508_vm4, %v499_v16, %v2435_v2  ;;  %v518_v10 = vsel %vm506_vm3, %v2524_v22, %v499_v16  ;;  %v520_v0 = vsel %vm508_vm4, %v2410_v33, %v519_v26 }
  0xbf   :  { %v1526_v36 = vsel %vm1525_vm2, %v1524_v9, 0  ;;  %v1998_v6 = vadd.s32 4294967169, %v1622_v39  ;;  %v2553_v19 = vadd.f32 %v2258_v14, %v2274_v32  ;;  %v2557_v3 = vadd.f32 %v2258_v14, %v2279_v44 }
  0xc0   :  { %v2562_v2 = vsel %vm925_vm0, %v2526_v5, 920167782  ;;  %v2566_v1 = vsel %vm925_vm0, %v921_v11, 1326507024  ;;  %vm4609_vm5 = vcmp.lt.s32.totalorder %v2528_v56, 4  ;;  %vm507_vm7 = vcmp.lt.s32.totalorder %v2357_v58, 2 }
  0xc1   :  { %4686 = vst [vmem:[#allocation42_spill] sm:$0xff] %v2562_v2  ;;  %4687 = vst [vmem:[#allocation43_spill] sm:$0xff] %v2566_v1  ;;  %v1025_v39 = vor.u32 %v1024_v8, %v1023_v60  ;;  %v2570_v32 = vshrl.u32 %v1422_v17, 5  ;;  %v517_v14 = vsel %vm507_vm7, %v514_v43, %v516_v51  ;;  %v521_v44 = vsel %vm507_vm7, %v518_v10, %v520_v0 }
  0xc2   :  { %v2576_v33 = vand.u32 31, %v1422_v17  ;;  %v2578_v26 = vshrl.u32 %v1526_v36, 5  ;;  %v2580_v4 = vand.u32 31, %v1526_v36  ;;  %v2582_v15 = vshll.u32 %v482_v24, 8 }
  0xc3   :  { %4688 = vst [vmem:[#allocation44_spill] sm:$0xff] %v2570_v32  ;;  %v2587_v38 = vsel %vm4609_vm5, %v2532_v20, 920167782  ;;  %v1628_v37 = vadd.s32 1, %v1998_v6  ;;  %v1101_v47 = vand.u32 2139095040, %v2553_v19  ;;  %v1205_v9 = vand.u32 2139095040, %v2557_v3 }
  0xc4   :  { %4689 = vst [vmem:[#allocation45_spill] sm:$0xff] %v2576_v33  ;;  %4690 = vst [vmem:[#allocation46_spill] sm:$0xff] %v2578_v26  ;;  %v2592_v11 = vmul.u32.u64.low %v2582_v15, %v521_v44  ;;  %v2593_v60 = vmul.u32.u64.high %v2582_v15, %v521_v44, %v2592_v11  ;;  %v2596_v8 = vmul.u32.u64.low %v2582_v15, %v517_v14  ;;  %v2597_v17 = vmul.u32.u64.high %v2582_v15, %v517_v14, %v2596_v8 }
  0xc5   :  { %4691 = vst [vmem:[#allocation47_spill] sm:$0xff] %v2580_v4  ;;  %4692 = vst [vmem:[#allocation48_spill] sm:$0xff] %v2587_v38  ;;  %v596_v43 = vshrl.u32 %v4678_v42, %v2365_v63  ;;  %v599_v51 = vshrl.u32 %v4679_v28, %v2365_v63  ;;  %v602_v10 = vshrl.u32 %v4672_v29, %v2365_v63  ;;  %v2609_v0 = vsel %vm4609_vm5, %v1025_v39, 1326507024 }
  0xc6   :  { %4693 = vst [vmem:[#allocation49_spill] sm:$0xff] %v2609_v0  ;;  %v2612_v36 = vsub.s32 32, %v2576_v33  ;;  %v1436_v6 = vshll.u32 %v4672_v29, %v2576_v33  ;;  %v2617_v14 = vsub.s32 32, %v2580_v4  ;;  %v1102_v44 = vshrl.u32 %v1101_v47, 23 }
  0xc7   :  { %v4696_v11 = vmov 683565275   ;;  %v598_v20 = vshll.u32 %v4678_v42, %v2337_v27  ;;  %v601_v39 = vshll.u32 %v4679_v28, %v2337_v27  ;;  %vm1629_vm11 = vcmp.gt.s32.totalorder %v1628_v37, 0 }
  0xc8   :  { %4694 = vst [vmem:[#allocation50_spill] sm:$0xff] %v2612_v36  ;;  %4695 = vst [vmem:[#allocation51_spill] sm:$0xff] %v2617_v14  ;;  %v595_v24 = vshll.u32 %v4696_v11, %v2337_v27  ;;  %v1206_v0 = vshrl.u32 %v1205_v9, 23  ;;  %v490_v38 = vshrl.u32 %v4696_v11, %v2345_v50  ;;  %v511_v56 = vsel %vm509_vm10, %v499_v16, 2102212464 }
  0xc9   :  { %v4697_v61 = vand.u32 2147483647, %v2250_v62  ;;  %v2633_v2 = vor.u32 %v599_v51, %v598_v20  ;;  %v603_v5 = vor.u32 %v602_v10, %v601_v39  ;;  %v1437_v1 = vshrl.u32 %v4666_v13, %v2612_v36 }
  0xca   :  { %v2631_v7 = vor.u32 %v596_v43, %v595_v24  ;;  %v1439_v27 = vshll.u32 %v4666_v13, %v2576_v33  ;;  %v1440_v50 = vshrl.u32 %v4670_v52, %v2612_v36  ;;  %v1541_v16 = vshrl.u32 %v4666_v13, %v2617_v14 }
  0xcb   :  { %v585_v47 = vand.u32 8388607, %v4697_v61  ;;  %v1630_v9 = vsel %vm1629_vm11, %v1628_v37, 0  ;;  %v1978_v12 = vadd.s32 4294967169, %v1102_v44  ;;  %v510_v61 = vsel %vm506_vm3, %v490_v38, %v2522_v31 }
  0xcc   :  { %v512_v20 = vsel %vm508_vm4, %v2524_v22, %v511_v56  ;;  %v1982_v24 = vadd.s32 4294967169, %v1206_v0  ;;  %v532_v43 = vadd.s32 1, %v2597_v17  ;;  %vm610_vm10 = vcmp.lt.s32.totalorder %v2401_v21, 1 }
  0xcd   :  { %vm612_vm12 = vcmp.lt.s32.totalorder %v2401_v21, 3  ;;  %vm531_vm1 = vc.u32 %v2593_v60, %v2596_v8  ;;  %v586_v37 = vor.u32 8388608, %v585_v47  ;;  %v618_v31 = vsel %vm610_vm10, %v2631_v7, %v2633_v2 }
  0xce   :  { %v620_v56 = vsel %vm612_vm12, %v603_v5, %v2451_v46  ;;  %v2661_v22 = vand.u32 31, %v1630_v9  ;;  %v513_v38 = vsel %vm507_vm7, %v510_v61, %v512_v20  ;;  %v622_v51 = vsel %vm610_vm10, %v2633_v2, %v603_v5 }
  0xcf   :  { %v624_v10 = vsel %vm612_vm12, %v2424_v35, %v2458_v41  ;;  %v1540_v0 = vshll.u32 %v4672_v29, %v2580_v4  ;;  %v1543_v46 = vshll.u32 %v4666_v13, %v2580_v4  ;;  %v1108_v44 = vadd.s32 1, %v1978_v12 }
  0xd0   :  { %4698 = vst [vmem:[#allocation52_spill] sm:$0xff] %v2661_v22  ;;  %vm611_vm2 = vcmp.lt.s32.totalorder %v2401_v21, 2  ;;  %v1544_v58 = vshrl.u32 %v4670_v52, %v2617_v14  ;;  %v1212_v39 = vadd.s32 1, %v1982_v24  ;;  %v533_v47 = vsel %vm531_vm1, %v532_v43, %v2597_v17 }
  0xd1   :  { %v621_v61 = vsel %vm611_vm2, %v618_v31, %v620_v56  ;;  %v1309_v35 = vand.u32 2139095040, %v2263_v23  ;;  %v529_v41 = vmul.u32 %v2582_v15, %v513_v38  ;;  %v625_v20 = vsel %vm611_vm2, %v622_v51, %v624_v10 }
  0xd2   :  { %v2686_v4 = vshll.u32 %v586_v37, 8  ;;  %v2688_v12 = vor.u32 %v1437_v1, %v1436_v6  ;;  %v1441_v33 = vor.u32 %v1440_v50, %v1439_v27  ;;  %v2690_v36 = vor.u32 %v1541_v16, %v1540_v0 }
  0xd3   :  { %v2693_v24 = vsub.s32 32, %v2661_v22  ;;  %vm1109_vm3 = vcmp.gt.s32.totalorder %v1108_v44, 0  ;;  %v2695_v17 = vadd.s32 %v533_v47, %v529_v41  ;;  %v1545_v15 = vor.u32 %v1544_v58, %v1543_v46 }
  0xd4   :  { %4699 = vst [vmem:[#allocation53_spill] sm:$0xff] %v2688_v12  ;;  %4700 = vst [vmem:[#allocation54_spill] sm:$0xff] %v2690_v36  ;;  %v2698_v43 = vmul.u32.u64.low %v2686_v4, %v621_v61  ;;  %v2699_v31 = vmul.u32.u64.high %v2686_v4, %v621_v61, %v2698_v43  ;;  %vm1213_vm4 = vcmp.gt.s32.totalorder %v1212_v39, 0  ;;  %vm1445_vm7 = vcmp.lt.s32.totalorder %v2570_v32, 4 }
  0xd5   :  { %4701 = vst [vmem:[#allocation55_spill] sm:$0xff] %v2693_v24  ;;  %v2703_v37 = vmul.u32.u64.low %v2686_v4, %v625_v20  ;;  %v2704_v1 = vmul.u32.u64.high %v2686_v4, %v625_v20, %v2703_v37  ;;  %vm4608_vm11 = vcmp.lt.s32.totalorder %v2578_v26, 4  ;;  %v2708_v6 = vshrl.u32 %v1630_v9, 5 }
  0xd6   :  { %v1310_v27 = vshrl.u32 %v1309_v35, 23  ;;  %v2713_v50 = vsel %vm1445_vm7, %v2688_v12, 920167782  ;;  %v2717_v16 = vsel %vm1445_vm7, %v1441_v33, 1326507024  ;;  %v1645_v56 = vshrl.u32 %v4666_v13, %v2693_v24 }
  0xd7   :  { %4702 = vst [vmem:[#allocation56_spill] sm:$0xff] %v2708_v6  ;;  %4703 = vst [vmem:[#allocation57_spill] sm:$0xff] %v2713_v50  ;;  %v1110_v38 = vsel %vm1109_vm3, %v1108_v44, 0  ;;  %v2723_v51 = vshrl.u32 %v4670_v52, %v2693_v24  ;;  %v1214_v9 = vsel %vm1213_vm4, %v1212_v39, 0  ;;  %v535_v10 = vadd.s32 536870912, %v2695_v17 }
  0xd8   :  { %4704 = vst [vmem:[#allocation58_spill] sm:$0xff] %v2717_v16  ;;  %v615_v0 = vsel %vm613_vm13, %v603_v5, 2102212464  ;;  %v2731_v46 = vsel %vm4608_vm11, %v2690_v36, 920167782  ;;  %v1644_v44 = vshll.u32 %v4672_v29, %v2661_v22  ;;  %v594_v58 = vshrl.u32 %v4696_v11, %v2365_v63 }
  0xd9   :  { %4705 = vst [vmem:[#allocation59_spill] sm:$0xff] %v2723_v51  ;;  %4706 = vst [vmem:[#allocation60_spill] sm:$0xff] %v2731_v46  ;;  %v2735_v33 = vsel %vm4608_vm11, %v1545_v15, 1326507024  ;;  %v2743_v39 = vshll.u32 %v4666_v13, %v2661_v22  ;;  %vm1653_vm13 = vcmp.lt.s32.totalorder %v2708_v6, 4  ;;  %v2746_v5 = vand.u32 31, %v1110_v38 }
  0xda   :  { %4707 = vst [vmem:[#allocation61_spill] sm:$0xff] %v2735_v33  ;;  %v1986_v47 = vadd.s32 4294967169, %v1310_v27  ;;  %v2748_v61 = vor.u32 %v1645_v56, %v1644_v44  ;;  %v2750_v35 = vand.u32 31, %v1214_v9  ;;  %v614_v41 = vsel %vm610_vm10, %v594_v58, %v2631_v7 }
  0xdb   :  { %4708 = vst [vmem:[#allocation62_spill] sm:$0xff] %v2743_v39  ;;  %v616_v63 = vsel %vm612_vm12, %v2633_v2, %v615_v0  ;;  %v2760_v15 = vshrl.u32 %v1110_v38, 5  ;;  %v2762_v37 = vshrl.u32 %v535_v10, 30  ;;  %v636_v27 = vadd.s32 1, %v2699_v31 }
  0xdc   :  { %4709 = vst [vmem:[#allocation63_spill] sm:$0xff] %v2748_v61  ;;  %vm635_vm1 = vc.u32 %v2704_v1, %v2698_v43  ;;  %v180_v56 = vshrl.u32 %v4678_v42, %v2286_v49  ;;  %v183_v7 = vshrl.u32 %v4679_v28, %v2286_v49  ;;  %v186_v2 = vshrl.u32 %v4672_v29, %v2286_v49 }
  0xdd   :  { %v2774_v0 = vsub.s32 32, %v2746_v5  ;;  %v2776_v38 = vshrl.u32 %v1214_v9, 5  ;;  %v1316_v10 = vadd.s32 1, %v1986_v47  ;;  %v617_v44 = vsel %vm611_vm2, %v614_v41, %v616_v63 }
  0xde   :  { %v2781_v58 = vsub.s32 32, %v2750_v35  ;;  %v179_v20 = vshll.u32 %v4696_v11, %v2266_v25  ;;  %v182_v22 = vshll.u32 %v4678_v42, %v2266_v25  ;;  %v185_v24 = vshll.u32 %v4679_v28, %v2266_v25 }
  0xdf   :  { %v2792_v9 = vsel %vm1653_vm13, %v2748_v61, 920167782  ;;  %v1124_v21 = vshll.u32 %v4672_v29, %v2746_v5  ;;  %v537_v47 = vshll.u32 %v2762_v37, 30  ;;  %v637_v41 = vsel %vm635_vm1, %v636_v27, %v2699_v31 }
  0xe0   :  { %4710 = vst [vmem:[#allocation64_spill] sm:$0xff] %v2792_v9  ;;  %v633_v63 = vmul.u32 %v2686_v4, %v617_v44  ;;  %v2799_v46 = vor.u32 %v180_v56, %v179_v20  ;;  %v2801_v36 = vor.u32 %v183_v7, %v182_v22  ;;  %v187_v33 = vor.u32 %v186_v2, %v185_v24 }
  0xe1   :  { %v1125_v25 = vshrl.u32 %v4666_v13, %v2774_v0  ;;  %v1127_v9 = vshll.u32 %v4666_v13, %v2746_v5  ;;  %v1228_v61 = vshll.u32 %v4672_v29, %v2750_v35  ;;  %v2811_v26 = vshll.u32 %v4666_v13, %v2750_v35 }
  0xe2   :  { %v1128_v4 = vshrl.u32 %v4670_v52, %v2774_v0  ;;  %v1229_v22 = vshrl.u32 %v4666_v13, %v2781_v58  ;;  %vm1317_vm10 = vcmp.gt.s32.totalorder %v1316_v10, 0  ;;  %v2817_v24 = vadd.s32 %v637_v41, %v633_v63 }
  0xe3   :  { %v2820_v31 = vsub.s32 %v2695_v17, %v537_v47  ;;  %vm194_vm12 = vcmp.lt.s32.totalorder %v2292_v53, 1  ;;  %vm196_vm2 = vcmp.lt.s32.totalorder %v2292_v53, 3  ;;  %v4599_v20 = vand.u32 2147483647, %v2237_v45 }
  0xe4   :  { %v170_v27 = vor.u32 8388608, %v2283_v48  ;;  %v202_v56 = vsel %vm194_vm12, %v2799_v46, %v2801_v36  ;;  %v204_v7 = vsel %vm196_vm2, %v187_v33, %v2350_v34  ;;  %v208_v17 = vsel %vm196_vm2, %v2327_v18, %v2354_v57 }
  0xe5   :  { %vm1133_vm3 = vcmp.lt.s32.totalorder %v2760_v15, 4  ;;  %v206_v48 = vsel %vm194_vm12, %v2801_v36, %v187_v33  ;;  %v284_v2 = vshrl.u32 %v4678_v42, %v2295_v54  ;;  %v287_v44 = vshrl.u32 %v4679_v28, %v2295_v54 }
  0xe6   :  { %v290_v34 = vshrl.u32 %v4672_v29, %v2295_v54  ;;  %v1232_v47 = vshrl.u32 %v4670_v52, %v2781_v58  ;;  %v1318_v18 = vsel %vm1317_vm10, %v1316_v10, 0  ;;  %v639_v57 = vadd.s32 536870912, %v2817_v24 }
  0xe7   :  { %vm195_vm4 = vcmp.lt.s32.totalorder %v2292_v53, 2  ;;  %v273_v41 = vand.u32 8388607, %v4599_v20  ;;  %v283_v63 = vshll.u32 %v4696_v11, %v2268_v30  ;;  %v286_v14 = vshll.u32 %v4678_v42, %v2268_v30 }
  0xe8   :  { %v289_v50 = vshll.u32 %v4679_v28, %v2268_v30  ;;  %v2860_v12 = vor.u32 %v1125_v25, %v1124_v21  ;;  %v540_v10 = vsub.s32 0, %v2820_v31  ;;  %v205_v16 = vsel %vm195_vm4, %v202_v56, %v204_v7 }
  0xe9   :  { %v209_v32 = vsel %vm195_vm4, %v206_v48, %v208_v17  ;;  %vm1237_vm1 = vcmp.lt.s32.totalorder %v2776_v38, 4  ;;  %v2868_v20 = vshll.u32 %v170_v27, 8  ;;  %v285_v23 = vor.u32 %v284_v2, %v283_v63  ;;  %v4718_v2 = vld [vmem:[#allocation15_spill] sm:$0xff] }
  0xea   :  { %v288_v6 = vor.u32 %v287_v44, %v286_v14  ;;  %v291_v39 = vor.u32 %v290_v34, %v289_v50  ;;  %v1129_v51 = vor.u32 %v1128_v4, %v1127_v9  ;;  %v2870_v45 = vshrl.u32 %v1318_v18, 5 }
  0xeb   :  { %v2872_v30 = vand.u32 31, %v1318_v18  ;;  %v2874_v21 = vshrl.u32 %v639_v57, 30  ;;  %v2876_v25 = vor.u32 %v1229_v22, %v1228_v61  ;;  %v274_v17 = vor.u32 8388608, %v273_v41 }
  0xec   :  { %4711 = vst [vmem:[#allocation65_spill] sm:$0xff] %v2870_v45  ;;  %v2879_v56 = vmul.u32.u64.low %v2868_v20, %v205_v16  ;;  %v2880_v7 = vmul.u32.u64.high %v2868_v20, %v205_v16, %v2879_v56  ;;  %v2884_v27 = vmul.u32.u64.low %v2868_v20, %v209_v32  ;;  %v2885_v48 = vmul.u32.u64.high %v2868_v20, %v209_v32, %v2884_v27  ;;  %v4728_v45 = vld [vmem:[#allocation14_spill] sm:$0xff] }
  0xed   :  { %4712 = vst [vmem:[#allocation66_spill] sm:$0xff] %v2872_v30  ;;  %4713 = vst [vmem:[#allocation67_spill] sm:$0xff] %v2874_v21  ;;  %vm298_vm10 = vcmp.lt.s32.totalorder %v2298_v55, 1  ;;  %vm300_vm11 = vcmp.lt.s32.totalorder %v2298_v55, 3  ;;  %v1233_v14 = vor.u32 %v1232_v47, %v2811_v26  ;;  %v1955_v50 = vmin.u32 %v540_v10, %v2820_v31 }
  0xee   :  { %4714 = vst [vmem:[#allocation68_spill] sm:$0xff] %v2876_v25  ;;  %4715 = vst [vmem:[#allocation69_spill] sm:$0xff] %v2879_v56  ;;  %v306_v61 = vsel %vm298_vm10, %v285_v23, %v288_v6  ;;  %v308_v16 = vsel %vm300_vm11, %v291_v39, %v2362_v40  ;;  %v2899_v32 = vsel %vm1133_vm3, %v2860_v12, 920167782  ;;  %v2903_v9 = vsel %vm1133_vm3, %v1129_v51, 1326507024 }
  0xef   :  { %4716 = vst [vmem:[#allocation70_spill] sm:$0xff] %v2885_v48  ;;  %v641_v26 = vshll.u32 %v2874_v21, 30  ;;  %v310_v4 = vsel %vm298_vm10, %v288_v6, %v291_v39  ;;  %v199_v22 = vsel %vm197_vm6, %v187_v33, 2102212464  ;;  %vm299_vm5 = vcmp.lt.s32.totalorder %v2298_v55, 2  ;;  %v4717_v40 = vld [vmem:[#allocation18_spill] sm:$0xff] }
  0xf0   :  { %v312_v44 = vsel %vm300_vm11, %v4718_v2, %v4717_v40  ;;  %v2915_v34 = vshll.u32 %v274_v17, 8  ;;  %v2918_v51 = vsub.s32 32, %v2872_v30  ;;  %v178_v47 = vshrl.u32 %v4696_v11, %v2286_v49  ;;  %v4729_v55 = vld [vmem:[#allocation12_spill] sm:$0xff] }
  0xf1   :  { %v309_v18 = vsel %vm299_vm5, %v306_v61, %v308_v16  ;;  %v313_v33 = vsel %vm299_vm5, %v310_v4, %v312_v44  ;;  %v2928_v57 = vshll.u32 %v4672_v29, %v2872_v30  ;;  %v542_v41 = vclz %v1955_v50 }
  0xf2   :  { %4719 = vst [vmem:[#allocation18_spill] sm:$0xff] %v2918_v51  ;;  %v2931_v63 = vmul.u32.u64.low %v2915_v34, %v313_v33  ;;  %v2932_v10 = vmul.u32.u64.high %v2915_v34, %v313_v33, %v2931_v63  ;;  %v2937_v17 = vsel %vm1237_vm1, %v2876_v25, 920167782  ;;  %v2940_v49 = vsub.s32 %v2817_v24, %v641_v26 }
  0xf3   :  { %v198_v27 = vsel %vm194_vm12, %v178_v47, %v2799_v46  ;;  %v200_v50 = vsel %vm196_vm2, %v2801_v36, %v199_v22  ;;  %v2950_v61 = vsel %vm1237_vm1, %v1233_v14, 1326507024  ;;  %v220_v16 = vadd.s32 1, %v2880_v7  ;;  %v4724_v47 = vld [vmem:[#allocation4_spill] sm:$0xff] }
  0xf4   :  { %4720 = vst [vmem:[#allocation15_spill] sm:$0xff] %v2932_v10  ;;  %v2954_v4 = vmul.u32.u64.low %v2915_v34, %v309_v18  ;;  %v2955_v40 = vmul.u32.u64.high %v2915_v34, %v309_v18, %v2954_v4  ;;  %v2960_v24 = vshrl.u32 %v4666_v13, %v2918_v51  ;;  %v2964_v46 = vshll.u32 %v4666_v13, %v2872_v30 }
  0xf5   :  { %vm219_vm6 = vc.u32 %v2885_v48, %v2879_v56  ;;  %v303_v36 = vsel %vm301_vm8, %v291_v39, 2102212464  ;;  %v2972_v14 = vshrl.u32 %v4670_v52, %v2918_v51  ;;  %v1956_v26 = vadd.s32 4294967294, %v542_v41  ;;  %v4725_v39 = vld [vmem:[#allocation19_spill] sm:$0xff] }
  0xf6   :  { %4721 = vst [vmem:[#allocation71_spill] sm:$0xff] %v2954_v4  ;;  %4722 = vst [vmem:[#allocation72_spill] sm:$0xff] %v2964_v46  ;;  %v201_v22 = vsel %vm195_vm4, %v198_v27, %v200_v50  ;;  %v282_v2 = vshrl.u32 %v4696_v11, %v2295_v54  ;;  %v2980_v13 = vadd.s32 %v2596_v8, %v2593_v60  ;;  %v644_v44 = vsub.s32 0, %v2940_v49  ;;  %v4726_v8 = vld [vmem:[#allocation16_spill] sm:$0xff] }
  0xf7   :  { %4723 = vst [vmem:[#allocation73_spill] sm:$0xff] %v2972_v14  ;;  %v4615_v18 = vand.u32 2147483647, %v4724_v47  ;;  %v2986_v33 = vshrl.u32 %v4696_v11, %v4725_v39  ;;  %v700_v52 = vshrl.u32 %v4678_v42, %v4725_v39  ;;  %v221_v53 = vsel %vm219_vm6, %v220_v16, %v2880_v7 }
  0xf8   :  { %v302_v54 = vsel %vm298_vm10, %v282_v2, %v285_v23  ;;  %v304_v60 = vsel %vm300_vm11, %v288_v6, %v303_v36  ;;  %v699_v41 = vshll.u32 %v4696_v11, %v4726_v8  ;;  %v702_v63 = vshll.u32 %v4678_v42, %v4726_v8  ;;  %v4727_v23 = vld [vmem:[#allocation3_spill] sm:$0xff] }
  0xf9   :  { %v217_v27 = vmul.u32 %v2868_v20, %v201_v22  ;;  %v324_v50 = vadd.s32 1, %v2955_v40  ;;  %vm1957_vm8 = vcmp.lt.s32.totalorder %v1956_v26, 0  ;;  %v703_v7 = vshrl.u32 %v4679_v28, %v4725_v39 }
  0xfa   :  { %vm323_vm12 = vc.u32 %v2932_v10, %v2954_v4  ;;  %v1959_v6 = vmin.u32 %v644_v44, %v2940_v49  ;;  %v689_v36 = vand.u32 8388607, %v4615_v18  ;;  %v305_v20 = vsel %vm299_vm5, %v302_v54, %v304_v60 }
  0xfb   :  { %v3009_v2 = vadd.s32 %v221_v53, %v217_v27  ;;  %v3013_v22 = vor.u32 %v700_v52, %v699_v41  ;;  %v705_v51 = vshll.u32 %v4679_v28, %v4726_v8  ;;  %v706_v30 = vshrl.u32 %v4672_v29, %v4725_v39 }
  0xfc   :  { %v391_v16 = vshrl.u32 %v4679_v28, %v4728_v45  ;;  %v3021_v44 = vsel %vm1957_vm8, 0, %v1956_v26  ;;  %v325_v18 = vsel %vm323_vm12, %v324_v50, %v2955_v40  ;;  %v388_v53 = vshrl.u32 %v4678_v42, %v4728_v45 }
  0xfd   :  { %v390_v52 = vshll.u32 %v4678_v42, %v4729_v55  ;;  %v321_v54 = vmul.u32 %v2915_v34, %v305_v20  ;;  %v4730_v60 = vand.u32 2147483647, %v4727_v23  ;;  %v393_v39 = vshll.u32 %v4679_v28, %v4729_v55  ;;  %v4731_v23 = vld [vmem:[#allocation26_spill] sm:$0xff] }
  0xfe   :  { %v394_v26 = vshrl.u32 %v4672_v29, %v4728_v45  ;;  %v646_v41 = vclz %v1959_v6  ;;  %v223_v40 = vadd.s32 536870912, %v3009_v2  ;;  %v387_v27 = vshll.u32 %v4696_v11, %v4729_v55  ;;  %v4732_v6 = vld [vmem:[#allocation13_spill] sm:$0xff] }
  0xff   :  { %v377_v8 = vand.u32 8388607, %v4730_v60  ;;  %v392_v50 = vor.u32 %v391_v16, %v390_v52  ;;  %v704_v47 = vor.u32 %v703_v7, %v702_v63  ;;  %v707_v14 = vor.u32 %v706_v30, %v705_v51  ;;  %v4733_v51 = vld [vmem:[#allocation22_spill] sm:$0xff]  ;;  %v4735_v16 = vld [vmem:[#allocation31_spill] sm:$0xff] }
 0x100   :  { %v326_v46 = vadd.s32 %v325_v18, %v321_v54  ;;  %v395_v34 = vor.u32 %v394_v26, %v393_v39  ;;  %v690_v20 = vor.u32 8388608, %v689_v36  ;;  %vm714_vm5 = vcmp.lt.s32.totalorder %v4731_v23, 1  ;;  %v4734_v18 = vld [vmem:[#allocation17_spill] sm:$0xff] }
 0x101   :  { %vm716_vm11 = vcmp.lt.s32.totalorder %v4731_v23, 3  ;;  %v389_v60 = vor.u32 %v388_v53, %v387_v27  ;;  %v550_v4 = vsub.s32 4294967266, %v3021_v44  ;;  %v378_v10 = vor.u32 8388608, %v377_v8  ;;  %v4736_v8 = vld [vmem:[#allocation21_spill] sm:$0xff] }
 0x102   :  { %vm402_vm2 = vcmp.lt.s32.totalorder %v4732_v6, 1  ;;  %vm404_vm4 = vcmp.lt.s32.totalorder %v4732_v6, 3  ;;  %v1960_v56 = vadd.s32 4294967294, %v646_v41  ;;  %v3043_v55 = vshrl.u32 %v223_v40, 30  ;;  %v4737_v41 = vld [vmem:[#allocation34_spill] sm:$0xff]  ;;  %v4738_v40 = vld [vmem:[#allocation27_spill] sm:$0xff] }
 0x103   :  { %v414_v30 = vsel %vm402_vm2, %v392_v50, %v395_v34  ;;  %v416_v63 = vsel %vm404_vm4, %v4734_v18, %v4733_v51  ;;  %vm715_vm10 = vcmp.lt.s32.totalorder %v4731_v23, 2  ;;  %v722_v7 = vsel %vm714_vm5, %v3013_v22, %v704_v47 }
 0x104   :  { %v724_v36 = vsel %vm716_vm11, %v707_v14, %v4735_v16  ;;  %v327_v53 = vadd.s32 536870912, %v326_v46  ;;  %v726_v52 = vsel %vm714_vm5, %v704_v47, %v707_v14  ;;  %vm403_vm6 = vcmp.lt.s32.totalorder %v4732_v6, 2 }
 0x105   :  { %v410_v54 = vsel %vm402_vm2, %v389_v60, %v392_v50  ;;  %v412_v39 = vsel %vm404_vm4, %v395_v34, %v4736_v8  ;;  %v551_v26 = vadd.s32 127, %v550_v4  ;;  %v728_v27 = vsel %vm716_vm11, %v4738_v40, %v4737_v41 }
 0x106   :  { %v417_v51 = vsel %vm403_vm6, %v414_v30, %v416_v63  ;;  %v418_v18 = vshll.u32 %v378_v10, 8  ;;  %vm1961_vm8 = vcmp.lt.s32.totalorder %v1960_v56, 0  ;;  %v225_v16 = vshll.u32 %v3043_v55, 30 }
 0x107   :  { %v386_v48 = vshrl.u32 %v4696_v11, %v4728_v45  ;;  %v407_v21 = vsel %vm405_vm9, %v395_v34, 2102212464  ;;  %v3077_v8 = vshrl.u32 %v327_v53, 30  ;;  %v413_v4 = vsel %vm403_vm6, %v410_v54, %v412_v39 }
 0x108   :  { %v3081_v25 = vmul.u32.u64.low %v418_v18, %v417_v51  ;;  %v3082_v41 = vmul.u32.u64.high %v418_v18, %v417_v51, %v3081_v25  ;;  %v719_v10 = vsel %vm717_vm14, %v707_v14, 2102212464  ;;  %v725_v30 = vsel %vm715_vm10, %v722_v7, %v724_v36 }
 0x109   :  { %v729_v45 = vsel %vm715_vm10, %v726_v52, %v728_v27  ;;  %v3090_v63 = vshll.u32 %v690_v20, 8  ;;  %v546_v34 = vsub.s32 32, %v3021_v44  ;;  %v552_v53 = vshll.u32 %v551_v26, 23 }
 0x10a   :  { %v406_v54 = vsel %vm402_vm2, %v386_v48, %v389_v60  ;;  %v408_v25 = vsel %vm404_vm4, %v392_v50, %v407_v21  ;;  %v3098_v39 = vsel %vm1961_vm8, 0, %v1960_v56  ;;  %v3101_v14 = vsub.s32 %v3009_v2, %v225_v16 }
 0x10b   :  { %v3103_v7 = vmul.u32.u64.low %v418_v18, %v413_v4  ;;  %v3104_v36 = vmul.u32.u64.high %v418_v18, %v413_v4, %v3103_v7  ;;  %v3109_v52 = vmul.u32.u64.low %v3090_v63, %v729_v45  ;;  %v3110_v26 = vmul.u32.u64.high %v3090_v63, %v729_v45, %v3109_v52 }
 0x10c   :  { %v329_v48 = vshll.u32 %v3077_v8, 30  ;;  %v718_v21 = vsel %vm714_vm5, %v2986_v33, %v3013_v22  ;;  %v3118_v56 = vmul.u32.u64.low %v3090_v63, %v725_v30  ;;  %v3119_v2 = vmul.u32.u64.high %v3090_v63, %v725_v30, %v3118_v56 }
 0x10d   :  { %4739 = vst [vmem:[#allocation19_spill] sm:$0xff] %v3103_v7  ;;  %4740 = vst [vmem:[#allocation16_spill] sm:$0xff] %v3110_v26  ;;  %v409_v50 = vsel %vm403_vm6, %v406_v54, %v408_v25  ;;  %v548_v60 = vshrl.u32 %v2980_v13, %v546_v34  ;;  %v654_v40 = vsub.s32 4294967266, %v3098_v39  ;;  %v720_v27 = vsel %vm716_vm11, %v704_v47, %v719_v10 }
 0x10e   :  { %4741 = vst [vmem:[#allocation14_spill] sm:$0xff] %v3118_v56  ;;  %vm427_vm9 = vc.u32 %v3082_v41, %v3103_v7  ;;  %v553_v51 = vor.u32 4788187, %v552_v53  ;;  %v228_v33 = vsub.s32 0, %v3101_v14  ;;  %v428_v22 = vadd.s32 1, %v3104_v36 }
 0x10f   :  { %v4627_v16 = vand.u32 2147483647, %v2553_v19  ;;  %v3133_v4 = vsub.s32 %v326_v46, %v329_v48  ;;  %v425_v6 = vmul.u32 %v418_v18, %v409_v50  ;;  %v1116_v13 = vshrl.u32 %v4678_v42, %v2774_v0 }
 0x110   :  { %v1119_v30 = vshrl.u32 %v4679_v28, %v2774_v0  ;;  %v429_v47 = vsel %vm427_vm9, %v428_v22, %v3104_v36  ;;  %v1118_v10 = vshll.u32 %v4678_v42, %v2746_v5  ;;  %v1121_v45 = vshll.u32 %v4679_v28, %v2746_v5 }
 0x111   :  { %v1122_v34 = vshrl.u32 %v4672_v29, %v2774_v0  ;;  %v547_v46 = vshll.u32 %v2820_v31, %v3021_v44  ;;  %v650_v18 = vsub.s32 32, %v3098_v39  ;;  %v655_v53 = vadd.s32 127, %v654_v40 }
 0x112   :  { %v430_v54 = vadd.s32 %v429_v47, %v425_v6  ;;  %v1105_v25 = vand.u32 8388607, %v4627_v16  ;;  %v1115_v36 = vshll.u32 %v4696_v11, %v2746_v5  ;;  %v1120_v52 = vor.u32 %v1119_v30, %v1118_v10 }
 0x113   :  { %v1123_v48 = vor.u32 %v1122_v34, %v1121_v45  ;;  %v549_v50 = vor.u32 %v548_v60, %v547_v46  ;;  %v634_v22 = vadd.s32 %v2698_v43, %v2704_v1  ;;  %v332_v20 = vsub.s32 0, %v3133_v4 }
 0x114   :  { %v431_v7 = vadd.s32 536870912, %v430_v54  ;;  %vm476_vm14 = vcmp.lt.s32.totalorder %v2248_v59, 0  ;;  %v554_v31 = vand.u32 2147483647, %v553_v51  ;;  %v3159_v44 = vsel %vm715_vm10, %v718_v21, %v720_v27 }
 0x115   :  { %v1943_v40 = vmin.u32 %v228_v33, %v3101_v14  ;;  %v1117_v6 = vor.u32 %v1116_v13, %v1115_v36  ;;  %v652_v5 = vshrl.u32 %v634_v22, %v650_v18  ;;  %vm1130_vm12 = vcmp.lt.s32.totalorder %v2760_v15, 1 }
 0x116   :  { %v3162_v30 = vshrl.u32 %v431_v7, 30  ;;  %vm1132_vm5 = vcmp.lt.s32.totalorder %v2760_v15, 3  ;;  %v656_v43 = vshll.u32 %v655_v53, 23  ;;  %v1106_v1 = vor.u32 8388608, %v1105_v25 }
 0x117   :  { %v1142_v60 = vsel %vm1130_vm12, %v1120_v52, %v1123_v48  ;;  %v1144_v23 = vsel %vm1132_vm5, %v2860_v12, %v2903_v9  ;;  %v556_v21 = vcvt.s32.f32 %v549_v50  ;;  %v651_v27 = vshll.u32 %v2940_v49, %v3098_v39 }
 0x118   :  { %v1947_v7 = vmin.u32 %v332_v20, %v3133_v4  ;;  %v433_v51 = vshll.u32 %v3162_v30, 30  ;;  %v230_v33 = vclz %v1943_v40  ;;  %vm1131_vm11 = vcmp.lt.s32.totalorder %v2760_v15, 2 }
 0x119   :  { %v1138_v13 = vsel %vm1130_vm12, %v1117_v6, %v1120_v52  ;;  %v1140_v47 = vsel %vm1132_vm5, %v1123_v48, %v2899_v32  ;;  %v557_v10 = vmul.f32 %v556_v21, %v554_v31  ;;  %vm739_vm2 = vc.u32 %v3110_v26, %v3118_v56 }
 0x11a   :  { %v740_v12 = vadd.s32 1, %v3119_v2  ;;  %v1145_v9 = vsel %vm1131_vm11, %v1142_v60, %v1144_v23  ;;  %v653_v49 = vor.u32 %v652_v5, %v651_v27  ;;  %v657_v39 = vor.u32 4788187, %v656_v43 }
 0x11b   :  { %v1135_v20 = vsel %vm1133_vm3, %v1123_v48, 2102212464  ;;  %v1146_v45 = vshll.u32 %v1106_v1, 8  ;;  %v334_v34 = vclz %v1947_v7  ;;  %v3189_v46 = vsub.s32 %v430_v54, %v433_v51 }
 0x11c   :  { %v1114_v32 = vshrl.u32 %v4696_v11, %v2774_v0  ;;  %v1141_v18 = vsel %vm1131_vm11, %v1138_v13, %v1140_v47  ;;  %v4742_v53 = vand.u32 2147483647, %v2248_v59  ;;  %v1944_v36 = vadd.s32 4294967294, %v230_v33 }
 0x11d   :  { %v3201_v50 = vmul.u32.u64.low %v1146_v45, %v1145_v9  ;;  %v3202_v22 = vmul.u32.u64.high %v1146_v45, %v1145_v9, %v3201_v50  ;;  %v4626_v48 = vand.u32 2147483647, %v2557_v3  ;;  %v3207_v54 = vor.u32 %v2960_v24, %v2928_v57 }
 0x11e   :  { %vm3197_vm4 = vcmp.le.f32.partialorder %v4742_v53, 0.7853982  ;;  %v4745_v0 = vsub.s32 4, %v2762_v37  ;;  %v1134_v40 = vsel %vm1130_vm12, %v1114_v32, %v1117_v6  ;;  %v1136_v5 = vsel %vm1132_vm5, %v1120_v52, %v1135_v20 }
 0x11f   :  { %v737_v43 = vmul.u32 %v3090_v63, %v3159_v44  ;;  %v741_v57 = vsel %vm739_vm2, %v740_v12, %v3119_v2  ;;  %v3224_v24 = vmul.u32.u64.low %v1146_v45, %v1141_v18  ;;  %v3225_v1 = vmul.u32.u64.high %v1146_v45, %v1141_v18, %v3224_v24 }
 0x120   :  { %v561_v31 = vsel %vm476_vm14, %v4745_v0, %v2762_v37  ;;  %v558_v60 = vxor.u32 2147483648, %v557_v10  ;;  %v660_v37 = vcvt.s32.f32 %v653_v49  ;;  %v1948_v23 = vadd.s32 4294967294, %v334_v34 }
 0x121   :  { %v436_v6 = vsub.s32 0, %v3189_v46  ;;  %v658_v21 = vand.u32 2147483647, %v657_v39  ;;  %vm1945_vm3 = vcmp.lt.s32.totalorder %v1944_v36, 0  ;;  %v1137_v52 = vsel %vm1131_vm11, %v1134_v40, %v1136_v5  ;;  %v4764_v40 = vld [vmem:[#allocation56_spill] sm:$0xff] }
 0x122   :  { %v1209_v63 = vand.u32 8388607, %v4626_v48  ;;  %vm1155_vm10 = vc.u32 %v3202_v22, %v3224_v24  ;;  %v1219_v2 = vshll.u32 %v4696_v11, %v2750_v35  ;;  %v1220_v44 = vshrl.u32 %v4678_v42, %v2781_v58 }
 0x123   :  { %v1223_v27 = vshrl.u32 %v4679_v28, %v2781_v58  ;;  %v1156_v7 = vadd.s32 1, %v3225_v1  ;;  %v1222_v15 = vshll.u32 %v4678_v42, %v2750_v35  ;;  %v1225_v51 = vshll.u32 %v4679_v28, %v2750_v35 }
 0x124   :  { %v1226_v33 = vshrl.u32 %v4672_v29, %v2781_v58  ;;  %v3248_v13 = vsel %vm1945_vm3, 0, %v1944_v36  ;;  %vm1949_vm6 = vcmp.lt.s32.totalorder %v1948_v23, 0  ;;  %v1951_v47 = vmin.u32 %v436_v6, %v3189_v46 }
 0x125   :  { %v1153_v12 = vmul.u32 %v1146_v45, %v1137_v52  ;;  %vm580_vm8 = vcmp.lt.s32.totalorder %v2250_v62, 0  ;;  %v1157_v9 = vsel %vm1155_vm10, %v1156_v7, %v3225_v1  ;;  %v1221_v49 = vor.u32 %v1220_v44, %v1219_v2  ;;  %v4749_v1 = vld [vmem:[#allocation68_spill] sm:$0xff]  ;;  %v4750_v52 = vld [vmem:[#allocation67_spill] sm:$0xff] }
 0x126   :  { %v1224_v39 = vor.u32 %v1223_v27, %v1222_v15  ;;  %v1227_v20 = vor.u32 %v1226_v33, %v1225_v51  ;;  %v563_v34 = vsel %vm3197_vm4, 0, %v561_v31  ;;  %v661_v35 = vmul.f32 %v660_v37, %v658_v21 }
 0x127   :  { %v3255_v32 = vadd.s32 %v741_v57, %v737_v43  ;;  %v1158_v18 = vadd.s32 %v1157_v9, %v1153_v12  ;;  %v559_v53 = vsel %vm476_vm14, %v558_v60, %v557_v10  ;;  %v238_v36 = vsub.s32 4294967266, %v3248_v13 }
 0x128   :  { %v3260_v45 = vsel %vm1949_vm6, 0, %v1948_v23  ;;  %v1210_v50 = vor.u32 8388608, %v1209_v63  ;;  %v4746_v0 = vand.u32 2147483647, %v2250_v62  ;;  %v438_v5 = vclz %v1951_v47 }
 0x129   :  { %v1159_v31 = vadd.s32 536870912, %v1158_v18  ;;  %vm1234_vm12 = vcmp.lt.s32.totalorder %v2776_v38, 1  ;;  %vm1236_vm5 = vcmp.lt.s32.totalorder %v2776_v38, 3  ;;  %v662_v37 = vxor.u32 2147483648, %v661_v35 }
 0x12a   :  { %vm3264_vm9 = vcmp.le.f32.partialorder %v4746_v0, 0.7853982  ;;  %v1242_v10 = vsel %vm1234_vm12, %v1221_v49, %v1224_v39  ;;  %v1244_v43 = vsel %vm1236_vm5, %v1227_v20, %v2937_v17  ;;  %v1246_v57 = vsel %vm1234_vm12, %v1224_v39, %v1227_v20 }
 0x12b   :  { %v1248_v60 = vsel %vm1236_vm5, %v4749_v1, %v2950_v61  ;;  %v743_v23 = vadd.s32 536870912, %v3255_v32  ;;  %v3282_v6 = vshrl.u32 %v1159_v31, 30  ;;  %vm1235_vm14 = vcmp.lt.s32.totalorder %v2776_v38, 2  ;;  %v4753_v31 = vld [vmem:[#allocation69_spill] sm:$0xff] }
 0x12c   :  { %v567_v21 = vadd.s32 3, %v563_v34  ;;  %v664_v63 = vsub.s32 4, %v4750_v52  ;;  %v1249_v17 = vsel %vm1235_vm14, %v1246_v57, %v1248_v60  ;;  %v1250_v2 = vshll.u32 %v1210_v50, 8 }
 0x12d   :  { %v562_v44 = vsel %vm3197_vm4, %v2248_v59, %v559_v53  ;;  %v239_v27 = vadd.s32 127, %v238_v36  ;;  %v342_v61 = vsub.s32 4294967266, %v3260_v45  ;;  %v1245_v7 = vsel %vm1235_vm14, %v1242_v10, %v1244_v43 }
 0x12e   :  { %v1952_v15 = vadd.s32 4294967294, %v438_v5  ;;  %v1239_v51 = vsel %vm1237_vm1, %v1227_v20, 2102212464  ;;  %v3296_v33 = vmul.u32.u64.low %v1250_v2, %v1249_v17  ;;  %v3297_v47 = vmul.u32.u64.high %v1250_v2, %v1249_v17, %v3296_v33  ;;  %v4754_v17 = vld [vmem:[#allocation15_spill] sm:$0xff] }
 0x12f   :  { %v663_v12 = vsel %vm580_vm8, %v662_v37, %v661_v35  ;;  %v3301_v9 = vshrl.u32 %v743_v23, 30  ;;  %v1161_v25 = vshll.u32 %v3282_v6, 30  ;;  %v1218_v34 = vshrl.u32 %v4696_v11, %v2781_v58  ;;  %v4752_v58 = vld [vmem:[#allocation70_spill] sm:$0xff] }
 0x130   :  { %2075 = vcosq.f32 %v562_v44  ;;  %v234_v53 = vsub.s32 32, %v3248_v13  ;;  %v3307_v36 = vmul.u32.u64.low %v1250_v2, %v1245_v7  ;;  %v3308_v50 = vmul.u32.u64.high %v1250_v2, %v1245_v7, %v3307_v36  ;;  %v4757_v7 = vld [vmem:[#allocation73_spill] sm:$0xff]  ;;  %v4758_v33 = vld [vmem:[#allocation6_spill] sm:$0xff] }
 0x131   :  { %4751 = vst [vmem:[#allocation12_spill] sm:$0xff] %v3301_v9  ;;  %2077 = vsinq.f32 %v562_v44  ;;  %v343_v20 = vadd.s32 127, %v342_v61  ;;  %v1238_v0 = vsel %vm1234_vm12, %v1218_v34, %v1221_v49  ;;  %v1240_v35 = vsel %vm1236_vm5, %v1224_v39, %v1239_v51  ;;  %v4755_v44 = vld [vmem:[#allocation71_spill] sm:$0xff]  ;;  %v4756_v61 = vld [vmem:[#allocation72_spill] sm:$0xff] }
 0x132   :  { %v666_v5 = vsel %vm3264_vm9, %v2250_v62, %v663_v12  ;;  %v218_v10 = vadd.s32 %v4753_v31, %v4752_v58  ;;  %v240_v43 = vshll.u32 %v239_v27, 23  ;;  %vm1953_vm1 = vcmp.lt.s32.totalorder %v1952_v15, 0 }
 0x133   :  { %v665_v57 = vsel %vm580_vm8, %v664_v63, %v4750_v52  ;;  %v745_v1 = vshll.u32 %v3301_v9, 30  ;;  %v338_v49 = vsub.s32 32, %v3260_v45  ;;  %v3325_v60 = vsub.s32 %v1158_v18, %v1161_v25 }
 0x134   :  { %v236_v39 = vshrl.u32 %v218_v10, %v234_v53  ;;  %v1241_v37 = vsel %vm1235_vm14, %v1238_v0, %v1240_v35  ;;  %vm1259_vm11 = vc.u32 %v3297_v47, %v3307_v36  ;;  %v1260_v23 = vadd.s32 1, %v3308_v50 }
 0x135   :  { %2079 = vcosq.f32 %v666_v5  ;;  %v322_v27 = vadd.s32 %v4755_v44, %v4754_v17  ;;  %v344_v52 = vshll.u32 %v343_v20, 23  ;;  %v3334_v63 = vsel %vm1953_vm1, 0, %v1952_v15 }
 0x136   :  { %v1337_v18 = vor.u32 %v4757_v7, %v4756_v61  ;;  %2081 = vsinq.f32 %v666_v5  ;;  %v235_v38 = vshll.u32 %v3101_v14, %v3248_v13  ;;  %v241_v51 = vor.u32 4788187, %v240_v43 }
 0x137   :  { %vm164_vm2 = vcmp.lt.s32.totalorder %v4758_v33, 0  ;;  %v340_v12 = vshrl.u32 %v322_v27, %v338_v49  ;;  %v1164_v25 = vsub.s32 0, %v3325_v60  ;;  %v1257_v34 = vmul.u32 %v1250_v2, %v1241_v37  ;;  %v4760_v2 = vld [vmem:[#allocation7_spill] sm:$0xff] }
 0x138   :  { %v1261_v53 = vsel %vm1259_vm11, %v1260_v23, %v3308_v50  ;;  %v568_v0 = vand.u32 3, %v567_v21  ;;  %v667_v15 = vsel %vm3264_vm9, 0, %v665_v57  ;;  %v237_v20 = vor.u32 %v236_v39, %v235_v38  ;;  %v4761_v50 = vld [vmem:[#allocation59_spill] sm:$0xff]  ;;  %v4762_v21 = vld [vmem:[#allocation62_spill] sm:$0xff]  ;;  %v4766_v57 = vld [vmem:[#allocation65_spill] sm:$0xff] }
 0x139   :  { %v446_v35 = vsub.s32 4294967266, %v3334_v63  ;;  %v3347_v5 = vsub.s32 %v3255_v32, %v745_v1  ;;  %v339_v14 = vshll.u32 %v3133_v4, %v3260_v45  ;;  %v345_v13 = vor.u32 4788187, %v344_v52 }
 0x13a   :  { %v3351_v58 = vadd.s32 %v1261_v53, %v1257_v34  ;;  %v2076_v31 = vpop.eup %2075  ;;  %vm268_vm4 = vcmp.lt.s32.totalorder %v4760_v2, 0  ;;  %v4763_v10 = vor.u32 %v4761_v50, %v4762_v21  ;;  %vm1341_vm3 = vcmp.lt.s32.totalorder %v4766_v57, 4  ;;  %v4770_v50 = vld [vmem:[#allocation19_spill] sm:$0xff] }
 0x13b   :  { %4759 = vst [vmem:[#allocation26_spill] sm:$0xff] %v3347_v5  ;;  %v4767_v32 = vand.u32 2147483647, %v4758_v33  ;;  %v242_v4 = vand.u32 2147483647, %v241_v51  ;;  %v2078_v45 = vpop.eup %2077  ;;  %v341_v37 = vor.u32 %v340_v12, %v339_v14  ;;  %v1979_v23 = vmin.u32 %v1164_v25, %v3325_v60 }
 0x13c   :  { %v3359_v43 = vsel %vm1653_vm13, %v4763_v10, 1326507024  ;;  %v3371_v49 = vsel %vm1341_vm3, %v3207_v54, 920167782  ;;  %v3375_v39 = vsel %vm1341_vm3, %v1337_v18, 1326507024  ;;  %v244_v44 = vcvt.s32.f32 %v237_v20 }
 0x13d   :  { %4765 = vst [vmem:[#allocation13_spill] sm:$0xff] %v3359_v43  ;;  %vm3364_vm10 = vcmp.le.f32.partialorder %v4767_v32, 0.7853982  ;;  %vm569_vm6 = vcmp.lt.s32.totalorder %v568_v0, 2  ;;  %v671_v17 = vadd.s32 3, %v667_v15  ;;  %v248_v27 = vsub.s32 4, %v3043_v55 }
 0x13e   :  { %v447_v52 = vadd.s32 127, %v446_v35  ;;  %v748_v61 = vsub.s32 0, %v3347_v5  ;;  %v346_v7 = vand.u32 2147483647, %v345_v13  ;;  %v352_v38 = vsub.s32 4, %v3077_v8 }
 0x13f   :  { %v1263_v51 = vadd.s32 536870912, %v3351_v58  ;;  %v571_v34 = vxor.u32 2147483648, %v2078_v45  ;;  %v574_v53 = vxor.u32 2147483648, %v2076_v31  ;;  %v245_v18 = vmul.f32 %v244_v44, %v242_v4  ;;  %v2080_v14 = vpop.eup %2079 }
 0x140   :  { %v442_v12 = vsub.s32 32, %v3334_v63  ;;  %vm566_vm8 = vweird.f32 %v2248_v59  ;;  %vm570_vm9 = vcmp.eq.s32.totalorder %v568_v0, 0  ;;  %vm573_vm12 = vcmp.eq.s32.totalorder %v568_v0, 2  ;;  %v2082_v20 = vpop.eup %2081 }
 0x141   :  { %v348_v25 = vcvt.s32.f32 %v341_v37  ;;  %v1166_v15 = vclz %v1979_v23  ;;  %v672_v35 = vand.u32 3, %v671_v17  ;;  %v249_v13 = vsel %vm164_vm2, %v248_v27, %v3043_v55  ;;  %v4780_v27 = vld [vmem:[#allocation24_spill] sm:$0xff] }
 0x142   :  { %v426_v21 = vadd.s32 %v4770_v50, %v3082_v41  ;;  %v448_v10 = vshll.u32 %v447_v52, 23  ;;  %v1963_v32 = vmin.u32 %v748_v61, %v3347_v5  ;;  %v353_v44 = vsel %vm268_vm4, %v352_v38, %v3077_v8  ;;  %v4774_v61 = vld [vmem:[#allocation3_spill] sm:$0xff] }
 0x143   :  { %v349_v4 = vmul.f32 %v348_v25, %v346_v7  ;;  %v3393_v48 = vshrl.u32 %v1263_v51, 30  ;;  %v572_v37 = vsel %vm570_vm9, %v2076_v31, %v571_v34  ;;  %v575_v23 = vsel %vm573_vm12, %v574_v53, %v2078_v45 }
 0x144   :  { %v246_v17 = vxor.u32 2147483648, %v245_v18  ;;  %v444_v16 = vshrl.u32 %v426_v21, %v442_v12  ;;  %v678_v9 = vxor.u32 2147483648, %v2080_v14  ;;  %v251_v55 = vsel %vm3364_vm10, 0, %v249_v13 }
 0x145   :  { %v4771_v41 = vand.u32 2147483647, %v4760_v2  ;;  %v1980_v52 = vadd.s32 4294967294, %v1166_v15  ;;  %vm372_vm14 = vcmp.lt.s32.totalorder %v4774_v61, 0  ;;  %v675_v8 = vxor.u32 2147483648, %v2082_v20 }
 0x146   :  { %v443_v45 = vshll.u32 %v3189_v46, %v3334_v63  ;;  %v449_v7 = vor.u32 4788187, %v448_v10  ;;  %v576_v38 = vsel %vm569_vm6, %v572_v37, %v575_v23  ;;  %vm673_vm1 = vcmp.lt.s32.totalorder %v672_v35, 2 }
 0x147   :  { %vm3399_vm5 = vcmp.le.f32.partialorder %v4771_v41, 0.7853982  ;;  %v350_v51 = vxor.u32 2147483648, %v349_v4  ;;  %v1265_v34 = vshll.u32 %v3393_v48, 30  ;;  %vm674_vm11 = vcmp.eq.s32.totalorder %v672_v35, 0 }
 0x148   :  { %v355_v31 = vsel %vm3399_vm5, 0, %v353_v44  ;;  %v750_v53 = vclz %v1963_v32  ;;  %v247_v12 = vsel %vm164_vm2, %v246_v17, %v245_v18  ;;  %v445_v25 = vor.u32 %v444_v16, %v443_v45  ;;  %v3423_v32 = vpop.permute.xlu1 %1734 }
 0x149   :  { %vm677_vm9 = vcmp.eq.s32.totalorder %v672_v35, 2  ;;  %v255_v15 = vadd.s32 3, %v251_v55  ;;  %v359_v13 = vadd.s32 3, %v355_v31  ;;  %vm1981_vm12 = vcmp.lt.s32.totalorder %v1980_v52, 0  ;;  %4775 = vst [vmem:[#allocation22_spill] sm:$0xff] %v3423_v32  ;;  %v4779_v55 = vld [vmem:[#allocation25_spill] sm:$0xff] }
 0x14a   :  { %v577_v46 = vsel %vm566_vm8, nan, %v576_v38  ;;  %v676_v63 = vsel %vm674_vm11, %v2080_v14, %v675_v8  ;;  %v679_v0 = vsel %vm677_vm9, %v678_v9, %v2082_v20  ;;  %v450_v50 = vand.u32 2147483647, %v449_v7  ;;  %v4777_v9 = vld [vmem:[#allocation9_spill] sm:$0xff] }
 0x14b   :  { %v250_v21 = vsel %vm3364_vm10, %v4758_v33, %v247_v12  ;;  %v351_v10 = vsel %vm268_vm4, %v350_v51, %v349_v4  ;;  %v456_v18 = vsub.s32 4, %v3162_v30  ;;  %v3421_v16 = vsub.s32 %v3351_v58, %v1265_v34  ;;  %v4781_v12 = vld [vmem:[#allocation10_spill] sm:$0xff] }
 0x14c   :  { %v3425_v44 = vadd.s32 4294967294, %v750_v53  ;;  %v452_v59 = vcvt.s32.f32 %v445_v25  ;;  %v3427_v14 = vsel %vm1981_vm12, 0, %v1980_v52  ;;  %v4630_v20 = vand.u32 2147483647, %v4777_v9 }
 0x14d   :  { %v3431_v1 = vsel %vm673_vm1, %v676_v63, %v679_v0  ;;  %v3434_v37 = vmul.f32 %v3423_v32, %v577_v46  ;;  %v3436_v4 = vand.u32 3, %v255_v15  ;;  %v3438_v23 = vand.u32 3, %v359_v13 }
 0x14e   :  { %4776 = vst [vmem:[#allocation17_spill] sm:$0xff] %v3425_v44  ;;  %2083 = vcosq.f32 %v250_v21  ;;  %v354_v58 = vsel %vm3399_vm5, %v4760_v2, %v351_v10  ;;  %v3443_v17 = vmul.f32 %v452_v59, %v450_v50  ;;  %v804_v41 = vshrl.u32 %v4678_v42, %v4779_v55  ;;  %v4785_v50 = vld [vmem:[#allocation29_spill] sm:$0xff] }
 0x14f   :  { %4778 = vst [vmem:[#allocation31_spill] sm:$0xff] %v3434_v37  ;;  %2085 = vsinq.f32 %v250_v21  ;;  %v3450_v35 = vsel %vm372_vm14, %v456_v18, %v3162_v30  ;;  %v1174_v52 = vsub.s32 4294967266, %v3427_v14  ;;  %v1268_v8 = vsub.s32 0, %v3421_v16  ;;  %v4786_v21 = vld [vmem:[#allocation66_spill] sm:$0xff] }
 0x150   :  { %v793_v31 = vand.u32 8388607, %v4630_v20  ;;  %v803_v45 = vshll.u32 %v4696_v11, %v4780_v27  ;;  %v806_v7 = vshll.u32 %v4678_v42, %v4780_v27  ;;  %v807_v38 = vshrl.u32 %v4679_v28, %v4779_v55  ;;  %v4787_v18 = vld [vmem:[#allocation18_spill] sm:$0xff] }
 0x151   :  { %2087 = vcosq.f32 %v354_v58  ;;  %v1154_v30 = vadd.s32 %v3224_v24, %v3202_v22  ;;  %v809_v51 = vshll.u32 %v4679_v28, %v4780_v27  ;;  %v810_v34 = vshrl.u32 %v4672_v29, %v4779_v55  ;;  %v4788_v27 = vld [vmem:[#allocation38_spill] sm:$0xff] }
 0x152   :  { %v454_v53 = vxor.u32 2147483648, %v3443_v17  ;;  %v805_v15 = vor.u32 %v804_v41, %v803_v45  ;;  %v808_v13 = vor.u32 %v807_v38, %v806_v7  ;;  %v4782_v46 = vand.u32 2147483647, %v4774_v61  ;;  %v4789_v45 = vld [vmem:[#allocation35_spill] sm:$0xff] }
 0x153   :  { %v1175_v0 = vadd.s32 127, %v1174_v52  ;;  %v1983_v22 = vmin.u32 %v1268_v8, %v3421_v16  ;;  %v811_v24 = vor.u32 %v810_v34, %v809_v51  ;;  %vm820_vm4 = vcmp.lt.s32.totalorder %v4785_v50, 3  ;;  %v4790_v51 = vld [vmem:[#allocation37_spill] sm:$0xff] }
 0x154   :  { %vm3472_vm2 = vcmp.le.f32.partialorder %v4782_v46, 0.7853982  ;;  %v1323_v10 = vshll.u32 %v4696_v11, %v4786_v21  ;;  %v1324_v59 = vshrl.u32 %v4678_v42, %v4787_v18  ;;  %v794_v41 = vor.u32 8388608, %v793_v31 }
 0x155   :  { %v832_v7 = vsel %vm820_vm4, %v4789_v45, %v4788_v27  ;;  %v1170_v38 = vsub.s32 32, %v3427_v14  ;;  %v1327_v52 = vshrl.u32 %v4679_v28, %v4787_v18  ;;  %v1330_v8 = vshrl.u32 %v4672_v29, %v4787_v18 }
 0x156   :  { %vm818_vm10 = vcmp.lt.s32.totalorder %v4785_v50, 1  ;;  %vm819_vm6 = vcmp.lt.s32.totalorder %v4785_v50, 2  ;;  %v828_v34 = vsel %vm820_vm4, %v811_v24, %v4790_v51  ;;  %v1176_v27 = vshll.u32 %v1175_v0, 23  ;;  %v4792_v50 = vld [vmem:[#allocation11_spill] sm:$0xff] }
 0x157   :  { %v826_v31 = vsel %vm818_vm10, %v805_v15, %v808_v13  ;;  %v830_v46 = vsel %vm818_vm10, %v808_v13, %v811_v24  ;;  %v1270_v45 = vclz %v1983_v22  ;;  %v1326_v20 = vshll.u32 %v4678_v42, %v4786_v21 }
 0x158   :  { %v833_v25 = vsel %vm819_vm6, %v830_v46, %v832_v7  ;;  %v3504_v5 = vpop.eup %2083  ;;  %v3506_v56 = vor.u32 %v1324_v59, %v1323_v10  ;;  %v1329_v26 = vshll.u32 %v4679_v28, %v4786_v21  ;;  %v823_v51 = vsel %vm821_vm15, %v811_v24, 2102212464 }
 0x159   :  { %v834_v44 = vshll.u32 %v794_v41, 8  ;;  %v3512_v37 = vpop.eup %2085  ;;  %v1172_v0 = vshrl.u32 %v1154_v30, %v1170_v38  ;;  %v3514_v22 = vor.u32 %v1327_v52, %v1326_v20  ;;  %v802_v43 = vshrl.u32 %v4696_v11, %v4779_v55 }
 0x15a   :  { %v829_v7 = vsel %vm819_vm6, %v826_v31, %v828_v34  ;;  %v1171_v10 = vshll.u32 %v3325_v60, %v3427_v14  ;;  %v3522_v59 = vor.u32 %v1330_v8, %v1329_v26  ;;  %v1177_v41 = vor.u32 4788187, %v1176_v27 }
 0x15b   :  { %v3524_v21 = vmul.u32.u64.low %v834_v44, %v833_v25  ;;  %v3525_v46 = vmul.u32.u64.high %v834_v44, %v833_v25, %v3524_v21  ;;  %v3527_v24 = vpop.eup %2087  ;;  %v1984_v30 = vadd.s32 4294967294, %v1270_v45  ;;  %v822_v20 = vsel %vm818_vm10, %v802_v43, %v805_v15 }
 0x15c   :  { %v824_v55 = vsel %vm820_vm4, %v808_v13, %v823_v51  ;;  %2089 = vsinq.f32 %v354_v58  ;;  %v3536_v26 = vmul.u32.u64.low %v834_v44, %v829_v7  ;;  %v3537_v14 = vmul.u32.u64.high %v834_v44, %v829_v7, %v3536_v26 }
 0x15d   :  { %v1173_v25 = vor.u32 %v1172_v0, %v1171_v10  ;;  %v4791_v38 = vand.u32 2147483647, %v4781_v12  ;;  %vm1338_vm15 = vcmp.lt.s32.totalorder %v4766_v57, 1  ;;  %vm1340_vm8 = vcmp.lt.s32.totalorder %v4766_v57, 3  ;;  %v4793_v10 = vld [vmem:[#allocation33_spill] sm:$0xff] }
 0x15e   :  { %v455_v43 = vsel %vm372_vm14, %v454_v53, %v3443_v17  ;;  %v1346_v58 = vsel %vm1338_vm15, %v3506_v56, %v3514_v22  ;;  %v1348_v15 = vsel %vm1340_vm8, %v3522_v59, %v3371_v49  ;;  %v825_v13 = vsel %vm819_vm6, %v822_v20, %v824_v55  ;;  %v4794_v55 = vld [vmem:[#allocation28_spill] sm:$0xff] }
 0x15f   :  { %v1313_v52 = vand.u32 8388607, %v4791_v38  ;;  %v1178_v8 = vand.u32 2147483647, %v1177_v41  ;;  %vm1985_vm5 = vcmp.lt.s32.totalorder %v1984_v30, 0  ;;  %vm1339_vm1 = vcmp.lt.s32.totalorder %v4766_v57, 2 }
 0x160   :  { %vm843_vm14 = vc.u32 %v3525_v46, %v3536_v26  ;;  %v1350_v17 = vsel %vm1338_vm15, %v3514_v22, %v3522_v59  ;;  %v1352_v49 = vsel %vm1340_vm8, %v3207_v54, %v3375_v39  ;;  %v844_v53 = vadd.s32 1, %v3537_v14 }
 0x161   :  { %v4635_v31 = vand.u32 2147483647, %v4792_v50  ;;  %v1180_v34 = vcvt.s32.f32 %v1173_v25  ;;  %v1314_v27 = vor.u32 8388608, %v1313_v52  ;;  %v1349_v45 = vsel %vm1339_vm1, %v1346_v58, %v1348_v15 }
 0x162   :  { %v841_v51 = vmul.u32 %v834_v44, %v825_v13  ;;  %v3572_v0 = vsel %vm1985_vm5, 0, %v1984_v30  ;;  %v845_v7 = vsel %vm843_vm14, %v844_v53, %v3537_v14  ;;  %v908_v21 = vshrl.u32 %v4678_v42, %v4793_v10 }
 0x163   :  { %v911_v54 = vshrl.u32 %v4679_v28, %v4793_v10  ;;  %vm1100_vm11 = vcmp.lt.s32.totalorder %v2553_v19, 0  ;;  %v1181_v39 = vmul.f32 %v1180_v34, %v1178_v8  ;;  %v1353_v41 = vsel %vm1339_vm1, %v1350_v17, %v1352_v49 }
 0x164   :  { %v846_v20 = vadd.s32 %v845_v7, %v841_v51  ;;  %v910_v44 = vshll.u32 %v4678_v42, %v4794_v55  ;;  %v897_v30 = vand.u32 8388607, %v4635_v31  ;;  %v907_v14 = vshll.u32 %v4696_v11, %v4794_v55 }
 0x165   :  { %v913_v25 = vshll.u32 %v4679_v28, %v4794_v55  ;;  %v914_v38 = vshrl.u32 %v4672_v29, %v4793_v10  ;;  %v1278_v52 = vsub.s32 4294967266, %v3572_v0  ;;  %v3593_v58 = vshll.u32 %v1314_v27, 8 }
 0x166   :  { %v847_v15 = vadd.s32 536870912, %v846_v20  ;;  %v912_v13 = vor.u32 %v911_v54, %v910_v44  ;;  %v3595_v8 = vpop.eup %2089  ;;  %v458_v17 = vsel %vm3472_vm2, %v4774_v61, %v455_v43  ;;  %v1258_v49 = vadd.s32 %v3307_v36, %v3297_v47  ;;  %v4798_v47 = vld [vmem:[#allocation32_spill] sm:$0xff] }
 0x167   :  { %v909_v53 = vor.u32 %v908_v21, %v907_v14  ;;  %v915_v34 = vor.u32 %v914_v38, %v913_v25  ;;  %v4795_v51 = vand.u32 2147483647, %v2553_v19  ;;  %v1182_v43 = vxor.u32 2147483648, %v1181_v39  ;;  %v4799_v25 = vld [vmem:[#allocation43_spill] sm:$0xff] }
 0x168   :  { %v3609_v27 = vmul.u32.u64.low %v3593_v58, %v1353_v41  ;;  %v3610_v54 = vmul.u32.u64.high %v3593_v58, %v1353_v41, %v3609_v27  ;;  %v3613_v55 = vmul.u32.u64.low %v3593_v58, %v1349_v45  ;;  %v3614_v44 = vmul.u32.u64.high %v3593_v58, %v1349_v45, %v3613_v55  ;;  %v4800_v41 = vld [vmem:[#allocation39_spill] sm:$0xff] }
 0x169   :  { %vm3604_vm9 = vcmp.le.f32.partialorder %v4795_v51, 0.7853982  ;;  %v898_v31 = vor.u32 8388608, %v897_v30  ;;  %vm922_vm12 = vcmp.lt.s32.totalorder %v4798_v47, 1  ;;  %vm924_vm4 = vcmp.lt.s32.totalorder %v4798_v47, 3  ;;  %v4801_v51 = vld [vmem:[#allocation42_spill] sm:$0xff] }
 0x16a   :  { %v1279_v36 = vadd.s32 127, %v1278_v52  ;;  %v3619_v21 = vshrl.u32 %v847_v15, 30  ;;  %v934_v14 = vsel %vm922_vm12, %v912_v13, %v915_v34  ;;  %v936_v38 = vsel %vm924_vm4, %v4800_v41, %v4799_v25 }
 0x16b   :  { %2091 = vcosq.f32 %v458_v17  ;;  %v1322_v45 = vshrl.u32 %v4696_v11, %v4787_v18  ;;  %v930_v30 = vsel %vm922_vm12, %v909_v53, %v912_v13  ;;  %v932_v52 = vsel %vm924_vm4, %v915_v34, %v4801_v51 }
 0x16c   :  { %2093 = vsinq.f32 %v458_v17  ;;  %v1274_v15 = vsub.s32 32, %v3572_v0  ;;  %v1343_v27 = vsel %vm1341_vm3, %v3522_v59, 2102212464  ;;  %vm923_vm10 = vcmp.lt.s32.totalorder %v4798_v47, 2 }
 0x16d   :  { %v1183_v25 = vsel %vm1100_vm11, %v1182_v43, %v1181_v39  ;;  %v927_v18 = vsel %vm925_vm0, %v915_v34, 2102212464  ;;  %v937_v41 = vsel %vm923_vm10, %v934_v14, %v936_v38  ;;  %v938_v60 = vshll.u32 %v898_v31, 8 }
 0x16e   :  { %vm261_vm6 = vcmp.eq.s32.totalorder %v3436_v4, 2  ;;  %v1280_v17 = vshll.u32 %v1279_v36, 23  ;;  %v849_v51 = vshll.u32 %v3619_v21, 30  ;;  %v906_v59 = vshrl.u32 %v4696_v11, %v4793_v10 }
 0x16f   :  { %v933_v12 = vsel %vm923_vm10, %v930_v30, %v932_v52  ;;  %v1184_v39 = vsub.s32 4, %v3282_v6  ;;  %v1342_v34 = vsel %vm1338_vm15, %v1322_v45, %v3506_v56  ;;  %vm258_vm0 = vcmp.eq.s32.totalorder %v3436_v4, 0 }
 0x170   :  { %v3655_v43 = vmul.u32.u64.low %v938_v60, %v937_v41  ;;  %v3656_v14 = vmul.u32.u64.high %v938_v60, %v937_v41, %v3655_v43  ;;  %v1276_v31 = vshrl.u32 %v1258_v49, %v1274_v15  ;;  %v1344_v36 = vsel %vm1340_vm8, %v3514_v22, %v1343_v27 }
 0x171   :  { %v926_v10 = vsel %vm922_vm12, %v906_v59, %v909_v53  ;;  %v928_v38 = vsel %vm924_vm4, %v912_v13, %v927_v18  ;;  %v1186_v56 = vsel %vm3604_vm9, %v2553_v19, %v1183_v25  ;;  %v1364_v45 = vadd.s32 1, %v3614_v44 }
 0x172   :  { %v3670_v30 = vmul.u32.u64.low %v938_v60, %v933_v12  ;;  %v3671_v52 = vmul.u32.u64.high %v938_v60, %v933_v12, %v3670_v30  ;;  %vm365_vm3 = vcmp.eq.s32.totalorder %v3438_v23, 2  ;;  %v1275_v22 = vshll.u32 %v3421_v16, %v3572_v0 }
 0x173   :  { %v1281_v49 = vor.u32 4788187, %v1280_v17  ;;  %vm1363_vm15 = vc.u32 %v3610_v54, %v3613_v55  ;;  %v3679_v13 = vsub.s32 %v846_v20, %v849_v51  ;;  %v262_v53 = vxor.u32 2147483648, %v3504_v5 }
 0x174   :  { %v4802_v15 = vsel %vm3472_vm2, 0, %v3450_v35  ;;  %v1345_v27 = vsel %vm1339_vm1, %v1342_v34, %v1344_v36  ;;  %v929_v25 = vsel %vm923_vm10, %v926_v10, %v928_v38  ;;  %vm1204_vm8 = vcmp.lt.s32.totalorder %v2557_v3, 0 }
 0x175   :  { %v463_v12 = vadd.s32 3, %v4802_v15  ;;  %vm257_vm5 = vcmp.lt.s32.totalorder %v3436_v4, 2  ;;  %v259_v16 = vxor.u32 2147483648, %v3512_v37  ;;  %2095 = vcosq.f32 %v1186_v56  ;;  %v2092_v63 = vpop.eup %2091 }
 0x176   :  { %v1277_v0 = vor.u32 %v1276_v31, %v1275_v22  ;;  %vm947_vm14 = vc.u32 %v3656_v14, %v3670_v30  ;;  %v1185_v57 = vsel %vm1100_vm11, %v1184_v39, %v3282_v6  ;;  %2097 = vsinq.f32 %v1186_v56  ;;  %v2094_v47 = vpop.eup %2093 }
 0x177   :  { %v1365_v35 = vsel %vm1363_vm15, %v1364_v45, %v3614_v44  ;;  %v948_v20 = vadd.s32 1, %v3671_v52  ;;  %vm670_vm2 = vweird.f32 %v2250_v62  ;;  %v1282_v18 = vand.u32 2147483647, %v1281_v49 }
 0x178   :  { %v1361_v41 = vmul.u32 %v3593_v58, %v1345_v27  ;;  %v852_v17 = vsub.s32 0, %v3679_v13  ;;  %v945_v51 = vmul.u32 %v938_v60, %v929_v25  ;;  %v263_v6 = vsel %vm261_vm6, %v262_v53, %v3512_v37 }
 0x179   :  { %v366_v59 = vxor.u32 2147483648, %v3527_v24  ;;  %v464_v39 = vand.u32 3, %v463_v12  ;;  %v949_v44 = vsel %vm947_vm14, %v948_v20, %v3671_v52  ;;  %vm254_vm1 = vweird.f32 %v4758_v33  ;;  %v1730_v33 = vpop.permute.xlu0 %1729 }
 0x17a   :  { %v363_v34 = vxor.u32 2147483648, %v3595_v8  ;;  %v1284_v43 = vcvt.s32.f32 %v1277_v0  ;;  %v3713_v31 = vadd.s32 %v1365_v35, %v1361_v41  ;;  %v950_v58 = vadd.s32 %v949_v44, %v945_v51 }
 0x17b   :  { %v260_v60 = vsel %vm258_vm0, %v3504_v5, %v259_v16  ;;  %v470_v36 = vxor.u32 2147483648, %v2092_v63  ;;  %v1187_v37 = vsel %vm3604_vm9, 0, %v1185_v57  ;;  %v1288_v10 = vsub.s32 4, %v3393_v48 }
 0x17c   :  { %v467_v38 = vxor.u32 2147483648, %v2094_v47  ;;  %v1285_v56 = vmul.f32 %v1284_v43, %v1282_v18  ;;  %v1967_v45 = vmin.u32 %v852_v17, %v3679_v13  ;;  %v951_v52 = vadd.s32 536870912, %v950_v58 }
 0x17d   :  { %vm361_vm11 = vcmp.lt.s32.totalorder %v3438_v23, 2  ;;  %vm362_vm12 = vcmp.eq.s32.totalorder %v3438_v23, 0  ;;  %v367_v22 = vsel %vm365_vm3, %v366_v59, %v3595_v8  ;;  %vm469_vm4 = vcmp.eq.s32.totalorder %v464_v39, 2 }
 0x17e   :  { %v364_v5 = vsel %vm362_vm12, %v3527_v24, %v363_v34  ;;  %v1191_v7 = vadd.s32 3, %v1187_v37  ;;  %v1367_v49 = vadd.s32 536870912, %v3713_v31  ;;  %v3729_v53 = vshrl.u32 %v951_v52, 30 }
 0x17f   :  { %v264_v15 = vsel %vm257_vm5, %v260_v60, %v263_v6  ;;  %vm466_vm9 = vcmp.eq.s32.totalorder %v464_v39, 0  ;;  %v471_v12 = vsel %vm469_vm4, %v470_v36, %v2094_v47  ;;  %v1289_v27 = vsel %vm1204_vm8, %v1288_v10, %v3393_v48  ;;  %v2096_v25 = vpop.eup %2095 }
 0x180   :  { %v468_v16 = vsel %vm466_vm9, %v2092_v63, %v467_v38  ;;  %v1286_v8 = vxor.u32 2147483648, %v1285_v56  ;;  %v854_v0 = vclz %v1967_v45  ;;  %v953_v24 = vshll.u32 %v3729_v53, 30  ;;  %v2098_v57 = vpop.eup %2097 }
 0x181   :  { %v681_v35 = vsel %vm670_vm2, nan, %v3431_v1  ;;  %v368_v4 = vsel %vm361_vm11, %v364_v5, %v367_v22  ;;  %vm465_vm10 = vcmp.lt.s32.totalorder %v464_v39, 2  ;;  %v4803_v20 = vand.u32 2147483647, %v2557_v3 }
 0x182   :  { %v1192_v48 = vand.u32 3, %v1191_v7  ;;  %v3750_v18 = vshrl.u32 %v1367_v49, 30  ;;  %v3752_v41 = vsub.s32 %v950_v58, %v953_v24  ;;  %vm788_vm0 = vcmp.lt.s32.totalorder %v4777_v9, 0  ;;  %v4806_v7 = vld [vmem:[#allocation5_spill] sm:$0xff]  ;;  %v4808_v24 = vld [vmem:[#allocation50_spill] sm:$0xff] }
 0x183   :  { %vm3744_vm6 = vcmp.le.f32.partialorder %v4803_v20, 0.7853982  ;;  %v265_v62 = vsel %vm254_vm1, nan, %v264_v15  ;;  %vm358_vm3 = vweird.f32 %v4760_v2  ;;  %v472_v1 = vsel %vm465_vm10, %v468_v16, %v471_v12  ;;  %v4810_v20 = vld [vmem:[#allocation30_spill] sm:$0xff] }
 0x184   :  { %v1291_v63 = vsel %vm3744_vm6, 0, %v1289_v27  ;;  %v1198_v23 = vxor.u32 2147483648, %v2096_v25  ;;  %v1195_v17 = vxor.u32 2147483648, %v2098_v57  ;;  %v1287_v51 = vsel %vm1204_vm8, %v1286_v8, %v1285_v56  ;;  %v4807_v27 = vld [vmem:[#allocation20_spill] sm:$0xff] }
 0x185   :  { %v1968_v6 = vadd.s32 4294967294, %v854_v0  ;;  %v956_v59 = vsub.s32 0, %v3752_v41  ;;  %v3762_v39 = vmul.f32 %v3423_v32, %v681_v35  ;;  %v369_v44 = vsel %vm358_vm3, nan, %v368_v4  ;;  %v4809_v35 = vld [vmem:[#allocation45_spill] sm:$0xff] }
 0x186   :  { %vm462_vm15 = vweird.f32 %v4774_v61  ;;  %v1295_v34 = vadd.s32 3, %v1291_v63  ;;  %vm1197_vm5 = vcmp.eq.s32.totalorder %v1192_v48, 2  ;;  %v1369_v2 = vshll.u32 %v3750_v18, 30 }
 0x187   :  { %v473_v43 = vsel %vm462_vm15, nan, %v472_v1  ;;  %v1971_v58 = vmin.u32 %v956_v59, %v3752_v41  ;;  %v3767_v60 = vmul.f32 %v1730_v33, %v265_v62  ;;  %vm1194_vm8 = vcmp.eq.s32.totalorder %v1192_v48, 0 }
 0x188   :  { %v1199_v36 = vsel %vm1197_vm5, %v1198_v23, %v2098_v57  ;;  %v1290_v37 = vsel %vm3744_vm6, %v2557_v3, %v1287_v51  ;;  %v1196_v10 = vsel %vm1194_vm8, %v2096_v25, %v1195_v17  ;;  %vm1969_vm14 = vcmp.lt.s32.totalorder %v1968_v6, 0  ;;  %v4811_v17 = vld [vmem:[#allocation36_spill] sm:$0xff] }
 0x189   :  { %v872_v61 = vsub.s32 4, %v3619_v21  ;;  %v958_v38 = vclz %v1971_v58  ;;  %v3773_v56 = vmul.f32 %v1730_v33, %v369_v44  ;;  %v3775_v45 = vmul.f32 %v1730_v33, %v473_v43  ;;  %v4812_v58 = vld [vmem:[#allocation44_spill] sm:$0xff] }
 0x18a   :  { %vm1193_vm2 = vcmp.lt.s32.totalorder %v1192_v48, 2  ;;  %v3777_v52 = vand.u32 3, %v1295_v34  ;;  %2099 = vcosq.f32 %v1290_v37  ;;  %v3780_v22 = vsub.s32 %v3713_v31, %v1369_v2 }
 0x18b   :  { %v1972_v5 = vadd.s32 4294967294, %v958_v38  ;;  %v4637_v49 = vand.u32 2147483647, %v4806_v7  ;;  %v3783_v15 = vsel %vm1193_vm2, %v1196_v10, %v1199_v36  ;;  %2101 = vsinq.f32 %v1290_v37  ;;  %v4814_v38 = vld [vmem:[#allocation53_spill] sm:$0xff] }
 0x18c   :  { %v857_v12 = vsel %vm1969_vm14, 0, %v1968_v6  ;;  %v4639_v25 = vand.u32 2147483647, %v4807_v27  ;;  %v842_v16 = vadd.s32 %v3536_v26, %v3525_v46  ;;  %v3791_v8 = vsel %vm788_vm0, %v872_v61, %v3619_v21  ;;  %v4813_v61 = vld [vmem:[#allocation58_spill] sm:$0xff] }
 0x18d   :  { %v946_v31 = vadd.s32 %v3670_v30, %v3656_v14  ;;  %vm1973_vm1 = vcmp.lt.s32.totalorder %v1972_v5, 0  ;;  %v1428_v57 = vshrl.u32 %v4678_v42, %v4808_v24  ;;  %v1430_v4 = vshll.u32 %v4678_v42, %v4809_v35 }
 0x18e   :  { %v3795_v0 = vsel %vm1973_vm1, 0, %v1972_v5  ;;  %v1431_v46 = vshrl.u32 %v4679_v28, %v4808_v24  ;;  %v862_v26 = vsub.s32 4294967266, %v857_v12  ;;  %v3805_v21 = vand.u32 8388607, %v4637_v49 }
 0x18f   :  { %v1011_v14 = vshll.u32 %v4696_v11, %v4810_v20  ;;  %v1427_v30 = vshll.u32 %v4696_v11, %v4809_v35  ;;  %v1417_v47 = vand.u32 8388607, %v4639_v25  ;;  %v1433_v63 = vshll.u32 %v4679_v28, %v4809_v35 }
 0x190   :  { %v1432_v48 = vor.u32 %v1431_v46, %v1430_v4  ;;  %v1434_v62 = vshrl.u32 %v4672_v29, %v4808_v24  ;;  %v858_v1 = vsub.s32 32, %v857_v12  ;;  %v966_v23 = vsub.s32 4294967266, %v3795_v0 }
 0x191   :  { %v1012_v51 = vshrl.u32 %v4678_v42, %v4811_v17  ;;  %v1015_v6 = vshrl.u32 %v4679_v28, %v4811_v17  ;;  %v1014_v59 = vshll.u32 %v4678_v42, %v4810_v20  ;;  %v1018_v44 = vshrl.u32 %v4672_v29, %v4811_v17 }
 0x192   :  { %v1429_v34 = vor.u32 %v1428_v57, %v1427_v30  ;;  %v1435_v33 = vor.u32 %v1434_v62, %v1433_v63  ;;  %v863_v43 = vadd.s32 127, %v862_v26  ;;  %v1002_v2 = vor.u32 8388608, %v3805_v21  ;;  %v4818_v62 = vld [vmem:[#allocation57_spill] sm:$0xff] }
 0x193   :  { %vm1442_vm11 = vcmp.lt.s32.totalorder %v4812_v58, 1  ;;  %vm1444_vm12 = vcmp.lt.s32.totalorder %v4812_v58, 3  ;;  %v1017_v36 = vshll.u32 %v4679_v28, %v4810_v20  ;;  %v1418_v37 = vor.u32 8388608, %v1417_v47 }
 0x194   :  { %v1454_v10 = vsel %vm1442_vm11, %v1432_v48, %v1435_v33  ;;  %v1456_v5 = vsel %vm1444_vm12, %v4814_v38, %v4813_v61  ;;  %v3837_v57 = vpop.eup %2099  ;;  %v4815_v35 = vand.u32 2147483647, %v4777_v9  ;;  %v860_v46 = vshrl.u32 %v842_v16, %v858_v1 }
 0x195   :  { %v967_v26 = vadd.s32 127, %v966_v23  ;;  %v3845_v21 = vor.u32 %v1012_v51, %v1011_v14  ;;  %v3847_v20 = vor.u32 %v1015_v6, %v1014_v59  ;;  %v3849_v30 = vpop.eup %2101  ;;  %v3851_v47 = vor.u32 %v1018_v44, %v1017_v36  ;;  %v4819_v51 = vld [vmem:[#allocation40_spill] sm:$0xff] }
 0x196   :  { %vm3841_vm4 = vcmp.le.f32.partialorder %v4815_v35, 0.7853982  ;;  %vm1443_vm9 = vcmp.lt.s32.totalorder %v4812_v58, 2  ;;  %v1450_v63 = vsel %vm1442_vm11, %v1429_v34, %v1432_v48  ;;  %v1452_v61 = vsel %vm1444_vm12, %v1435_v33, %v4818_v62 }
 0x197   :  { %v859_v16 = vshll.u32 %v3679_v13, %v857_v12  ;;  %v864_v1 = vshll.u32 %v863_v43, 23  ;;  %v962_v14 = vsub.s32 32, %v3795_v0  ;;  %v1457_v23 = vsel %vm1443_vm9, %v1454_v10, %v1456_v5  ;;  %v4820_v43 = vld [vmem:[#allocation48_spill] sm:$0xff] }
 0x198   :  { %vm1026_vm10 = vcmp.lt.s32.totalorder %v4819_v51, 1  ;;  %vm1028_vm6 = vcmp.lt.s32.totalorder %v4819_v51, 3  ;;  %v1447_v6 = vsel %vm1445_vm7, %v1435_v33, 2102212464  ;;  %v1458_v59 = vshll.u32 %v1418_v37, 8 }
 0x199   :  { %v861_v44 = vor.u32 %v860_v46, %v859_v16  ;;  %v968_v36 = vshll.u32 %v967_v26, 23  ;;  %v1426_v38 = vshrl.u32 %v4696_v11, %v4808_v24  ;;  %v1453_v13 = vsel %vm1443_vm9, %v1450_v63, %v1452_v61 }
 0x19a   :  { %v1034_v12 = vsel %vm1026_vm10, %v3845_v21, %v3847_v20  ;;  %v1036_v10 = vsel %vm1028_vm6, %v3851_v47, %v4820_v43  ;;  %v3879_v33 = vmul.u32.u64.low %v1458_v59, %v1457_v23  ;;  %v3880_v37 = vmul.u32.u64.high %v1458_v59, %v1457_v23, %v3879_v33  ;;  %v4823_v43 = vld [vmem:[#allocation23_spill] sm:$0xff] }
 0x19b   :  { %v865_v5 = vor.u32 4788187, %v864_v1  ;;  %v964_v35 = vshrl.u32 %v946_v31, %v962_v14  ;;  %v1446_v24 = vsel %vm1442_vm11, %v1426_v38, %v1429_v34  ;;  %v1448_v46 = vsel %vm1444_vm12, %v1432_v48, %v1447_v6  ;;  %v4821_v34 = vld [vmem:[#allocation49_spill] sm:$0xff] }
 0x19c   :  { %vm1027_vm7 = vcmp.lt.s32.totalorder %v4819_v51, 2  ;;  %v3888_v63 = vmul.u32.u64.low %v1458_v59, %v1453_v13  ;;  %v3889_v62 = vmul.u32.u64.high %v1458_v59, %v1453_v13, %v3888_v63  ;;  %v963_v61 = vshll.u32 %v3752_v41, %v3795_v0  ;;  %v4822_v1 = vld [vmem:[#allocation41_spill] sm:$0xff] }
 0x19d   :  { %v969_v16 = vor.u32 4788187, %v968_v36  ;;  %v1038_v31 = vsel %vm1026_vm10, %v3847_v20, %v3851_v47  ;;  %v1040_v48 = vsel %vm1028_vm6, %v4822_v1, %v4821_v34  ;;  %vm892_vm3 = vcmp.lt.s32.totalorder %v4792_v50, 0 }
 0x19e   :  { %v868_v14 = vcvt.s32.f32 %v861_v44  ;;  %v875_v23 = vsel %vm3841_vm4, 0, %v3791_v8  ;;  %v1037_v41 = vsel %vm1027_vm7, %v1034_v12, %v1036_v10  ;;  %v1449_v0 = vsel %vm1443_vm9, %v1446_v24, %v1448_v46  ;;  %v4827_v46 = vld [vmem:[#allocation51_spill] sm:$0xff] }
 0x19f   :  { %v866_v6 = vand.u32 2147483647, %v865_v5  ;;  %v965_v36 = vor.u32 %v964_v35, %v963_v61  ;;  %v3910_v38 = vshll.u32 %v1002_v2, 8  ;;  %vm1467_vm15 = vc.u32 %v3880_v37, %v3888_v63  ;;  %v4836_v35 = vld [vmem:[#allocation8_spill] sm:$0xff] }
 0x1a0   :  { %v976_v13 = vsub.s32 4, %v3729_v53  ;;  %v1041_v44 = vsel %vm1027_vm7, %v1038_v31, %v1040_v48  ;;  %v1468_v8 = vadd.s32 1, %v3889_v62  ;;  %v4638_v33 = vand.u32 2147483647, %v4823_v43  ;;  %v4828_v31 = vld [vmem:[#allocation47_spill] sm:$0xff] }
 0x1a1   :  { %v970_v12 = vand.u32 2147483647, %v969_v16  ;;  %v3920_v58 = vmul.u32.u64.low %v3910_v38, %v1037_v41  ;;  %v3921_v10 = vmul.u32.u64.high %v3910_v38, %v1037_v41, %v3920_v58  ;;  %v1465_v2 = vmul.u32 %v1458_v59, %v1449_v0 }
 0x1a2   :  { %v4824_v5 = vand.u32 2147483647, %v4792_v50  ;;  %v1469_v24 = vsel %vm1467_vm15, %v1468_v8, %v3889_v62  ;;  %v1532_v61 = vshrl.u32 %v4678_v42, %v4827_v46  ;;  %v1534_v16 = vshll.u32 %v4678_v42, %v4828_v31 }
 0x1a3   :  { %v1535_v34 = vshrl.u32 %v4679_v28, %v4827_v46  ;;  %v869_v1 = vmul.f32 %v868_v14, %v866_v6  ;;  %v972_v48 = vcvt.s32.f32 %v965_v36  ;;  %v1470_v59 = vadd.s32 %v1469_v24, %v1465_v2 }
 0x1a4   :  { %vm3926_vm5 = vcmp.le.f32.partialorder %v4824_v5, 0.7853982  ;;  %v1531_v41 = vshll.u32 %v4696_v11, %v4828_v31  ;;  %v1521_v0 = vand.u32 8388607, %v4638_v33  ;;  %v1537_v62 = vshll.u32 %v4679_v28, %v4828_v31 }
 0x1a5   :  { %v1536_v5 = vor.u32 %v1535_v34, %v1534_v16  ;;  %v1538_v8 = vshrl.u32 %v4672_v29, %v4827_v46  ;;  %v1010_v49 = vshrl.u32 %v4696_v11, %v4811_v17  ;;  %v1471_v36 = vadd.s32 536870912, %v1470_v59  ;;  %v4830_v17 = vld [vmem:[#allocation46_spill] sm:$0xff] }
 0x1a6   :  { %v3948_v14 = vmul.u32.u64.low %v3910_v38, %v1041_v44  ;;  %v3949_v6 = vmul.u32.u64.high %v3910_v38, %v1041_v44, %v3948_v14  ;;  %v973_v2 = vmul.f32 %v972_v48, %v970_v12  ;;  %vm4829_vm8 = vcmp.lt.s32.totalorder %v4819_v51, 4  ;;  %v4832_v48 = vld [vmem:[#allocation54_spill] sm:$0xff] }
 0x1a7   :  { %v1031_v24 = vsel %vm4829_vm8, %v3851_v47, 2102212464  ;;  %v1533_v16 = vor.u32 %v1532_v61, %v1531_v41  ;;  %v1539_v34 = vor.u32 %v1538_v8, %v1537_v62  ;;  %vm1301_vm14 = vcmp.eq.s32.totalorder %v3777_v52, 2  ;;  %v4831_v61 = vld [vmem:[#allocation61_spill] sm:$0xff] }
 0x1a8   :  { %v977_v31 = vsel %vm892_vm3, %v976_v13, %v3729_v53  ;;  %v3958_v33 = vshrl.u32 %v1471_v36, 30  ;;  %vm1546_vm2 = vcmp.lt.s32.totalorder %v4830_v17, 1  ;;  %vm1548_vm1 = vcmp.lt.s32.totalorder %v4830_v17, 3  ;;  %v4833_v36 = vld [vmem:[#allocation60_spill] sm:$0xff] }
 0x1a9   :  { %vm1298_vm11 = vcmp.eq.s32.totalorder %v3777_v52, 0  ;;  %v870_v44 = vxor.u32 2147483648, %v869_v1  ;;  %v1522_v12 = vor.u32 8388608, %v1521_v0  ;;  %v1558_v47 = vsel %vm1546_vm2, %v1536_v5, %v1539_v34 }
 0x1aa   :  { %v1560_v41 = vsel %vm1548_vm1, %v4832_v48, %v4831_v61  ;;  %v1299_v53 = vxor.u32 2147483648, %v3849_v30  ;;  %v879_v13 = vadd.s32 3, %v875_v23  ;;  %v1030_v62 = vsel %vm1026_vm10, %v1010_v49, %v3845_v21 }
 0x1ab   :  { %v1473_v8 = vshll.u32 %v3958_v33, 30  ;;  %v974_v14 = vxor.u32 2147483648, %v973_v2  ;;  %vm1547_vm12 = vcmp.lt.s32.totalorder %v4830_v17, 2  ;;  %v1554_v0 = vsel %vm1546_vm2, %v1533_v16, %v1536_v5 }
 0x1ac   :  { %v1556_v25 = vsel %vm1548_vm1, %v1539_v34, %v4833_v36  ;;  %v979_v61 = vsel %vm3926_vm5, 0, %v977_v31  ;;  %v1032_v23 = vsel %vm1028_vm6, %v3847_v20, %v1031_v24  ;;  %v1561_v21 = vsel %vm1547_vm12, %v1558_v47, %v1560_v41 }
 0x1ad   :  { %v3985_v49 = vsub.s32 %v1470_v59, %v1473_v8  ;;  %v871_v48 = vsel %vm788_vm0, %v870_v44, %v869_v1  ;;  %v1052_v26 = vadd.s32 1, %v3921_v10  ;;  %vm4834_vm9 = vcmp.lt.s32.totalorder %v4830_v17, 4  ;;  %v4837_v17 = vld [vmem:[#allocation55_spill] sm:$0xff] }
 0x1ae   :  { %v1551_v36 = vsel %vm4834_vm9, %v1539_v34, 2102212464  ;;  %v1562_v32 = vshll.u32 %v1522_v12, 8  ;;  %vm1051_vm10 = vc.u32 %v3949_v6, %v3920_v58  ;;  %v1530_v20 = vshrl.u32 %v4696_v11, %v4827_v46 }
 0x1af   :  { %v1476_v31 = vsub.s32 0, %v3985_v49  ;;  %v1557_v59 = vsel %vm1547_vm12, %v1554_v0, %v1556_v25  ;;  %v975_v1 = vsel %vm892_vm3, %v974_v14, %v973_v2  ;;  %v1033_v24 = vsel %vm1027_vm7, %v1030_v62, %v1032_v23 }
 0x1b0   :  { %v4005_v44 = vmul.u32.u64.low %v1562_v32, %v1561_v21  ;;  %v4006_v34 = vmul.u32.u64.high %v1562_v32, %v1561_v21, %v4005_v44  ;;  %v874_v12 = vsel %vm3841_vm4, %v4777_v9, %v871_v48  ;;  %v1550_v46 = vsel %vm1546_vm2, %v1530_v20, %v1533_v16 }
 0x1b1   :  { %v1991_v47 = vmin.u32 %v1476_v31, %v3985_v49  ;;  %v1552_v25 = vsel %vm1548_vm1, %v1536_v5, %v1551_v36  ;;  %v4835_v2 = vxor.u32 2147483648, %v3837_v57  ;;  %v1053_v41 = vsel %vm1051_vm10, %v1052_v26, %v3921_v10  ;;  %v4838_v36 = vld [vmem:[#allocation52_spill] sm:$0xff] }
 0x1b2   :  { %v4024_v62 = vmul.u32.u64.low %v1562_v32, %v1557_v59  ;;  %v4025_v4 = vmul.u32.u64.high %v1562_v32, %v1557_v59, %v4024_v62  ;;  %v4031_v16 = vsel %vm1298_vm11, %v3837_v57, %v1299_v53  ;;  %v978_v5 = vsel %vm3926_vm5, %v4792_v50, %v975_v1 }
 0x1b3   :  { %v4021_v51 = vsel %vm1301_vm14, %v4835_v2, %v3849_v30  ;;  %v1049_v8 = vmul.u32 %v3910_v38, %v1033_v24  ;;  %v1478_v14 = vclz %v1991_v47  ;;  %2103 = vcosq.f32 %v874_v12 }
 0x1b4   :  { %v4037_v30 = vand.u32 3, %v879_v13  ;;  %v983_v26 = vadd.s32 3, %v979_v61  ;;  %v1553_v10 = vsel %vm1547_vm12, %v1550_v46, %v1552_v25  ;;  %2105 = vsinq.f32 %v874_v12 }
 0x1b5   :  { %v4041_v0 = vadd.s32 %v1053_v41, %v1049_v8  ;;  %v1992_v23 = vadd.s32 4294967294, %v1478_v14  ;;  %vm1571_vm0 = vc.u32 %v4006_v34, %v4024_v62  ;;  %2107 = vcosq.f32 %v978_v5 }
 0x1b6   :  { %v1466_v57 = vadd.s32 %v3888_v63, %v3880_v37  ;;  %v1572_v38 = vadd.s32 1, %v4025_v4  ;;  %v1618_v53 = vand.u32 2147483647, %v4836_v35  ;;  %2109 = vsinq.f32 %v978_v5 }
 0x1b7   :  { %vm1993_vm4 = vcmp.lt.s32.totalorder %v1992_v23, 0  ;;  %v1569_v13 = vmul.u32 %v1562_v32, %v1553_v10  ;;  %v1636_v61 = vshrl.u32 %v4678_v42, %v4837_v17  ;;  %v1638_v31 = vshll.u32 %v4678_v42, %v4838_v36 }
 0x1b8   :  { %v1481_v21 = vsel %vm1993_vm4, 0, %v1992_v23  ;;  %v1573_v48 = vsel %vm1571_vm0, %v1572_v38, %v4025_v4  ;;  %v1639_v20 = vshrl.u32 %v4679_v28, %v4837_v17  ;;  %v1635_v1 = vshll.u32 %v4696_v11, %v4838_v36  ;;  %v4839_v23 = vld [vmem:[#allocation13_spill] sm:$0xff] }
 0x1b9   :  { %v1482_v37 = vsub.s32 32, %v1481_v21  ;;  %v1486_v63 = vsub.s32 4294967266, %v1481_v21  ;;  %v1574_v59 = vadd.s32 %v1573_v48, %v1569_v13  ;;  %v1625_v32 = vand.u32 8388607, %v1618_v53 }
 0x1ba   :  { %v1640_v24 = vor.u32 %v1639_v20, %v1638_v31  ;;  %v1641_v44 = vshll.u32 %v4679_v28, %v4838_v36  ;;  %v1642_v12 = vshrl.u32 %v4672_v29, %v4837_v17  ;;  %vm1412_vm6 = vcmp.lt.s32.totalorder %v4807_v27, 0 }
 0x1bb   :  { %v1483_v42 = vshll.u32 %v3985_v49, %v1481_v21  ;;  %v1484_v47 = vshrl.u32 %v1466_v57, %v1482_v37  ;;  %v1487_v46 = vadd.s32 127, %v1486_v63  ;;  %v1575_v25 = vadd.s32 536870912, %v1574_v59  ;;  %v4844_v37 = vld [vmem:[#allocation64_spill] sm:$0xff] }
 0x1bc   :  { %v4066_v2 = vand.u32 3, %v983_v26  ;;  %v1637_v41 = vor.u32 %v1636_v61, %v1635_v1  ;;  %v1643_v4 = vor.u32 %v1642_v12, %v1641_v44  ;;  %vm1650_vm7 = vcmp.lt.s32.totalorder %v4764_v40, 1  ;;  %v4840_v26 = vld [vmem:[#allocation63_spill] sm:$0xff] }
 0x1bd   :  { %v1485_v5 = vor.u32 %v1484_v47, %v1483_v42  ;;  %v1488_v8 = vshll.u32 %v1487_v46, 23  ;;  %v4069_v14 = vshrl.u32 %v1575_v25, 30  ;;  %vm1652_vm3 = vcmp.lt.s32.totalorder %v4764_v40, 3  ;;  %v2104_v28 = vpop.eup %2103 }
 0x1be   :  { %v1055_v29 = vadd.s32 536870912, %v4041_v0  ;;  %v1626_v10 = vor.u32 8388608, %v1625_v32  ;;  %v1662_v49 = vsel %vm1650_vm7, %v1640_v24, %v1643_v4  ;;  %v1664_v57 = vsel %vm1652_vm3, %v4840_v26, %v4839_v23  ;;  %v2106_v38 = vpop.eup %2105 }
 0x1bf   :  { %vm882_vm15 = vcmp.eq.s32.totalorder %v4037_v30, 0  ;;  %vm885_vm5 = vcmp.eq.s32.totalorder %v4037_v30, 2  ;;  %v4841_v13 = vand.u32 2147483647, %v4807_v27  ;;  %v1489_v21 = vor.u32 4788187, %v1488_v8  ;;  %v2108_v36 = vpop.eup %2107 }
 0x1c0   :  { %v1577_v48 = vshll.u32 %v4069_v14, 30  ;;  %v1496_v31 = vsub.s32 4, %v3958_v33  ;;  %vm1651_vm14 = vcmp.lt.s32.totalorder %v4764_v40, 2  ;;  %v1658_v20 = vsel %vm1650_vm7, %v1637_v41, %v1640_v24  ;;  %v2110_v1 = vpop.eup %2109 }
 0x1c1   :  { %vm4083_vm8 = vcmp.le.f32.partialorder %v4841_v13, 0.7853982  ;;  %v1660_v63 = vsel %vm1652_vm3, %v1643_v4, %v4844_v37  ;;  %vm989_vm2 = vcmp.eq.s32.totalorder %v4066_v2, 2  ;;  %v1490_v32 = vand.u32 2147483647, %v1489_v21 }
 0x1c2   :  { %v1492_v44 = vcvt.s32.f32 %v1485_v5  ;;  %v4096_v12 = vsub.s32 %v1574_v59, %v1577_v48  ;;  %v1665_v42 = vsel %vm1651_vm14, %v1662_v49, %v1664_v57  ;;  %v886_v47 = vxor.u32 2147483648, %v2104_v28 }
 0x1c3   :  { %vm986_vm1 = vcmp.eq.s32.totalorder %v4066_v2, 0  ;;  %v4101_v46 = vshrl.u32 %v1055_v29, 30  ;;  %v1655_v25 = vsel %vm1653_vm13, %v1643_v4, 2102212464  ;;  %v1666_v8 = vshll.u32 %v1626_v10, 8 }
 0x1c4   :  { %vm881_vm11 = vcmp.lt.s32.totalorder %v4037_v30, 2  ;;  %v1493_v23 = vmul.f32 %v1492_v44, %v1490_v32  ;;  %v1580_v26 = vsub.s32 0, %v4096_v12  ;;  %v1634_v59 = vshrl.u32 %v4696_v11, %v4837_v17 }
 0x1c5   :  { %v1661_v5 = vsel %vm1651_vm14, %v1658_v20, %v1660_v63  ;;  %v883_v49 = vxor.u32 2147483648, %v2106_v38  ;;  %v1497_v29 = vsel %vm1412_vm6, %v1496_v31, %v3958_v33  ;;  %vm985_vm13 = vcmp.lt.s32.totalorder %v4066_v2, 2 }
 0x1c6   :  { %v4114_v57 = vmul.u32.u64.low %v1666_v8, %v1665_v42  ;;  %v4115_v13 = vmul.u32.u64.high %v1666_v8, %v1665_v42, %v4114_v57  ;;  %v1494_v4 = vxor.u32 2147483648, %v1493_v23  ;;  %v1995_v10 = vmin.u32 %v1580_v26, %v4096_v12 }
 0x1c7   :  { %v1654_v21 = vsel %vm1650_vm7, %v1634_v59, %v1637_v41  ;;  %v1656_v11 = vsel %vm1652_vm3, %v1640_v24, %v1655_v25  ;;  %v990_v17 = vxor.u32 2147483648, %v2108_v36  ;;  %v1057_v48 = vshll.u32 %v4101_v46, 30 }
 0x1c8   :  { %v4124_v20 = vmul.u32.u64.low %v1666_v8, %v1661_v5  ;;  %v4125_v37 = vmul.u32.u64.high %v1666_v8, %v1661_v5, %v4124_v20  ;;  %vm878_vm12 = vweird.f32 %v4777_v9  ;;  %v887_v33 = vsel %vm885_vm5, %v886_v47, %v2106_v38 }
 0x1c9   :  { %v987_v31 = vxor.u32 2147483648, %v2110_v1  ;;  %v1495_v63 = vsel %vm1412_vm6, %v1494_v4, %v1493_v23  ;;  %v1582_v41 = vclz %v1995_v10  ;;  %v884_v24 = vsel %vm882_vm15, %v2104_v28, %v883_v49 }
 0x1ca   :  { %vm982_vm9 = vweird.f32 %v4792_v50  ;;  %v1498_v32 = vsel %vm4083_vm8, %v4807_v27, %v1495_v63  ;;  %v1499_v44 = vsel %vm4083_vm8, 0, %v1497_v29  ;;  %v1657_v38 = vsel %vm1651_vm14, %v1654_v21, %v1656_v11 }
 0x1cb   :  { %vm1190_vm10 = vweird.f32 %v2553_v19  ;;  %2111 = vcosq.f32 %v1498_v32  ;;  %v1996_v42 = vadd.s32 4294967294, %v1582_v41  ;;  %vm1675_vm0 = vc.u32 %v4115_v13, %v4124_v20 }
 0x1cc   :  { %v1767_v28 = vlaneseq  ;;  %v991_v47 = vsel %vm989_vm2, %v990_v17, %v2110_v1  ;;  %v4149_v25 = vsub.s32 %v4041_v0, %v1057_v48  ;;  %2113 = vsinq.f32 %v1498_v32  ;;  %v2135_v17 = vld [vmem:[#allocation2] sm:$0xff] }
 0x1cd   :  { %v1676_v61 = vadd.s32 1, %v4125_v37  ;;  %v988_v40 = vsel %vm986_vm1, %v2108_v36, %v987_v31  ;;  %vm1997_vm4 = vcmp.lt.s32.totalorder %v1996_v42, 0  ;;  %v1673_v23 = vmul.u32 %v1666_v8, %v1657_v38 }
 0x1ce   :  { %v1768_v26 = vshrl.u32 %v1767_v28, 7  ;;  %v888_v59 = vsel %vm881_vm11, %v884_v24, %v887_v33  ;;  %v1503_v5 = vadd.s32 3, %v1499_v44  ;;  %v1585_v49 = vsel %vm1997_vm4, 0, %v1996_v42  ;;  %v2137_v33 = vld [vmem:[#allocation2 + $0x10] sm:$0xff]  ;;  %v4845_v28 = vld [vmem:[#allocation31_spill] sm:$0xff] }
 0x1cf   :  { %v1677_v29 = vsel %vm1675_vm0, %v1676_v61, %v4125_v37  ;;  %v1570_v0 = vadd.s32 %v4024_v62, %v4006_v34  ;;  %v1586_v1 = vsub.s32 32, %v1585_v49  ;;  %v1590_v57 = vsub.s32 4294967266, %v1585_v49  ;;  %v2136_v37 = vld [vmem:[#allocation2 + $0x8] sm:$0xff] }
 0x1d0   :  { %v1678_v4 = vadd.s32 %v1677_v29, %v1673_v23  ;;  %v992_v10 = vsel %vm985_vm13, %v988_v40, %v991_v47  ;;  %v1060_v36 = vsub.s32 0, %v4149_v25  ;;  %v1587_v8 = vshll.u32 %v4096_v12, %v1585_v49 }
 0x1d1   :  { %vm1773_vm6 = vcmp.lt.s32.totalorder %v1768_v26, 4  ;;  %v1588_v30 = vshrl.u32 %v1570_v0, %v1586_v1  ;;  %v1591_v21 = vadd.s32 127, %v1590_v57  ;;  %v889_v34 = vsel %vm878_vm12, nan, %v888_v59  ;;  %v4195_v59 = vpop.permute.xlu1 %1744 }
 0x1d2   :  { %v1679_v11 = vadd.s32 536870912, %v1678_v4  ;;  %v1778_v48 = vsel %vm1773_vm6, %v2135_v17, %v3767_v60  ;;  %v1504_v62 = vand.u32 3, %v1503_v5  ;;  %v1779_v2 = vsel %vm1773_vm6, %v2136_v37, %v3773_v56 }
 0x1d3   :  { %1793 = vxpose.xlu1.b32.start [1/5] (short) %v1778_v48, 128  ;;  %v4168_v31 = vsel %vm1773_vm6, %v2137_v33, %v3775_v45  ;;  %v993_v12 = vsel %vm982_vm9, nan, %v992_v10  ;;  %v1589_v63 = vor.u32 %v1588_v30, %v1587_v8  ;;  %v1592_v41 = vshll.u32 %v1591_v21, 23  ;;  %1825 = vxpose.xlu0.b32.start [1/5] (short) %v1779_v2, 128  ;;  %v4182_v45 = vpop.permute.xlu0 %1739  ;;  %v4846_v10 = vld [vmem:[#allocation17_spill] sm:$0xff] }
 0x1d4   :  { %v4172_v24 = vshrl.u32 %v1679_v11, 30  ;;  %v1201_v9 = vsel %vm1190_vm10, nan, %v3783_v15  ;;  %vm1294_vm7 = vweird.f32 %v2557_v3  ;;  %vm1297_vm3 = vcmp.lt.s32.totalorder %v3777_v52, 2 }
 0x1d5   :  { %v1372_v60 = vsub.s32 0, %v3780_v22  ;;  %v2112_v56 = vpop.eup %2111  ;;  %v1304_v50 = vsel %vm1297_vm3, %v4031_v16, %v4021_v51  ;;  %v1975_v32 = vmin.u32 %v1060_v36, %v4149_v25  ;;  %v1593_v44 = vor.u32 4788187, %v1592_v41 }
 0x1d6   :  { %v1681_v38 = vshll.u32 %v4172_v24, 30  ;;  %v2114_v42 = vpop.eup %2113  ;;  %v1758_v19 = vmul.f32 %v4182_v45, %v889_v34  ;;  %v1759_v15 = vmul.f32 %v4182_v45, %v993_v12  ;;  %vm1509_vm15 = vcmp.eq.s32.totalorder %v1504_v62, 2 }
 0x1d7   :  { %v1510_v52 = vxor.u32 2147483648, %v2112_v56  ;;  %1794 = vxpose.xlu1.b32.cont [2/5] (short) %v4845_v28, 128  ;;  %v1507_v47 = vxor.u32 2147483648, %v2114_v42  ;;  %v1594_v61 = vand.u32 2147483647, %v1593_v44  ;;  %v1596_v40 = vcvt.s32.f32 %v1589_v63  ;;  %1826 = vxpose.xlu0.b32.cont [2/5] (short) %v3762_v39, 128  ;;  %v4215_v37 = vpop.permute.xlu0 %1749 }
 0x1d8   :  { %v4189_v51 = vsub.s32 %v1678_v4, %v1681_v38  ;;  %v1305_v16 = vsel %vm1294_vm7, nan, %v1304_v50  ;;  %v1987_v23 = vmin.u32 %v1372_v60, %v3780_v22  ;;  %vm1506_vm5 = vcmp.eq.s32.totalorder %v1504_v62, 0 }
 0x1d9   :  { %v1511_v26 = vsel %vm1509_vm15, %v1510_v52, %v2114_v42  ;;  %vm1505_vm8 = vcmp.lt.s32.totalorder %v1504_v62, 2  ;;  %v1508_v5 = vsel %vm1506_vm5, %v2112_v56, %v1507_v47  ;;  %v1597_v49 = vmul.f32 %v1596_v40, %v1594_v61  ;;  %v4851_v52 = vld [vmem:[#allocation14_spill] sm:$0xff] }
 0x1da   :  { %v1600_v29 = vsub.s32 4, %v4069_v14  ;;  %v1761_v0 = vmul.f32 %v4195_v59, %v1201_v9  ;;  %v1062_v1 = vclz %v1975_v32  ;;  %v1512_v57 = vsel %vm1505_vm8, %v1508_v5, %v1511_v26 }
 0x1db   :  { %v1684_v39 = vsub.s32 0, %v4189_v51  ;;  %1795 = vxpose.xlu1.b32.cont [3/5] (short) %v1758_v19, 128  ;;  %v1762_v3 = vmul.f32 %v4195_v59, %v1305_v16  ;;  %v1598_v4 = vxor.u32 2147483648, %v1597_v49  ;;  %1827 = vxpose.xlu0.b32.cont [3/5] (short) %v1759_v15, 128  ;;  %vm1516_vm14 = vcmp.lt.s32.totalorder %v4823_v43, 0  ;;  %v4850_v15 = vld [vmem:[#allocation16_spill] sm:$0xff] }
 0x1dc   :  { %vm1965_vm2 = vcmp.lt.s32.totalorder %v4846_v10, 0  ;;  %v1374_v36 = vclz %v1987_v23  ;;  %vm1502_vm1 = vweird.f32 %v4807_v27  ;;  %v4847_v30 = vand.u32 2147483647, %v4823_v43 }
 0x1dd   :  { %v1513_v8 = vsel %vm1502_vm1, nan, %v1512_v57  ;;  %v1599_v11 = vsel %vm1516_vm14, %v1598_v4, %v1597_v49  ;;  %v1601_v17 = vsel %vm1516_vm14, %v1600_v29, %v4069_v14  ;;  %v1976_v48 = vadd.s32 4294967294, %v1062_v1  ;;  %v4852_v57 = vld [vmem:[#allocation26_spill] sm:$0xff] }
 0x1de   :  { %vm4206_vm11 = vcmp.le.f32.partialorder %v4847_v30, 0.7853982  ;;  %v1999_v62 = vmin.u32 %v1684_v39, %v4189_v51  ;;  %v753_v27 = vsel %vm1965_vm2, 0, %v4846_v10  ;;  %v1764_v14 = vmul.f32 %v4215_v37, %v1513_v8 }
 0x1df   :  { %v1602_v34 = vsel %vm4206_vm11, %v4823_v43, %v1599_v11  ;;  %1796 = vxpose.xlu1.b32.cont [4/5] (short) %v1761_v0, 128  ;;  %1828 = vxpose.xlu0.b32.cont [4/5] (short) %v1762_v3, 128  ;;  %v1603_v2 = vsel %vm4206_vm11, 0, %v1601_v17  ;;  %v1988_v33 = vadd.s32 4294967294, %v1374_v36  ;;  %vm1977_vm13 = vcmp.lt.s32.totalorder %v1976_v48, 0 }
 0x1e0   :  { %2115 = vcosq.f32 %v1602_v34  ;;  %v1686_v12 = vclz %v1999_v62  ;;  %v758_v63 = vsub.s32 4294967266, %v753_v27  ;;  %v1607_v41 = vadd.s32 3, %v1603_v2 }
 0x1e1   :  { %2117 = vsinq.f32 %v1602_v34  ;;  %vm1989_vm12 = vcmp.lt.s32.totalorder %v1988_v33, 0  ;;  %v1065_v9 = vsel %vm1977_vm13, 0, %v1976_v48  ;;  %v754_v42 = vsub.s32 32, %v753_v27 }
 0x1e2   :  { %v2000_v60 = vadd.s32 4294967294, %v1686_v12  ;;  %v759_v56 = vadd.s32 127, %v758_v63  ;;  %v1608_v50 = vand.u32 3, %v1607_v41  ;;  %v1377_v32 = vsel %vm1989_vm12, 0, %v1988_v33 }
 0x1e3   :  { %1797 = vxpose.xlu1.b32.end [5/5] (short) %v1764_v14, 128  ;;  %v1070_v44 = vsub.s32 4294967266, %v1065_v9  ;;  %v738_v28 = vadd.s32 %v4851_v52, %v4850_v15  ;;  %v1382_v40 = vsub.s32 4294967266, %v1377_v32  ;;  %v1066_v0 = vsub.s32 32, %v1065_v9  ;;  %v4853_v52 = vld [vmem:[#allocation4_spill] sm:$0xff] }
 0x1e4   :  { %vm2001_vm9 = vcmp.lt.s32.totalorder %v2000_v60, 0  ;;  %v760_v61 = vshll.u32 %v759_v56, 23  ;;  %vm1613_vm10 = vcmp.eq.s32.totalorder %v1608_v50, 2  ;;  %vm1610_vm0 = vcmp.eq.s32.totalorder %v1608_v50, 0 }
 0x1e5   :  { %v1071_v23 = vadd.s32 127, %v1070_v44  ;;  %v756_v5 = vshrl.u32 %v738_v28, %v754_v42  ;;  %vm1609_vm4 = vcmp.lt.s32.totalorder %v1608_v50, 2  ;;  %v1689_v29 = vsel %vm2001_vm9, 0, %v2000_v60 }
 0x1e6   :  { %vm1606_vm6 = vweird.f32 %v4823_v43  ;;  %v755_v39 = vshll.u32 %v4852_v57, %v753_v27  ;;  %v761_v3 = vor.u32 4788187, %v760_v61  ;;  %v1383_v4 = vadd.s32 127, %v1382_v40  ;;  %v4861_v57 = vld [vmem:[#allocation10_spill] sm:$0xff] }
 0x1e7   :  { %v1050_v36 = vadd.s32 %v3920_v58, %v3949_v6  ;;  %v1072_v8 = vshll.u32 %v1071_v23, 23  ;;  %v1694_v30 = vsub.s32 4294967266, %v1689_v29  ;;  %v1378_v17 = vsub.s32 32, %v1377_v32  ;;  %v4857_v23 = vld [vmem:[#allocation12_spill] sm:$0xff] }
 0x1e8   :  { %v757_v11 = vor.u32 %v756_v5, %v755_v39  ;;  %v762_v34 = vand.u32 2147483647, %v761_v3  ;;  %v1362_v43 = vadd.s32 %v3613_v55, %v3610_v54  ;;  %v1384_v62 = vshll.u32 %v1383_v4, 23 }
 0x1e9   :  { %v1068_v48 = vshrl.u32 %v1050_v36, %v1066_v0  ;;  %v1067_v27 = vshll.u32 %v4149_v25, %v1065_v9  ;;  %v1073_v2 = vor.u32 4788187, %v1072_v8  ;;  %v1695_v14 = vadd.s32 127, %v1694_v30 }
 0x1ea   :  { %v2116_v38 = vpop.eup %2115  ;;  %v764_v33 = vcvt.s32.f32 %v757_v11  ;;  %v1380_v12 = vshrl.u32 %v1362_v43, %v1378_v17  ;;  %v1690_v6 = vsub.s32 32, %v1689_v29  ;;  %v1379_v41 = vshll.u32 %v3780_v22, %v1377_v32 }
 0x1eb   :  { %v2118_v19 = vpop.eup %2117  ;;  %v1614_v47 = vxor.u32 2147483648, %v2116_v38  ;;  %v1069_v58 = vor.u32 %v1068_v48, %v1067_v27  ;;  %v1385_v60 = vor.u32 4788187, %v1384_v62  ;;  %v1074_v56 = vand.u32 2147483647, %v1073_v2 }
 0x1ec   :  { %v1611_v16 = vxor.u32 2147483648, %v2118_v19  ;;  %v765_v63 = vmul.f32 %v764_v33, %v762_v34  ;;  %v1674_v50 = vadd.s32 %v4124_v20, %v4115_v13  ;;  %v1696_v44 = vshll.u32 %v1695_v14, 23 }
 0x1ed   :  { %v1615_v26 = vsel %vm1613_vm10, %v1614_v47, %v2118_v19  ;;  %v1076_v54 = vcvt.s32.f32 %v1069_v58  ;;  %v1386_v25 = vand.u32 2147483647, %v1385_v60  ;;  %v1691_v19 = vshll.u32 %v4189_v51, %v1689_v29 }
 0x1ee   :  { %v1612_v49 = vsel %vm1610_vm0, %v2116_v38, %v1611_v16  ;;  %v1381_v38 = vor.u32 %v1380_v12, %v1379_v41  ;;  %v1692_v55 = vshrl.u32 %v1674_v50, %v1690_v6  ;;  %v766_v42 = vxor.u32 2147483648, %v765_v63 }
 0x1ef   :  { %v1616_v1 = vsel %vm1609_vm4, %v1612_v49, %v1615_v26  ;;  %v1077_v9 = vmul.f32 %v1076_v54, %v1074_v56  ;;  %v1697_v15 = vor.u32 4788187, %v1696_v44  ;;  %vm684_vm7 = vcmp.lt.s32.totalorder %v4853_v52, 0 }
 0x1f0   :  { %v1617_v10 = vsel %vm1606_vm6, nan, %v1616_v1  ;;  %v1388_v28 = vcvt.s32.f32 %v1381_v38  ;;  %v1693_v47 = vor.u32 %v1692_v55, %v1691_v19  ;;  %v767_v22 = vsel %vm684_vm7, %v766_v42, %v765_v63 }
 0x1f1   :  { %v1765_v21 = vmul.f32 %v4215_v37, %v1617_v10  ;;  %v1078_v61 = vxor.u32 2147483648, %v1077_v9  ;;  %v1698_v13 = vand.u32 2147483647, %v1697_v15  ;;  %v4854_v20 = vand.u32 2147483647, %v4853_v52 }
 0x1f2   :  { %v1389_v32 = vmul.f32 %v1388_v28, %v1386_v25  ;;  %v1700_v16 = vcvt.s32.f32 %v1693_v47  ;;  %vm996_vm15 = vcmp.lt.s32.totalorder %v4806_v7, 0  ;;  %v768_v26 = vsub.s32 4, %v4857_v23 }
 0x1f3   :  { %1829 = vxpose.xlu0.b32.end [5/5] (short) %v1765_v21, 128  ;;  %vm4240_vm3 = vcmp.le.f32.partialorder %v4854_v20, 0.7853982  ;;  %v1079_v49 = vsel %vm996_vm15, %v1078_v61, %v1077_v9  ;;  %v4858_v0 = vand.u32 2147483647, %v4806_v7  ;;  %vm1308_vm8 = vcmp.lt.s32.totalorder %v4861_v57, 0 }
 0x1f4   :  { %v770_v51 = vsel %vm4240_vm3, %v4853_v52, %v767_v22  ;;  %v1390_v5 = vxor.u32 2147483648, %v1389_v32  ;;  %v1701_v29 = vmul.f32 %v1700_v16, %v1698_v13  ;;  %v769_v3 = vsel %vm684_vm7, %v768_v26, %v4857_v23 }
 0x1f5   :  { %2119 = vcosq.f32 %v770_v51  ;;  %vm4253_vm5 = vcmp.le.f32.partialorder %v4858_v0, 0.7853982  ;;  %v1080_v36 = vsub.s32 4, %v4101_v46  ;;  %v4862_v8 = vand.u32 2147483647, %v4861_v57 }
 0x1f6   :  { %2121 = vsinq.f32 %v770_v51  ;;  %v1082_v39 = vsel %vm4253_vm5, %v4806_v7, %v1079_v49  ;;  %v1391_v4 = vsel %vm1308_vm8, %v1390_v5, %v1389_v32  ;;  %v1702_v10 = vxor.u32 2147483648, %v1701_v29 }
 0x1f7   :  { %vm4269_vm14 = vcmp.le.f32.partialorder %v4862_v8, 0.7853982  ;;  %2123 = vcosq.f32 %v1082_v39  ;;  %vm1620_vm2 = vcmp.lt.s32.totalorder %v4836_v35, 0  ;;  %v771_v21 = vsel %vm4240_vm3, 0, %v769_v3 }
 0x1f8   :  { %v1394_v11 = vsel %vm4269_vm14, %v4861_v57, %v1391_v4  ;;  %2125 = vsinq.f32 %v1082_v39  ;;  %v1703_v17 = vsel %vm1620_vm2, %v1702_v10, %v1701_v29  ;;  %v1392_v48 = vsub.s32 4, %v3750_v18  ;;  %v4867_v29 = vld [vmem:[#allocation22_spill] sm:$0xff] }
 0x1f9   :  { %v1081_v34 = vsel %vm996_vm15, %v1080_v36, %v4101_v46  ;;  %v775_v43 = vadd.s32 3, %v771_v21  ;;  %2127 = vcosq.f32 %v1394_v11  ;;  %vm4287_vm1 = vcmp.le.f32.partialorder %v1618_v53, 0.7853982 }
 0x1fa   :  { %2129 = vsinq.f32 %v1394_v11  ;;  %v1706_v2 = vsel %vm4287_vm1, %v4836_v35, %v1703_v17  ;;  %v1083_v33 = vsel %vm4253_vm5, 0, %v1081_v34  ;;  %v1393_v46 = vsel %vm1308_vm8, %v1392_v48, %v3750_v18 }
 0x1fb   :  { %v1704_v12 = vsub.s32 4, %v4172_v24  ;;  %v776_v53 = vand.u32 3, %v775_v43  ;;  %2131 = vcosq.f32 %v1706_v2  ;;  %v1087_v63 = vadd.s32 3, %v1083_v33 }
 0x1fc   :  { %2133 = vsinq.f32 %v1706_v2  ;;  %v1395_v60 = vsel %vm4269_vm14, 0, %v1393_v46  ;;  %vm774_vm0 = vweird.f32 %v4853_v52  ;;  %vm1086_vm3 = vweird.f32 %v4806_v7 }
 0x1fd   :  { %v1705_v50 = vsel %vm1620_vm2, %v1704_v12, %v4172_v24  ;;  %vm778_vm11 = vcmp.eq.s32.totalorder %v776_v53, 0  ;;  %vm781_vm13 = vcmp.eq.s32.totalorder %v776_v53, 2  ;;  %v1399_v38 = vadd.s32 3, %v1395_v60 }
 0x1fe   :  { %v1088_v54 = vand.u32 3, %v1087_v63  ;;  %v1707_v9 = vsel %vm4287_vm1, 0, %v1705_v50  ;;  %vm777_vm12 = vcmp.lt.s32.totalorder %v776_v53, 2  ;;  %vm1398_vm14 = vweird.f32 %v4861_v57 }
 0x1ff   :  { %v2120_v27 = vpop.eup %2119  ;;  %v1400_v28 = vand.u32 3, %v1399_v38  ;;  %v1711_v47 = vadd.s32 3, %v1707_v9  ;;  %vm1710_vm1 = vweird.f32 %v4836_v35 }
 0x200   :  { %v2122_v14 = vpop.eup %2121  ;;  %v782_v6 = vxor.u32 2147483648, %v2120_v27  ;;  %vm1090_vm9 = vcmp.eq.s32.totalorder %v1088_v54, 0  ;;  %vm1093_vm10 = vcmp.eq.s32.totalorder %v1088_v54, 2  ;;  %vm1089_vm4 = vcmp.lt.s32.totalorder %v1088_v54, 2 }
 0x201   :  { %v779_v58 = vxor.u32 2147483648, %v2122_v14  ;;  %v2124_v41 = vpop.eup %2123  ;;  %vm1402_vm6 = vcmp.eq.s32.totalorder %v1400_v28, 0  ;;  %vm1405_vm7 = vcmp.eq.s32.totalorder %v1400_v28, 2  ;;  %v1712_v16 = vand.u32 3, %v1711_v47 }
 0x202   :  { %v2126_v56 = vpop.eup %2125  ;;  %v783_v44 = vsel %vm781_vm13, %v782_v6, %v2122_v14  ;;  %v1094_v25 = vxor.u32 2147483648, %v2124_v41  ;;  %vm1401_vm15 = vcmp.lt.s32.totalorder %v1400_v28, 2 }
 0x203   :  { %v780_v18 = vsel %vm778_vm11, %v2120_v27, %v779_v58  ;;  %v2128_v55 = vpop.eup %2127  ;;  %v1091_v42 = vxor.u32 2147483648, %v2126_v56  ;;  %vm1714_vm5 = vcmp.eq.s32.totalorder %v1712_v16, 0  ;;  %vm1717_vm8 = vcmp.eq.s32.totalorder %v1712_v16, 2 }
 0x204   :  { %v2130_v19 = vpop.eup %2129  ;;  %v784_v15 = vsel %vm777_vm12, %v780_v18, %v783_v44  ;;  %v1406_v32 = vxor.u32 2147483648, %v2128_v55  ;;  %v1095_v13 = vsel %vm1093_vm10, %v1094_v25, %v2126_v56  ;;  %vm1713_vm2 = vcmp.lt.s32.totalorder %v1712_v16, 2 }
 0x205   :  { %v2132_v24 = vpop.eup %2131  ;;  %v1403_v22 = vxor.u32 2147483648, %v2130_v19  ;;  %v1092_v61 = vsel %vm1090_vm9, %v2124_v41, %v1091_v42  ;;  %v785_v40 = vsel %vm774_vm0, nan, %v784_v15  ;;  %vm1889_vm11 = vcmask 293888  }
 0x206   :  { %v2134_v20 = vpop.eup %2133  ;;  %v1096_v51 = vsel %vm1089_vm4, %v1092_v61, %v1095_v13  ;;  %v1407_v26 = vsel %vm1405_vm7, %v1406_v32, %v2130_v19  ;;  %v1718_v49 = vxor.u32 2147483648, %v2132_v24  ;;  %v1757_v0 = vmul.f32 %v4867_v29, %v785_v40 }
 0x207   :  { %v1404_v23 = vsel %vm1402_vm6, %v2128_v55, %v1403_v22  ;;  %v1715_v5 = vxor.u32 2147483648, %v2134_v20  ;;  %v1097_v1 = vsel %vm1086_vm3, nan, %v1096_v51 }
 0x208   :  { %v1408_v39 = vsel %vm1401_vm15, %v1404_v23, %v1407_v26  ;;  %v1719_v3 = vsel %vm1717_vm8, %v1718_v49, %v2134_v20 }
 0x209   :  { %v1716_v52 = vsel %vm1714_vm5, %v2132_v24, %v1715_v5  ;;  %v1409_v4 = vsel %vm1398_vm14, nan, %v1408_v39 }
 0x20a   :  { %v1720_v10 = vsel %vm1713_vm2, %v1716_v52, %v1719_v3  ;;  %v1763_v36 = vmul.f32 %v4195_v59, %v1409_v4 }
 0x20b   :  { %v1721_v7 = vsel %vm1710_vm1, nan, %v1720_v10 }
 0x20c   :  { %v1766_v8 = vmul.f32 %v4215_v37, %v1721_v7 }
 0x220   :  { %1857 = vxpose.xlu0.b32.start [1/5] (short) %v4168_v31, 128  ;;  %v1760_v31 = vmul.f32 %v4182_v45, %v1097_v1 }
 0x224   :  { %1858 = vxpose.xlu0.b32.cont [2/5] (short) %v1757_v0, 128 }
 0x228   :  { %1859 = vxpose.xlu0.b32.cont [3/5] (short) %v1760_v31, 128 }
 0x22c   :  { %1860 = vxpose.xlu0.b32.cont [4/5] (short) %v1763_v36, 128 }
 0x230   :  { %1861 = vxpose.xlu0.b32.end [5/5] (short) %v1766_v8, 128 }
 0x253   :  { %v1809_v30 = vpop.trf.xlu1 }
 0x254   :  { %1890 = vst.msk [vmem:[%s4512_s4] sm:$0xff] %vm1889_vm11, %v1809_v30 }
 0x257   :  { %v1810_v45 = vpop.trf.xlu1 }
 0x258   :  { %1891 = vst.msk [vmem:[%s4512_s4 + $0x8] sm:$0xff] %vm1889_vm11, %v1810_v45 }
 0x25b   :  { %v1811_v59 = vpop.trf.xlu1 }
 0x25c   :  { %1892 = vst.msk [vmem:[%s4512_s4 + $0x10] sm:$0xff] %vm1889_vm11, %v1811_v59 }
 0x25f   :  { %v1812_v35 = vpop.trf.xlu1 }
 0x260   :  { %1893 = vst.msk [vmem:[%s4512_s4 + $0x18] sm:$0xff] %vm1889_vm11, %v1812_v35 }
 0x263   :  { %v1841_v37 = vpop.trf.xlu0  ;;  %v1813_v57 = vpop.trf.xlu1 }
 0x264   :  { %1906 = vst.msk [vmem:[%s4512_s4 + $0x80] sm:$0xff] %vm1889_vm11, %v1841_v37  ;;  %1894 = vst.msk [vmem:[%s4512_s4 + $0x20] sm:$0xff] %vm1889_vm11, %v1813_v57 }
 0x267   :  { %v1842_v21 = vpop.trf.xlu0  ;;  %v1814_v11 = vpop.trf.xlu1 }
 0x268   :  { %1907 = vst.msk [vmem:[%s4512_s4 + $0x88] sm:$0xff] %vm1889_vm11, %v1842_v21  ;;  %1895 = vst.msk [vmem:[%s4512_s4 + $0x28] sm:$0xff] %vm1889_vm11, %v1814_v11 }
 0x26b   :  { %v1843_v17 = vpop.trf.xlu0  ;;  %v1815_v48 = vpop.trf.xlu1 }
 0x26c   :  { %1908 = vst.msk [vmem:[%s4512_s4 + $0x90] sm:$0xff] %vm1889_vm11, %v1843_v17  ;;  %1896 = vst.msk [vmem:[%s4512_s4 + $0x30] sm:$0xff] %vm1889_vm11, %v1815_v48 }
 0x26f   :  { %v1844_v34 = vpop.trf.xlu0  ;;  %v1816_v43 = vpop.trf.xlu1 }
 0x270   :  { %1909 = vst.msk [vmem:[%s4512_s4 + $0x98] sm:$0xff] %vm1889_vm11, %v1844_v34  ;;  %1897 = vst.msk [vmem:[%s4512_s4 + $0x38] sm:$0xff] %vm1889_vm11, %v1816_v43 }
 0x273   :  { %v1845_v62 = vpop.trf.xlu0  ;;  %v1817_v27 = vpop.trf.xlu1 }
 0x274   :  { %1910 = vst.msk [vmem:[%s4512_s4 + $0xa0] sm:$0xff] %vm1889_vm11, %v1845_v62  ;;  %1898 = vst.msk [vmem:[%s4512_s4 + $0x40] sm:$0xff] %vm1889_vm11, %v1817_v27 }
 0x277   :  { %v1846_v2 = vpop.trf.xlu0  ;;  %v1818_v14 = vpop.trf.xlu1 }
 0x278   :  { %1911 = vst.msk [vmem:[%s4512_s4 + $0xa8] sm:$0xff] %vm1889_vm11, %v1846_v2  ;;  %1899 = vst.msk [vmem:[%s4512_s4 + $0x48] sm:$0xff] %vm1889_vm11, %v1818_v14 }
 0x27b   :  { %v1847_v33 = vpop.trf.xlu0  ;;  %v1819_v46 = vpop.trf.xlu1 }
 0x27c   :  { %1912 = vst.msk [vmem:[%s4512_s4 + $0xb0] sm:$0xff] %vm1889_vm11, %v1847_v33  ;;  %1900 = vst.msk [vmem:[%s4512_s4 + $0x50] sm:$0xff] %vm1889_vm11, %v1819_v46 }
 0x27f   :  { %v1848_v12 = vpop.trf.xlu0  ;;  %v1820_v53 = vpop.trf.xlu1 }
 0x280   :  { %1913 = vst.msk [vmem:[%s4512_s4 + $0xb8] sm:$0xff] %vm1889_vm11, %v1848_v12  ;;  %1901 = vst.msk [vmem:[%s4512_s4 + $0x58] sm:$0xff] %vm1889_vm11, %v1820_v53 }
 0x283   :  { %v1849_v58 = vpop.trf.xlu0  ;;  %v1821_v6 = vpop.trf.xlu1 }
 0x284   :  { %1914 = vst.msk [vmem:[%s4512_s4 + $0xc0] sm:$0xff] %vm1889_vm11, %v1849_v58  ;;  %1902 = vst.msk [vmem:[%s4512_s4 + $0x60] sm:$0xff] %vm1889_vm11, %v1821_v6 }
 0x287   :  { %v1850_v63 = vpop.trf.xlu0  ;;  %v1822_v41 = vpop.trf.xlu1 }
 0x288   :  { %1915 = vst.msk [vmem:[%s4512_s4 + $0xc8] sm:$0xff] %vm1889_vm11, %v1850_v63  ;;  %1903 = vst.msk [vmem:[%s4512_s4 + $0x68] sm:$0xff] %vm1889_vm11, %v1822_v41 }
 0x28b   :  { %v1851_v60 = vpop.trf.xlu0  ;;  %v1823_v56 = vpop.trf.xlu1 }
 0x28c   :  { %1916 = vst.msk [vmem:[%s4512_s4 + $0xd0] sm:$0xff] %vm1889_vm11, %v1851_v60  ;;  %1904 = vst.msk [vmem:[%s4512_s4 + $0x70] sm:$0xff] %vm1889_vm11, %v1823_v56 }
 0x28f   :  { %v1852_v50 = vpop.trf.xlu0  ;;  %v1824_v18 = vpop.trf.xlu1 }
 0x290   :  { %1917 = vst.msk [vmem:[%s4512_s4 + $0xd8] sm:$0xff] %vm1889_vm11, %v1852_v50  ;;  %1905 = vst.msk [vmem:[%s4512_s4 + $0x78] sm:$0xff] %vm1889_vm11, %v1824_v18 }
 0x293   :  { %v1853_v44 = vpop.trf.xlu0 }
 0x294   :  { %1918 = vst.msk [vmem:[%s4512_s4 + $0xe0] sm:$0xff] %vm1889_vm11, %v1853_v44 }
 0x297   :  { %v1854_v38 = vpop.trf.xlu0 }
 0x298   :  { %1919 = vst.msk [vmem:[%s4512_s4 + $0xe8] sm:$0xff] %vm1889_vm11, %v1854_v38 }
 0x29b   :  { %v1855_v54 = vpop.trf.xlu0 }
 0x29c   :  { %1920 = vst.msk [vmem:[%s4512_s4 + $0xf0] sm:$0xff] %vm1889_vm11, %v1855_v54 }
 0x29f   :  { %v1856_v55 = vpop.trf.xlu0 }
 0x2a0   :  { %1921 = vst.msk [vmem:[%s4512_s4 + $0xf8] sm:$0xff] %vm1889_vm11, %v1856_v55 }
 0x2a3   :  { %v1873_v42 = vpop.trf.xlu0 }
 0x2a4   :  { %1922 = vst.msk [vmem:[%s4512_s4 + $0x100] sm:$0xff] %vm1889_vm11, %v1873_v42 }
 0x2a7   :  { %v1874_v25 = vpop.trf.xlu0 }
 0x2a8   :  { %1923 = vst.msk [vmem:[%s4512_s4 + $0x108] sm:$0xff] %vm1889_vm11, %v1874_v25 }
 0x2ab   :  { %v1875_v9 = vpop.trf.xlu0 }
 0x2ac   :  { %1924 = vst.msk [vmem:[%s4512_s4 + $0x110] sm:$0xff] %vm1889_vm11, %v1875_v9 }
 0x2af   :  { %v1876_v19 = vpop.trf.xlu0 }
 0x2b0   :  { %1925 = vst.msk [vmem:[%s4512_s4 + $0x118] sm:$0xff] %vm1889_vm11, %v1876_v19 }
 0x2b3   :  { %v1877_v15 = vpop.trf.xlu0 }
 0x2b4   :  { %1926 = vst.msk [vmem:[%s4512_s4 + $0x120] sm:$0xff] %vm1889_vm11, %v1877_v15 }
 0x2b7   :  { %v1878_v28 = vpop.trf.xlu0 }
 0x2b8   :  { %1927 = vst.msk [vmem:[%s4512_s4 + $0x128] sm:$0xff] %vm1889_vm11, %v1878_v28 }
 0x2bb   :  { %v1879_v47 = vpop.trf.xlu0 }
 0x2bc   :  { %1928 = vst.msk [vmem:[%s4512_s4 + $0x130] sm:$0xff] %vm1889_vm11, %v1879_v47 }
 0x2bf   :  { %v1880_v24 = vpop.trf.xlu0 }
 0x2c0   :  { %1929 = vst.msk [vmem:[%s4512_s4 + $0x138] sm:$0xff] %vm1889_vm11, %v1880_v24 }
 0x2c3   :  { %v1881_v22 = vpop.trf.xlu0 }
 0x2c4   :  { %1930 = vst.msk [vmem:[%s4512_s4 + $0x140] sm:$0xff] %vm1889_vm11, %v1881_v22 }
 0x2c7   :  { %v1882_v32 = vpop.trf.xlu0 }
 0x2c8   :  { %1931 = vst.msk [vmem:[%s4512_s4 + $0x148] sm:$0xff] %vm1889_vm11, %v1882_v32 }
 0x2cb   :  { %v1883_v61 = vpop.trf.xlu0 }
 0x2cc   :  { %1932 = vst.msk [vmem:[%s4512_s4 + $0x150] sm:$0xff] %vm1889_vm11, %v1883_v61 }
 0x2cf   :  { %v1884_v13 = vpop.trf.xlu0 }
 0x2d0   :  { %1933 = vst.msk [vmem:[%s4512_s4 + $0x158] sm:$0xff] %vm1889_vm11, %v1884_v13 }
 0x2d3   :  { %v1885_v20 = vpop.trf.xlu0 }
 0x2d4   :  { %1934 = vst.msk [vmem:[%s4512_s4 + $0x160] sm:$0xff] %vm1889_vm11, %v1885_v20 }
 0x2d7   :  { %v1886_v40 = vpop.trf.xlu0 }
 0x2d8   :  { %1935 = vst.msk [vmem:[%s4512_s4 + $0x168] sm:$0xff] %vm1889_vm11, %v1886_v40 }
 0x2db   :  { %v1887_v51 = vpop.trf.xlu0 }
 0x2dc   :  { %1936 = vst.msk [vmem:[%s4512_s4 + $0x170] sm:$0xff] %vm1889_vm11, %v1887_v51 }
 0x2df   :  { %v1888_v16 = vpop.trf.xlu0 }
 0x2e0   :  { %1937 = vst.msk [vmem:[%s4512_s4 + $0x178] sm:$0xff] %vm1889_vm11, %v1888_v16 }

// kernel: tpu_custom_call.1
= control target key start
LH: loop header
LB: loop body
LE: loop exit
PB: predicated region body
PF: predicated region fallthrough
CT: control target
= control target key end

     0   :  { %v2048_v2 = vmov 0   ;;  %s4063_s0 = inlined_call_operand.vmem [shape: f32[4,384], index: 0, kind: input, shape index: {}]   ;;  %s4064_s1 = inlined_call_operand.vmem [shape: f32[40,1], index: 1, kind: input, shape index: {}]   ;;  %s4065_s2 = inlined_call_operand.vmem [shape: f32[40,1], index: 2, kind: input, shape index: {}]   ;;  %s4066_s3 = inlined_call_operand.vmem [shape: f32[40,1], index: 3, kind: input, shape index: {}]   ;;  %s4067_s4 = inlined_call_operand.hbm [shape: f32[36,384], index: 4, kind: output, shape index: {}]  }
   0x1   :  { %v75_v0 = vld [vmem:[%s4064_s1 + $0x10] sm:$0xff]  ;;  %v73_v1 = vld [vmem:[%s4064_s1] sm:$0xff]  ;;  %1957 = vset.pattern.permute.xlu1 %v2048_v2  ;;  %1956 = vset.pattern.permute.xlu0 %v2048_v2  ;;  %v76_v3 = vld [vmem:[%s4064_s1 + $0x18] sm:$0xff] }
   0x2   :  { %90 = vperm.xlu1 %1957, %v75_v0   ;;  %80 = vperm.xlu0 %1956, %v73_v1   ;;  %v74_v4 = vld [vmem:[%s4064_s1 + $0x8] sm:$0xff]  ;;  %v18_v5 = vld [vmem:[%s4063_s0] sm:$0xff] }
   0x3   :  { %v19_v6 = vld [vmem:[%s4063_s0 + $0x8] sm:$0xf] }
   0x4   :  { %9 = vsyncpa [#allocation4], 0  ;;  %v22_v7 = vcombine.high %v18_v5, %v18_v5  ;;  %v27_v8 = vcombine.low %v18_v5, %v18_v5  ;;  %v28_v9 = vcombine.low %v19_v6, %v19_v6  ;;  %40 = vst [vmem:[#allocation2 + $0x30] sm:$0xf] %v18_v5  ;;  %v118_v10 = vld [vmem:[%s4065_s2] sm:$0xff]  ;;  %v2049_v12 = vmov 0.0  }
   0x5   :  { %42 = vst [vmem:[#allocation2 + $0x40] sm:$0xf] %v19_v6  ;;  %44 = vst [vmem:[#allocation2 + $0x38] sm:$0xf0] %v18_v5  ;;  %v77_v11 = vld [vmem:[%s4064_s1 + $0x20] sm:$0xff]  ;;  %v120_v13 = vld [vmem:[%s4065_s2 + $0x10] sm:$0xff] }
   0x6   :  { %95 = vperm.xlu1 %1957, %v76_v3   ;;  %85 = vperm.xlu0 %1956, %v74_v4   ;;  %24 = vst [vmem:[#allocation2] sm:$0xf] %v18_v5  ;;  %26 = vst [vmem:[#allocation2 + $0x10] sm:$0xf] %v19_v6  ;;  %v119_v14 = vld [vmem:[%s4065_s2 + $0x8] sm:$0xff]  ;;  %v122_v15 = vld [vmem:[%s4065_s2 + $0x20] sm:$0xff] }
   0x7   :  { %32 = vst [vmem:[#allocation2 + $0x8] sm:$0xf0] %v18_v5  ;;  %34 = vst [vmem:[#allocation2 + $0x18] sm:$0xf] %v18_v5  ;;  %v121_v16 = vld [vmem:[%s4065_s2 + $0x18] sm:$0xff]  ;;  %v1724_v17 = vld [vmem:[%s4066_s3 + $0x8] sm:$0xff] }
   0x8   :  { %36 = vst [vmem:[#allocation2 + $0x28] sm:$0xf] %v19_v6  ;;  %38 = vst [vmem:[#allocation2 + $0x20] sm:$0xf0] %v18_v5  ;;  %v1723_v18 = vld [vmem:[%s4066_s3] sm:$0xff]  ;;  %v1726_v19 = vld [vmem:[%s4066_s3 + $0x18] sm:$0xff] }
   0x9   :  { %46 = vst [vmem:[#allocation2 + $0x48] sm:$0xf] %v18_v5  ;;  %48 = vst [vmem:[#allocation2 + $0x58] sm:$0xf] %v19_v6  ;;  %v1725_v20 = vld [vmem:[%s4066_s3 + $0x10] sm:$0xff]  ;;  %v1727_v21 = vld [vmem:[%s4066_s3 + $0x20] sm:$0xff] }
   0xa   :  { %50 = vst [vmem:[#allocation2 + $0x50] sm:$0xf0] %v18_v5  ;;  %52 = vst [vmem:[#allocation2 + $0x60] sm:$0xf] %v18_v5  ;;  %125 = vperm.xlu1 %1957, %v118_v10   ;;  %100 = vperm.xlu0 %1956, %v77_v11   ;;  %v4068_v11 = vmov 1326507024  }
   0xb   :  { %54 = vst [vmem:[#allocation2 + $0x70] sm:$0xf] %v19_v6  ;;  %55 = vst [vmem:[#allocation2 + $0x60] sm:$0xf0] %v2049_v12  ;;  %s2056_s3 = smov [#allocation3]  }
   0xc   :  { %56 = vst [vmem:[#allocation2 + $0x68] sm:$0xf0] %v2049_v12  ;;  %57 = vst [vmem:[#allocation2 + $0x70] sm:$0xf0] %v2049_v12  ;;  %s1814_s20 = sshll.u32 %s2056_s3, 4  ;;  %s1815_s20 = int_to_ptr.vmem [resolvable:$true] %s1814_s20 }
   0xd   :  { %41 = vst [vmem:[#allocation2 + $0x38] sm:$0xf] %v22_v7  ;;  %43 = vst [vmem:[#allocation2 + $0x30] sm:$0xf0] %v27_v8  ;;  %s2024_s21 = scalar_lea.vmem %s1815_s20, 1920  ;;  %p2029_p1 = scmp.lt.s32.totalorder %s1815_s20, %s1815_s20 }
   0xe   :  { %45 = vst [vmem:[#allocation2 + $0x40] sm:$0xf0] %v28_v9  ;;  %25 = vst [vmem:[#allocation2 + $0x8] sm:$0xf] %v22_v7  ;;  %135 = vperm.xlu1 %1957, %v120_v13   ;;  %130 = vperm.xlu0 %1956, %v119_v14   ;;  %p2025_p0 = scmp.ne.s32.totalorder %s1815_s20, %s2024_s21  ;;  %p2030_p2 = scmp.lt.s32.totalorder %s2024_s21, %s2024_s21 }
   0xf   :  { %31 = vst [vmem:[#allocation2] sm:$0xf0] %v27_v8  ;;  %33 = vst [vmem:[#allocation2 + $0x10] sm:$0xf0] %v28_v9 }
  0x10   :  { %35 = vst [vmem:[#allocation2 + $0x20] sm:$0xf] %v22_v7  ;;  %37 = vst [vmem:[#allocation2 + $0x18] sm:$0xf0] %v27_v8  ;;  %p2031_p3 = por %p2030_p2, %p2029_p1 }
  0x11   :  { %39 = vst [vmem:[#allocation2 + $0x28] sm:$0xf0] %v28_v9  ;;  %47 = vst [vmem:[#allocation2 + $0x50] sm:$0xf] %v22_v7 }
  0x12   :  { %49 = vst [vmem:[#allocation2 + $0x48] sm:$0xf0] %v27_v8  ;;  %51 = vst [vmem:[#allocation2 + $0x58] sm:$0xf0] %v28_v9  ;;  %145 = vperm.xlu1 %1957, %v122_v15   ;;  %140 = vperm.xlu0 %1956, %v121_v16   ;;  %v4076_v9 = vmov 920167782   ;;  %p2032_p4 = pnand %p2031_p3, %p2025_p0 }
  0x13   :  { %53 = vst [vmem:[#allocation2 + $0x68] sm:$0xf] %v22_v7 }
  0x14   :  { %v64_v30 = vld [vmem:[#allocation2 + $0x30] sm:$0xff]  ;;  %v65_v31 = vld [vmem:[#allocation2 + $0x38] sm:$0xff] }
  0x15   :  { %v59_v24 = vld [vmem:[#allocation2 + $0x8] sm:$0xff]  ;;  %v66_v34 = vld [vmem:[#allocation2 + $0x40] sm:$0xff] }
  0x16   :  { %1735 = vperm.xlu1 %1957, %v1724_v17   ;;  %1730 = vperm.xlu0 %1956, %v1723_v18   ;;  %v60_v25 = vld [vmem:[#allocation2 + $0x10] sm:$0xff]  ;;  %v58_v27 = vld [vmem:[#allocation2] sm:$0xff] }
  0x1a   :  { %1745 = vperm.xlu1 %1957, %v1726_v19   ;;  %1740 = vperm.xlu0 %1956, %v1725_v20   ;;  %v61_v19 = vld [vmem:[#allocation2 + $0x18] sm:$0xff] }
  0x1e   :  { %1750 = vperm.xlu0 %1956, %v1727_v21  }
  0x81   :  { %v91_v22 = vpop.permute.xlu1 %90  ;;  %v81_v23 = vpop.permute.xlu0 %80 }
  0x82   :  { %v104_v28 = vmul.f32 %v81_v23, %v59_v24  ;;  %v105_v29 = vmul.f32 %v81_v23, %v60_v25  ;;  %v103_v32 = vmul.f32 %v81_v23, %v58_v27  ;;  %v109_v38 = vmul.f32 %v91_v22, %v64_v30 }
  0x83   :  { %v110_v39 = vmul.f32 %v91_v22, %v65_v31  ;;  %v111_v41 = vmul.f32 %v91_v22, %v66_v34 }
  0x85   :  { %v2135_v26 = vpop.permute.xlu1 %95  ;;  %v2154_v60 = vpop.permute.xlu0 %85 }
  0x89   :  { %v126_v33 = vpop.permute.xlu1 %125  ;;  %v101_v13 = vpop.permute.xlu0 %100 }
  0x8a   :  { %v2137_v35 = vadd.f32 %v126_v33, %v104_v28  ;;  %v2139_v36 = vadd.f32 %v126_v33, %v105_v29  ;;  %v2141_v37 = vadd.f32 %v126_v33, %v103_v32  ;;  %v106_v28 = vmul.f32 %v2154_v60, %v61_v19 }
  0x8c   :  { %4169 = vst [vmem:[#allocation6_spill] sm:$0xff] %v2137_v35  ;;  %4170 = vst [vmem:[#allocation7_spill] sm:$0xff] %v2139_v36  ;;  %v270_v40 = vand.u32 2139095040, %v2137_v35  ;;  %v374_v42 = vand.u32 2139095040, %v2139_v36  ;;  %v166_v47 = vand.u32 2139095040, %v2141_v37 }
  0x8d   :  { %v136_v43 = vpop.permute.xlu1 %135  ;;  %v2203_v27 = vpop.permute.xlu0 %130  ;;  %v4239_v35 = vmov 683565275  }
  0x8e   :  { %v271_v44 = vshrl.u32 %v270_v40, 23  ;;  %v2145_v45 = vadd.f32 %v136_v43, %v109_v38  ;;  %v2147_v46 = vadd.f32 %v136_v43, %v110_v39  ;;  %v375_v48 = vshrl.u32 %v374_v42, 23 }
  0x8f   :  { %v2150_v49 = vadd.f32 %v136_v43, %v111_v41  ;;  %v167_v56 = vshrl.u32 %v166_v47, 23  ;;  %v2221_v34 = vadd.f32 %v2203_v27, %v106_v28  ;;  %v70_v43 = vld [vmem:[#allocation2 + $0x60] sm:$0xff] }
  0x90   :  { %4171 = vst [vmem:[#allocation8_spill] sm:$0xff] %v2145_v45  ;;  %4172 = vst [vmem:[#allocation9_spill] sm:$0xff] %v2147_v46  ;;  %v1829_v50 = vadd.s32 4294967169, %v271_v44  ;;  %v790_v51 = vand.u32 2139095040, %v2145_v45  ;;  %v1833_v52 = vadd.s32 4294967169, %v375_v48  ;;  %v894_v53 = vand.u32 2139095040, %v2147_v46 }
  0x91   :  { %4173 = vst [vmem:[#allocation10_spill] sm:$0xff] %v2150_v49  ;;  %v998_v63 = vand.u32 2139095040, %v2150_v49  ;;  %v1825_v1 = vadd.s32 4294967169, %v167_v56  ;;  %v71_v44 = vld [vmem:[#allocation2 + $0x68] sm:$0xff]  ;;  %v146_v56 = vpop.permute.xlu1 %145 }
  0x92   :  { %v277_v54 = vadd.s32 1, %v1829_v50  ;;  %v791_v55 = vshrl.u32 %v790_v51, 23  ;;  %v381_v57 = vadd.s32 1, %v1833_v52  ;;  %v895_v58 = vshrl.u32 %v894_v53, 23  ;;  %v67_v50 = vld [vmem:[#allocation2 + $0x48] sm:$0xff]  ;;  %v62_v51 = vld [vmem:[#allocation2 + $0x20] sm:$0xff] }
  0x93   :  { %v999_v6 = vshrl.u32 %v998_v63, 23  ;;  %v173_v8 = vadd.s32 1, %v1825_v1  ;;  %v478_v52 = vand.u32 2139095040, %v2221_v34  ;;  %v107_v63 = vmul.f32 %v2154_v60, %v62_v51 }
  0x94   :  { %vm278_vm0 = vcmp.gt.s32.totalorder %v277_v54, 0  ;;  %v1849_v59 = vadd.s32 4294967169, %v791_v55  ;;  %vm382_vm1 = vcmp.gt.s32.totalorder %v381_v57, 0  ;;  %v1853_v62 = vadd.s32 4294967169, %v895_v58 }
  0x95   :  { %v2156_v61 = vsel %vm278_vm0, %v277_v54, 0  ;;  %v2162_v2 = vsel %vm382_vm1, %v381_v57, 0  ;;  %v1857_v16 = vadd.s32 4294967169, %v999_v6  ;;  %vm174_vm4 = vcmp.gt.s32.totalorder %v173_v8, 0  ;;  %v72_v54 = vld [vmem:[#allocation2 + $0x70] sm:$0xff]  ;;  %v63_v57 = vld [vmem:[#allocation2 + $0x28] sm:$0xff] }
  0x96   :  { %v2160_v0 = vand.u32 31, %v2156_v61  ;;  %v797_v3 = vadd.s32 1, %v1849_v59  ;;  %v901_v4 = vadd.s32 1, %v1853_v62  ;;  %v2168_v7 = vand.u32 31, %v2162_v2 }
  0x97   :  { %v1005_v25 = vadd.s32 1, %v1857_v16  ;;  %v175_v29 = vsel %vm174_vm4, %v173_v8, 0  ;;  %v115_v58 = vmul.f32 %v101_v13, %v70_v43  ;;  %v116_v59 = vmul.f32 %v101_v13, %v71_v44 }
  0x98   :  { %4174 = vst [vmem:[#allocation11_spill] sm:$0xff] %v2160_v0  ;;  %v2165_v5 = vsub.s32 32, %v2160_v0  ;;  %4176 = vst [vmem:[#allocation13_spill] sm:$0xff] %v2168_v7  ;;  %v2172_v10 = vshll.u32 %v4076_v9, %v2160_v0  ;;  %v2179_v14 = vsub.s32 32, %v2168_v7  ;;  %vm798_vm2 = vcmp.gt.s32.totalorder %v797_v3, 0 }
  0x99   :  { %vm902_vm3 = vcmp.gt.s32.totalorder %v901_v4, 0  ;;  %v2185_v17 = vshll.u32 %v4076_v9, %v2168_v7  ;;  %v2191_v20 = vsel %vm798_vm2, %v797_v3, 0  ;;  %v2223_v38 = vand.u32 31, %v175_v29 }
  0x9a   :  { %4175 = vst [vmem:[#allocation12_spill] sm:$0xff] %v2165_v5  ;;  %v2176_v12 = vshrl.u32 %v4068_v11, %v2165_v5  ;;  %4177 = vst [vmem:[#allocation14_spill] sm:$0xff] %v2179_v14  ;;  %v2189_v18 = vshrl.u32 %v4068_v11, %v2179_v14  ;;  %v2193_v21 = vsel %vm902_vm3, %v901_v4, 0  ;;  %v2198_v23 = vand.u32 31, %v2191_v20 }
  0x9b   :  { %v2201_v24 = vand.u32 31, %v2193_v21  ;;  %vm1006_vm5 = vcmp.gt.s32.totalorder %v1005_v25, 0  ;;  %v2244_v53 = vsub.s32 32, %v2223_v38  ;;  %v2250_v62 = vmul.f32 %v2135_v26, %v67_v50 }
  0x9c   :  { %4178 = vst [vmem:[#allocation15_spill] sm:$0xff] %v2198_v23  ;;  %v2207_v30 = vsub.s32 32, %v2198_v23  ;;  %v2214_v32 = vshll.u32 %v4076_v9, %v2198_v23  ;;  %v2235_v42 = vsel %vm1006_vm5, %v1005_v25, 0  ;;  %v117_v4 = vmul.f32 %v101_v13, %v72_v54 }
  0x9d   :  { %4179 = vst [vmem:[#allocation16_spill] sm:$0xff] %v2201_v24  ;;  %v2210_v31 = vsub.s32 32, %v2201_v24  ;;  %v2227_v39 = vshll.u32 %v4076_v9, %v2201_v24  ;;  %v2240_v48 = vand.u32 31, %v2235_v42  ;;  %v479_v6 = vshrl.u32 %v478_v52, 23  ;;  %v69_v52 = vld [vmem:[#allocation2 + $0x58] sm:$0xff] }
  0x9e   :  { %4180 = vst [vmem:[#allocation17_spill] sm:$0xff] %v2207_v30  ;;  %v2218_v33 = vshrl.u32 %v4068_v11, %v2207_v30  ;;  %v2261_v8 = vadd.f32 %v146_v56, %v115_v58  ;;  %v2263_v16 = vadd.f32 %v146_v56, %v116_v59  ;;  %v108_v19 = vmul.f32 %v2154_v60, %v63_v57  ;;  %v68_v60 = vld [vmem:[#allocation2 + $0x50] sm:$0xff] }
  0x9f   :  { %4181 = vst [vmem:[#allocation18_spill] sm:$0xff] %v2210_v31  ;;  %v2231_v40 = vshrl.u32 %v4068_v11, %v2210_v31  ;;  %4182 = vst [vmem:[#allocation19_spill] sm:$0xff] %v2240_v48  ;;  %v2247_v55 = vsub.s32 32, %v2240_v48  ;;  %v2255_v1 = vshll.u32 %v4076_v9, %v2240_v48  ;;  %v190_v25 = vshrl.u32 %v4076_v9, %v2244_v53 }
  0xa0   :  { %4186 = vst [vmem:[#allocation23_spill] sm:$0xff] %v2261_v8  ;;  %4187 = vst [vmem:[#allocation24_spill] sm:$0xff] %v2263_v16  ;;  %v193_v28 = vshrl.u32 %v4068_v11, %v2244_v53  ;;  %v2272_v44 = vshrl.u32 %v175_v29, 5  ;;  %v294_v13 = vshrl.u32 %v4076_v9, %v2165_v5  ;;  %v2277_v50 = vadd.f32 %v2203_v27, %v107_v63 }
  0xa1   :  { %4183 = vst [vmem:[#allocation20_spill] sm:$0xff] %v2247_v55  ;;  %4184 = vst [vmem:[#allocation21_spill] sm:$0xff] %v2255_v1  ;;  %v2259_v3 = vshrl.u32 %v4068_v11, %v2247_v55  ;;  %v2279_v51 = vadd.f32 %v146_v56, %v117_v4  ;;  %v4082_v54 = vmov 2102212464   ;;  %v192_v58 = vshll.u32 %v4076_v9, %v2223_v38 }
  0xa2   :  { %v189_v57 = vshll.u32 %v4082_v54, %v2223_v38  ;;  %v2286_v29 = vshrl.u32 %v2156_v61, 5  ;;  %v1414_v59 = vand.u32 2139095040, %v2261_v8  ;;  %v293_v63 = vshll.u32 %v4082_v54, %v2160_v0 }
  0xa3   :  { %4185 = vst [vmem:[#allocation22_spill] sm:$0xff] %v2259_v3  ;;  %4188 = vst [vmem:[#allocation25_spill] sm:$0xff] %v2279_v51  ;;  %v2292_v56 = vshrl.u32 %v2162_v2, 5  ;;  %v398_v4 = vshrl.u32 %v4076_v9, %v2179_v14  ;;  %v1837_v43 = vadd.s32 4294967169, %v479_v6  ;;  %v194_v41 = vor.u32 %v193_v28, %v192_v58 }
  0xa4   :  { %4189 = vst [vmem:[#allocation26_spill] sm:$0xff] %v2286_v29  ;;  %v2296_v47 = vor.u32 %v190_v25, %v189_v57  ;;  %v1415_v11 = vshrl.u32 %v1414_v59, 23  ;;  %v1518_v22 = vand.u32 2139095040, %v2263_v16  ;;  %v113_v61 = vmul.f32 %v2135_v26, %v68_v60 }
  0xa5   :  { %4190 = vst [vmem:[#allocation27_spill] sm:$0xff] %v2292_v56  ;;  %v2301_v15 = vmul.f32 %v2135_v26, %v69_v52  ;;  %v2303_v8 = vor.u32 %v294_v13, %v293_v63  ;;  %v397_v2 = vshll.u32 %v4082_v54, %v2168_v7  ;;  %v2308_v49 = vadd.f32 %v2203_v27, %v108_v19 }
  0xa6   :  { %4191 = vst [vmem:[#allocation28_spill] sm:$0xff] %v2296_v47  ;;  %v582_v6 = vand.u32 2139095040, %v2277_v50  ;;  %v1873_v25 = vadd.s32 4294967169, %v1415_v11  ;;  %vm198_vm6 = vcmp.lt.s32.totalorder %v2272_v44, 4  ;;  %v485_v60 = vadd.s32 1, %v1837_v43 }
  0xa7   :  { %4192 = vst [vmem:[#allocation29_spill] sm:$0xff] %v2303_v8  ;;  %v2313_v57 = vor.u32 %v398_v4, %v397_v2  ;;  %v1519_v26 = vshrl.u32 %v1518_v22, 23  ;;  %v2318_v13 = vsel %vm198_vm6, %v2296_v47, 920167782  ;;  %v2322_v27 = vsel %vm198_vm6, %v194_v41, 1326507024 }
  0xa8   :  { %vm302_vm7 = vcmp.lt.s32.totalorder %v2286_v29, 4  ;;  %vm406_vm8 = vcmp.lt.s32.totalorder %v2292_v56, 4  ;;  %v4195_v22 = vor.u32 %v2176_v12, %v2172_v10  ;;  %v814_v41 = vshrl.u32 %v4076_v9, %v2207_v30 }
  0xa9   :  { %4193 = vst [vmem:[#allocation30_spill] sm:$0xff] %v2313_v57  ;;  %v2329_v11 = vsel %vm302_vm7, %v2303_v8, 920167782  ;;  %v1622_v43 = vand.u32 2139095040, %v2279_v51  ;;  %v2342_v52 = vshrl.u32 %v2191_v20, 5  ;;  %v583_v58 = vshrl.u32 %v582_v6, 23 }
  0xaa   :  { %4194 = vst [vmem:[#allocation31_spill] sm:$0xff] %v2329_v11  ;;  %v2336_v19 = vsel %vm302_vm7, %v4195_v22, 1326507024  ;;  %v1421_v59 = vadd.s32 1, %v1873_v25  ;;  %v1877_v63 = vadd.s32 4294967169, %v1519_v26  ;;  %v813_v10 = vshll.u32 %v4082_v54, %v2198_v23 }
  0xab   :  { %4196 = vst [vmem:[#allocation32_spill] sm:$0xff] %v2336_v19  ;;  %4197 = vst [vmem:[#allocation33_spill] sm:$0xff] %v2342_v52  ;;  %v2347_v4 = vsel %vm406_vm8, %v2313_v57, 920167782  ;;  %v2352_v12 = vshrl.u32 %v2193_v21, 5  ;;  %vm486_vm9 = vcmp.gt.s32.totalorder %v485_v60, 0  ;;  %v918_v2 = vshrl.u32 %v4076_v9, %v2210_v31 }
  0xac   :  { %4198 = vst [vmem:[#allocation34_spill] sm:$0xff] %v2347_v4  ;;  %v686_v20 = vand.u32 2139095040, %v2308_v49  ;;  %vm1422_vm10 = vcmp.gt.s32.totalorder %v1421_v59, 0  ;;  %v1525_v6 = vadd.s32 1, %v1877_v63  ;;  %v4200_v25 = vor.u32 %v2189_v18, %v2185_v17 }
  0xad   :  { %4199 = vst [vmem:[#allocation35_spill] sm:$0xff] %v2352_v12  ;;  %v2364_v22 = vor.u32 %v814_v41, %v813_v10  ;;  %v2366_v28 = vsel %vm1422_vm10, %v1421_v59, 0  ;;  %v1623_v21 = vshrl.u32 %v1622_v43, 23  ;;  %v917_v51 = vshll.u32 %v4082_v54, %v2201_v24 }
  0xae   :  { %v2362_v26 = vsel %vm406_vm8, %v4200_v25, 1326507024  ;;  %4203 = vst [vmem:[#allocation38_spill] sm:$0xff] %v2366_v28  ;;  %v487_v9 = vsel %vm486_vm9, %v485_v60, 0  ;;  %v1841_v16 = vadd.s32 4294967169, %v583_v58  ;;  %v2371_v31 = vand.u32 31, %v2366_v28  ;;  %v141_v60 = vpop.permute.xlu0 %140 }
  0xaf   :  { %4201 = vst [vmem:[#allocation36_spill] sm:$0xff] %v2362_v26  ;;  %4202 = vst [vmem:[#allocation37_spill] sm:$0xff] %v2364_v22  ;;  %vm822_vm11 = vcmp.lt.s32.totalorder %v2342_v52, 4  ;;  %vm926_vm12 = vcmp.lt.s32.totalorder %v2352_v12, 4  ;;  %vm1526_vm13 = vcmp.gt.s32.totalorder %v1525_v6, 0  ;;  %v1881_v17 = vadd.s32 4294967169, %v1623_v21 }
  0xb0   :  { %4204 = vst [vmem:[#allocation39_spill] sm:$0xff] %v2371_v31  ;;  %v2375_v18 = vor.u32 %v918_v2, %v917_v51  ;;  %v2378_v41 = vshrl.u32 %v2235_v42, 5  ;;  %v687_v43 = vshrl.u32 %v686_v20, 23  ;;  %v2381_v59 = vsub.s32 32, %v2371_v31 }
  0xb1   :  { %v2386_v58 = vsel %vm822_vm11, %v2364_v22, 920167782  ;;  %v2388_v63 = vand.u32 31, %v487_v9  ;;  %v2390_v10 = vsel %vm1526_vm13, %v1525_v6, 0  ;;  %v1629_v25 = vadd.s32 1, %v1881_v17 }
  0xb2   :  { %4205 = vst [vmem:[#allocation40_spill] sm:$0xff] %v2375_v18  ;;  %4206 = vst [vmem:[#allocation41_spill] sm:$0xff] %v2378_v41  ;;  %v589_v51 = vadd.s32 1, %v1841_v16  ;;  %v4210_v2 = vmov 920167782   ;;  %v2401_v54 = vand.u32 31, %v2390_v10  ;;  %v4215_v24 = vor.u32 %v2218_v33, %v2214_v32 }
  0xb3   :  { %4207 = vst [vmem:[#allocation42_spill] sm:$0xff] %v2381_v59  ;;  %4208 = vst [vmem:[#allocation43_spill] sm:$0xff] %v2386_v58  ;;  %v2394_v42 = vshll.u32 %v4210_v2, %v2371_v31  ;;  %v4212_v20 = vmov 1326507024   ;;  %vm1630_vm14 = vcmp.gt.s32.totalorder %v1629_v25, 0  ;;  %v2411_v16 = vadd.f32 %v141_v60, %v2250_v62 }
  0xb4   :  { %4209 = vst [vmem:[#allocation44_spill] sm:$0xff] %v2390_v10  ;;  %v2398_v21 = vshrl.u32 %v4212_v20, %v2381_v59  ;;  %4214 = vst [vmem:[#allocation47_spill] sm:$0xff] %v2401_v54  ;;  %v2408_v6 = vsel %vm822_vm11, %v4215_v24, 1326507024  ;;  %v2413_v17 = vadd.f32 %v141_v60, %v113_v61  ;;  %v1845_v46 = vadd.s32 4294967169, %v687_v43 }
  0xb5   :  { %4211 = vst [vmem:[#allocation45_spill] sm:$0xff] %v2394_v42  ;;  %4216 = vst [vmem:[#allocation48_spill] sm:$0xff] %v2408_v6  ;;  %v2418_v22 = vsub.s32 32, %v2401_v54  ;;  %v2421_v23 = vadd.f32 %v141_v60, %v2301_v15  ;;  %v2426_v24 = vsel %vm926_vm12, %v2375_v18, 920167782  ;;  %v4222_v32 = vor.u32 %v2231_v40, %v2227_v39 }
  0xb6   :  { %4213 = vst [vmem:[#allocation46_spill] sm:$0xff] %v2398_v21  ;;  %4217 = vst [vmem:[#allocation49_spill] sm:$0xff] %v2411_v16  ;;  %v2435_v62 = vsel %vm1630_vm14, %v1629_v25, 0  ;;  %v1102_v61 = vand.u32 2139095040, %v2411_v16  ;;  %v2439_v43 = vsub.s32 32, %v2388_v63  ;;  %vm590_vm15 = vcmp.gt.s32.totalorder %v589_v51, 0 }
  0xb7   :  { %4218 = vst [vmem:[#allocation50_spill] sm:$0xff] %v2413_v17  ;;  %4219 = vst [vmem:[#allocation51_spill] sm:$0xff] %v2418_v22  ;;  %v2433_v33 = vsel %vm926_vm12, %v4222_v32, 1326507024  ;;  %v2443_v15 = vshll.u32 %v4210_v2, %v2401_v54  ;;  %v2447_v60 = vshrl.u32 %v4212_v20, %v2418_v22  ;;  %v4227_v39 = vmov 2102212464  }
  0xb8   :  { %4220 = vst [vmem:[#allocation52_spill] sm:$0xff] %v2421_v23  ;;  %4221 = vst [vmem:[#allocation53_spill] sm:$0xff] %v2426_v24  ;;  %v1021_v40 = vshll.u32 %v4227_v39, %v2240_v48  ;;  %v2452_v25 = vand.u32 31, %v2435_v62  ;;  %v1103_v32 = vshrl.u32 %v1102_v61, 23  ;;  %v1206_v58 = vand.u32 2139095040, %v2413_v17 }
  0xb9   :  { %4223 = vst [vmem:[#allocation54_spill] sm:$0xff] %v2433_v33  ;;  %4224 = vst [vmem:[#allocation55_spill] sm:$0xff] %v2435_v62  ;;  %v1022_v42 = vshrl.u32 %v4210_v2, %v2247_v55  ;;  %v693_v21 = vadd.s32 1, %v1845_v46  ;;  %v1310_v18 = vand.u32 2139095040, %v2421_v23  ;;  %v2460_v22 = vshrl.u32 %v487_v9, 5 }
  0xba   :  { %4225 = vst [vmem:[#allocation56_spill] sm:$0xff] %v2443_v15  ;;  %4226 = vst [vmem:[#allocation57_spill] sm:$0xff] %v2447_v60  ;;  %v501_v48 = vshll.u32 %v4227_v39, %v2388_v63  ;;  %v591_v33 = vsel %vm590_vm15, %v589_v51, 0  ;;  %v2465_v62 = vsub.s32 32, %v2452_v25  ;;  %v502_v61 = vshrl.u32 %v4210_v2, %v2439_v43 }
  0xbb   :  { %4228 = vst [vmem:[#allocation58_spill] sm:$0xff] %v2452_v25  ;;  %v505_v46 = vshrl.u32 %v4212_v20, %v2439_v43  ;;  %v1861_v55 = vadd.s32 4294967169, %v1103_v32  ;;  %v1207_v12 = vshrl.u32 %v1206_v58, 23  ;;  %v504_v24 = vshll.u32 %v4210_v2, %v2388_v63 }
  0xbc   :  { %4229 = vst [vmem:[#allocation59_spill] sm:$0xff] %v2465_v62  ;;  %v2475_v9 = vshll.u32 %v4210_v2, %v2452_v25  ;;  %v2479_v51 = vshrl.u32 %v4212_v20, %v2465_v62  ;;  %v1311_v15 = vshrl.u32 %v1310_v18, 23  ;;  %v2481_v60 = vand.u32 31, %v591_v33 }
  0xbd   :  { %vm694_vm0 = vcmp.gt.s32.totalorder %v693_v21, 0  ;;  %v1109_v54 = vadd.s32 1, %v1861_v55  ;;  %v1865_v6 = vadd.s32 4294967169, %v1207_v12  ;;  %v2483_v52 = vor.u32 %v1022_v42, %v1021_v40 }
  0xbe   :  { %4230 = vst [vmem:[#allocation60_spill] sm:$0xff] %v2475_v9  ;;  %4231 = vst [vmem:[#allocation61_spill] sm:$0xff] %v2479_v51  ;;  %vm510_vm1 = vcmp.lt.s32.totalorder %v2460_v22, 4  ;;  %v1869_v32 = vadd.s32 4294967169, %v1311_v15  ;;  %v2488_v25 = vor.u32 %v502_v61, %v501_v48  ;;  %v506_v30 = vor.u32 %v505_v46, %v504_v24 }
  0xbf   :  { %4232 = vst [vmem:[#allocation62_spill] sm:$0xff] %v2483_v52  ;;  %vm1110_vm2 = vcmp.gt.s32.totalorder %v1109_v54, 0  ;;  %v1213_v62 = vadd.s32 1, %v1865_v6  ;;  %v2490_v45 = vshrl.u32 %v591_v33, 5  ;;  %v695_v18 = vsel %vm694_vm0, %v693_v21, 0 }
  0xc0   :  { %v2492_v10 = vsel %vm1110_vm2, %v1109_v54, 0  ;;  %v1317_v55 = vadd.s32 1, %v1869_v32  ;;  %v2495_v12 = vsub.s32 32, %v2481_v60  ;;  %v605_v42 = vshll.u32 %v4227_v39, %v2481_v60 }
  0xc1   :  { %v2500_v40 = vand.u32 31, %v2492_v10  ;;  %vm1214_vm3 = vcmp.gt.s32.totalorder %v1213_v62, 0  ;;  %v608_v48 = vshll.u32 %v4210_v2, %v2481_v60  ;;  %v516_v21 = vsel %vm510_vm1, %v2488_v25, 920167782 }
  0xc2   :  { %v2504_v6 = vsel %vm1214_vm3, %v1213_v62, 0  ;;  %vm1318_vm4 = vcmp.gt.s32.totalorder %v1317_v55, 0  ;;  %v520_v24 = vsel %vm510_vm1, %v506_v30, 1326507024  ;;  %v2512_v33 = vshrl.u32 %v695_v18, 5 }
  0xc3   :  { %v2515_v15 = vsub.s32 32, %v2500_v40  ;;  %v2517_v61 = vand.u32 31, %v695_v18  ;;  %v2520_v62 = vand.u32 31, %v2504_v6  ;;  %v2522_v46 = vsel %vm1318_vm4, %v1317_v55, 0 }
  0xc4   :  { %v4120_v32 = vmov 2475754826   ;;  %v2528_v54 = vshll.u32 %v4210_v2, %v2500_v40  ;;  %v2535_v18 = vand.u32 31, %v2522_v46  ;;  %v4129_v9 = vmov 2131351028  }
  0xc5   :  { %v493_v58 = vshrl.u32 %v4120_v32, %v2439_v43  ;;  %v2532_v30 = vshrl.u32 %v4212_v20, %v2515_v15  ;;  %v496_v55 = vshrl.u32 %v4129_v9, %v2439_v43  ;;  %v606_v51 = vshrl.u32 %v4210_v2, %v2495_v12 }
  0xc6   :  { %4233 = vst [vmem:[#allocation63_spill] sm:$0xff] %v2535_v18  ;;  %v609_v32 = vshrl.u32 %v4212_v20, %v2495_v12  ;;  %v2544_v59 = vsub.s32 32, %v2520_v62  ;;  %v4234_v31 = vand.u32 2147483647, %v2221_v34  ;;  %vm614_vm5 = vcmp.lt.s32.totalorder %v2490_v45, 4 }
  0xc7   :  { %v2552_v3 = vsub.s32 32, %v2535_v18  ;;  %v4138_v9 = vmov 683565275   ;;  %v4236_v17 = vmov 2475754826   ;;  %v2559_v57 = vsub.s32 32, %v2517_v61 }
  0xc8   :  { %v482_v28 = vand.u32 8388607, %v4234_v31  ;;  %v492_v23 = vshll.u32 %v4138_v9, %v2388_v63  ;;  %v495_v16 = vshll.u32 %v4236_v17, %v2388_v63  ;;  %v709_v31 = vshll.u32 %v4227_v39, %v2517_v61 }
  0xc9   :  { %4235 = vst [vmem:[#allocation64_spill] sm:$0xff] %v2552_v3  ;;  %v2565_v26 = vshll.u32 %v4210_v2, %v2520_v62  ;;  %v2569_v1 = vshrl.u32 %v4212_v20, %v2544_v59  ;;  %v2573_v9 = vshll.u32 %v4210_v2, %v2535_v18  ;;  %v2577_v4 = vshrl.u32 %v4212_v20, %v2552_v3 }
  0xca   :  { %v494_v56 = vor.u32 %v493_v58, %v492_v23  ;;  %v497_v7 = vor.u32 %v496_v55, %v495_v16  ;;  %v607_v14 = vor.u32 %v606_v51, %v605_v42  ;;  %v4238_v11 = vmov 2131351028  }
  0xcb   :  { %4237 = vst [vmem:[#allocation65_spill] sm:$0xff] %v2573_v9  ;;  %v498_v8 = vshll.u32 %v4238_v11, %v2388_v63  ;;  %v499_v19 = vshrl.u32 %v4227_v39, %v2439_v43  ;;  %v610_v29 = vor.u32 %v609_v32, %v608_v48  ;;  %v483_v5 = vor.u32 8388608, %v482_v28 }
  0xcc   :  { %v491_v47 = vshrl.u32 %v4239_v35, %v2439_v43  ;;  %v710_v23 = vshrl.u32 %v4210_v2, %v2559_v57  ;;  %v2593_v16 = vshrl.u32 %v4212_v20, %v2559_v57  ;;  %vm507_vm9 = vcmp.lt.s32.totalorder %v2460_v22, 1 }
  0xcd   :  { %v500_v51 = vor.u32 %v499_v19, %v498_v8  ;;  %vm508_vm10 = vcmp.lt.s32.totalorder %v2460_v22, 2  ;;  %vm509_vm13 = vcmp.lt.s32.totalorder %v2460_v22, 3  ;;  %v515_v58 = vsel %vm507_vm9, %v494_v56, %v497_v7 }
  0xce   :  { %v511_v63 = vsel %vm507_vm9, %v491_v47, %v494_v56  ;;  %v521_v48 = vsel %vm509_vm13, %v2488_v25, %v520_v24  ;;  %v523_v19 = vshll.u32 %v483_v5, 8  ;;  %v620_v55 = vsel %vm614_vm5, %v607_v14, 920167782 }
  0xcf   :  { %v512_v28 = vsel %vm510_vm1, %v500_v51, 2102212464  ;;  %v517_v43 = vsel %vm509_vm13, %v500_v51, %v516_v21  ;;  %v519_v42 = vsel %vm507_vm9, %v497_v7, %v500_v51  ;;  %v624_v47 = vsel %vm614_vm5, %v610_v29, 1326507024 }
  0xd0   :  { %v513_v32 = vsel %vm509_vm13, %v497_v7, %v512_v28  ;;  %v518_v20 = vsel %vm508_vm10, %v515_v58, %v517_v43  ;;  %v522_v8 = vsel %vm508_vm10, %v519_v42, %v521_v48  ;;  %v712_v56 = vshll.u32 %v4210_v2, %v2517_v61 }
  0xd1   :  { %v4158_v21 = vand.u32 2147483647, %v2277_v50  ;;  %v2612_v25 = vmul.u32.u64.low %v523_v19, %v522_v8  ;;  %v2613_v7 = vmul.u32.u64.high %v523_v19, %v522_v8, %v2612_v25  ;;  %v2619_v58 = vor.u32 %v710_v23, %v709_v31 }
  0xd2   :  { %v2615_v24 = vmul.u32.u64.low %v523_v19, %v518_v20  ;;  %v2616_v51 = vmul.u32.u64.high %v523_v19, %v518_v20, %v2615_v24  ;;  %v714_v5 = vor.u32 %v2593_v16, %v712_v56  ;;  %v514_v28 = vsel %vm508_vm10, %v511_v63, %v513_v32 }
  0xd3   :  { %v586_v29 = vand.u32 8388607, %v4158_v21  ;;  %v595_v43 = vshrl.u32 %v4239_v35, %v2495_v12  ;;  %v596_v42 = vshll.u32 %v4239_v35, %v2481_v60  ;;  %v597_v48 = vshrl.u32 %v4236_v17, %v2495_v12 }
  0xd4   :  { %v600_v31 = vshrl.u32 %v4238_v11, %v2495_v12  ;;  %v599_v22 = vshll.u32 %v4236_v17, %v2481_v60  ;;  %v602_v16 = vshll.u32 %v4238_v11, %v2481_v60  ;;  %v603_v63 = vshrl.u32 %v4227_v39, %v2495_v12 }
  0xd5   :  { %v587_v23 = vor.u32 8388608, %v586_v29  ;;  %v530_v32 = vmul.u32 %v523_v19, %v514_v28  ;;  %vm532_vm14 = vc.u32 %v2613_v7, %v2615_v24  ;;  %v533_v20 = vadd.s32 1, %v2616_v51 }
  0xd6   :  { %v598_v8 = vor.u32 %v597_v48, %v596_v42  ;;  %v601_v56 = vor.u32 %v600_v31, %v599_v22  ;;  %v604_v25 = vor.u32 %v603_v63, %v602_v16  ;;  %vm611_vm15 = vcmp.lt.s32.totalorder %v2490_v45, 1 }
  0xd7   :  { %vm613_vm0 = vcmp.lt.s32.totalorder %v2490_v45, 3  ;;  %v534_v29 = vsel %vm532_vm14, %v533_v20, %v2616_v51  ;;  %vm612_vm1 = vcmp.lt.s32.totalorder %v2490_v45, 2  ;;  %v627_v0 = vshll.u32 %v587_v23, 8 }
  0xd8   :  { %v625_v60 = vsel %vm613_vm0, %v607_v14, %v624_v47  ;;  %v535_v12 = vadd.s32 %v534_v29, %v530_v32  ;;  %v616_v19 = vsel %vm614_vm5, %v604_v25, 2102212464  ;;  %v619_v28 = vsel %vm611_vm15, %v598_v8, %v601_v56 }
  0xd9   :  { %v621_v36 = vsel %vm613_vm0, %v604_v25, %v620_v55  ;;  %v615_v21 = vsel %vm611_vm15, %v595_v43, %v598_v8  ;;  %v617_v42 = vsel %vm613_vm0, %v601_v56, %v616_v19  ;;  %v623_v31 = vsel %vm611_vm15, %v601_v56, %v604_v25 }
  0xda   :  { %v622_v48 = vsel %vm612_vm1, %v619_v28, %v621_v36  ;;  %vm1030_vm2 = vcmp.lt.s32.totalorder %v2378_v41, 4  ;;  %v536_v22 = vadd.s32 536870912, %v535_v12  ;;  %v626_v51 = vsel %vm612_vm1, %v623_v31, %v625_v60 }
  0xdb   :  { %v4159_v14 = vand.u32 2147483647, %v2308_v49  ;;  %v2655_v47 = vmul.u32.u64.low %v627_v0, %v626_v51  ;;  %v2656_v23 = vmul.u32.u64.high %v627_v0, %v626_v51, %v2655_v47  ;;  %v2665_v36 = vsel %vm1030_vm2, %v2483_v52, 920167782 }
  0xdc   :  { %v2658_v16 = vmul.u32.u64.low %v627_v0, %v622_v48  ;;  %v2659_v63 = vmul.u32.u64.high %v627_v0, %v622_v48, %v2658_v16  ;;  %4240 = vst [vmem:[#allocation66_spill] sm:$0xff] %v2665_v36  ;;  %vm718_vm3 = vcmp.lt.s32.totalorder %v2512_v33, 4  ;;  %v537_v55 = vshrl.u32 %v536_v22, 30 }
  0xdd   :  { %v618_v43 = vsel %vm612_vm1, %v615_v21, %v617_v42  ;;  %vm477_vm4 = vcmp.lt.s32.totalorder %v2221_v34, 0  ;;  %v724_v32 = vsel %vm718_vm3, %v2619_v58, 920167782  ;;  %v728_v20 = vsel %vm718_vm3, %v714_v5, 1326507024 }
  0xde   :  { %v701_v8 = vshrl.u32 %v4236_v17, %v2559_v57  ;;  %v704_v56 = vshrl.u32 %v4238_v11, %v2559_v57  ;;  %v538_v25 = vshll.u32 %v537_v55, 30  ;;  %v690_v45 = vand.u32 8388607, %v4159_v14 }
  0xdf   :  { %v700_v21 = vshll.u32 %v4239_v35, %v2517_v61  ;;  %v703_v29 = vshll.u32 %v4236_v17, %v2517_v61  ;;  %v634_v60 = vmul.u32 %v627_v0, %v618_v43  ;;  %vm636_vm5 = vc.u32 %v2656_v23, %v2658_v16 }
  0xe0   :  { %v637_v5 = vadd.s32 1, %v2659_v63  ;;  %v706_v19 = vshll.u32 %v4238_v11, %v2517_v61  ;;  %v4241_v28 = vand.u32 2147483647, %v2221_v34  ;;  %v2697_v48 = vsub.s32 %v535_v12, %v538_v25 }
  0xe1   :  { %v702_v31 = vor.u32 %v701_v8, %v700_v21  ;;  %v705_v22 = vor.u32 %v704_v56, %v703_v29  ;;  %v707_v0 = vshrl.u32 %v4227_v39, %v2559_v57  ;;  %v2702_v51 = vshrl.u32 %v2492_v10, 5 }
  0xe2   :  { %vm2693_vm9 = vcmp.le.f32.partialorder %v4241_v28, 0.7853982  ;;  %v1125_v47 = vshll.u32 %v4227_v39, %v2500_v40  ;;  %v561_v61 = vsub.s32 4, %v537_v55  ;;  %v638_v43 = vsel %vm636_vm5, %v637_v5, %v2659_v63 }
  0xe3   :  { %v541_v28 = vsub.s32 0, %v2697_v48  ;;  %v639_v14 = vadd.s32 %v638_v43, %v634_v60  ;;  %v691_v52 = vor.u32 8388608, %v690_v45  ;;  %v708_v12 = vor.u32 %v707_v0, %v706_v19 }
  0xe4   :  { %v1126_v8 = vshrl.u32 %v4210_v2, %v2515_v15  ;;  %v2711_v56 = vshrl.u32 %v2504_v6, 5  ;;  %v2714_v10 = vshrl.u32 %v2522_v46, 5  ;;  %vm715_vm10 = vcmp.lt.s32.totalorder %v2512_v33, 1 }
  0xe5   :  { %v1838_v25 = vmin.u32 %v541_v28, %v2697_v48  ;;  %v640_v21 = vadd.s32 536870912, %v639_v14  ;;  %vm717_vm13 = vcmp.lt.s32.totalorder %v2512_v33, 3  ;;  %v723_v63 = vsel %vm715_vm10, %v702_v31, %v705_v22 }
  0xe6   :  { %v2723_v45 = vshll.u32 %v4227_v39, %v2520_v62  ;;  %v725_v6 = vsel %vm717_vm13, %v708_v12, %v724_v32  ;;  %v727_v46 = vsel %vm715_vm10, %v705_v22, %v708_v12  ;;  %v729_v29 = vsel %vm717_vm13, %v2619_v58, %v728_v20 }
  0xe7   :  { %vm1134_vm14 = vcmp.lt.s32.totalorder %v2702_v51, 4  ;;  %v543_v60 = vclz %v1838_v25  ;;  %v562_v5 = vsel %vm477_vm4, %v561_v61, %v537_v55  ;;  %vm716_vm15 = vcmp.lt.s32.totalorder %v2512_v33, 2 }
  0xe8   :  { %v731_v19 = vshll.u32 %v691_v52, 8  ;;  %v641_v0 = vshrl.u32 %v640_v21, 30  ;;  %v720_v32 = vsel %vm718_vm3, %v708_v12, 2102212464  ;;  %v726_v43 = vsel %vm716_vm15, %v723_v63, %v725_v6 }
  0xe9   :  { %v730_v28 = vsel %vm716_vm15, %v727_v46, %v729_v29  ;;  %v1839_v58 = vadd.s32 4294967294, %v543_v60  ;;  %v699_v20 = vshrl.u32 %v4239_v35, %v2559_v57  ;;  %vm581_vm0 = vcmp.lt.s32.totalorder %v2277_v50, 0 }
  0xea   :  { %v2744_v25 = vmul.u32.u64.low %v731_v19, %v730_v28  ;;  %v2745_v36 = vmul.u32.u64.high %v731_v19, %v730_v28, %v2744_v25  ;;  %v564_v52 = vsel %vm2693_vm9, 0, %v562_v5  ;;  %v642_v55 = vshll.u32 %v641_v0, 30 }
  0xeb   :  { %v2750_v61 = vmul.u32.u64.low %v731_v19, %v726_v43  ;;  %v2751_v12 = vmul.u32.u64.high %v731_v19, %v726_v43, %v2750_v61  ;;  %v2754_v21 = vor.u32 %v1126_v8, %v1125_v47  ;;  %vm1840_vm1 = vcmp.lt.s32.totalorder %v1839_v58, 0 }
  0xec   :  { %v719_v63 = vsel %vm715_vm10, %v699_v20, %v702_v31  ;;  %v721_v57 = vsel %vm717_vm13, %v705_v22, %v720_v32  ;;  %v2762_v6 = vshrl.u32 %v4210_v2, %v2544_v59  ;;  %v2766_v46 = vshll.u32 %v4227_v39, %v2535_v18 }
  0xed   :  { %v546_v29 = vsel %vm1840_vm1, 0, %v1839_v58  ;;  %v2768_v60 = vsub.s32 %v639_v14, %v642_v55  ;;  %v531_v47 = vadd.s32 %v2615_v24, %v2613_v7  ;;  %v568_v31 = vadd.s32 3, %v564_v52 }
  0xee   :  { %v547_v8 = vsub.s32 32, %v546_v29  ;;  %v551_v5 = vsub.s32 4294967266, %v546_v29  ;;  %v665_v22 = vsub.s32 4, %v641_v0  ;;  %v722_v32 = vsel %vm716_vm15, %v719_v63, %v721_v57 }
  0xef   :  { %v645_v43 = vsub.s32 0, %v2768_v60  ;;  %vm740_vm3 = vc.u32 %v2745_v36, %v2750_v61  ;;  %v548_v28 = vshll.u32 %v2697_v48, %v546_v29  ;;  %v741_v20 = vadd.s32 1, %v2751_v12 }
  0xf0   :  { %v549_v58 = vshrl.u32 %v531_v47, %v547_v8  ;;  %v552_v14 = vadd.s32 127, %v551_v5  ;;  %v2782_v7 = vsel %vm1134_vm14, %v2754_v21, 920167782  ;;  %v4244_v24 = vor.u32 %v2532_v30, %v2528_v54 }
  0xf1   :  { %v2793_v25 = vshrl.u32 %v4210_v2, %v2552_v3  ;;  %v1842_v48 = vmin.u32 %v645_v43, %v2768_v60  ;;  %v738_v63 = vmul.u32 %v731_v19, %v722_v32  ;;  %v742_v57 = vsel %vm740_vm3, %v741_v20, %v2751_v12 }
  0xf2   :  { %v2789_v33 = vsel %vm1134_vm14, %v4244_v24, 1326507024  ;;  %v550_v52 = vor.u32 %v549_v58, %v548_v28  ;;  %v553_v55 = vshll.u32 %v552_v14, 23  ;;  %v2797_v29 = vand.u32 3, %v568_v31 }
  0xf3   :  { %v4245_v47 = vand.u32 2147483647, %v2277_v50  ;;  %v635_v30 = vadd.s32 %v2658_v16, %v2656_v23  ;;  %v647_v8 = vclz %v1842_v48  ;;  %v666_v43 = vsel %vm581_vm0, %v665_v22, %v641_v0 }
  0xf4   :  { %v554_v5 = vor.u32 4788187, %v553_v55  ;;  %v743_v28 = vadd.s32 %v742_v57, %v738_v63  ;;  %v4248_v19 = vand.u32 2147483647, %v2141_v37  ;;  %v557_v31 = vcvt.s32.f32 %v550_v52 }
  0xf5   :  { %vm2801_vm5 = vcmp.le.f32.partialorder %v4245_v47, 0.7853982  ;;  %v1843_v32 = vadd.s32 4294967294, %v647_v8  ;;  %v181_v58 = vshrl.u32 %v4236_v17, %v2244_v53  ;;  %v184_v14 = vshrl.u32 %v4238_v11, %v2244_v53 }
  0xf6   :  { %v170_v12 = vand.u32 8388607, %v4248_v19  ;;  %v555_v20 = vand.u32 2147483647, %v554_v5  ;;  %v744_v24 = vadd.s32 536870912, %v743_v28  ;;  %v186_v23 = vshll.u32 %v4238_v11, %v2223_v38 }
  0xf7   :  { %v187_v16 = vshrl.u32 %v4227_v39, %v2244_v53  ;;  %vm1844_vm10 = vcmp.lt.s32.totalorder %v1843_v32, 0  ;;  %v668_v0 = vsel %vm2801_vm5, 0, %v666_v43  ;;  %v180_v22 = vshll.u32 %v4239_v35, %v2223_v38 }
  0xf8   :  { %v183_v48 = vshll.u32 %v4236_v17, %v2223_v38  ;;  %v558_v52 = vmul.f32 %v557_v31, %v555_v20  ;;  %v650_v55 = vsel %vm1844_vm10, 0, %v1843_v32  ;;  %v745_v63 = vshrl.u32 %v744_v24, 30 }
  0xf9   :  { %v188_v57 = vor.u32 %v187_v16, %v186_v23  ;;  %vm685_vm13 = vcmp.lt.s32.totalorder %v2308_v49, 0  ;;  %v651_v47 = vsub.s32 32, %v650_v55  ;;  %v655_v8 = vsub.s32 4294967266, %v650_v55 }
  0xfa   :  { %v171_v5 = vor.u32 8388608, %v170_v12  ;;  %v179_v19 = vshrl.u32 %v4239_v35, %v2244_v53  ;;  %v559_v2 = vxor.u32 2147483648, %v558_v52  ;;  %v746_v43 = vshll.u32 %v745_v63, 30 }
  0xfb   :  { %v182_v41 = vor.u32 %v181_v58, %v180_v22  ;;  %v185_v18 = vor.u32 %v184_v14, %v183_v48  ;;  %v652_v3 = vshll.u32 %v2768_v60, %v650_v55  ;;  %v653_v9 = vshrl.u32 %v635_v30, %v651_v47  ;;  %v4249_v48 = vld [vmem:[#allocation28_spill] sm:$0xff] }
  0xfc   :  { %v656_v38 = vadd.s32 127, %v655_v8  ;;  %vm195_vm15 = vcmp.lt.s32.totalorder %v2272_v44, 1  ;;  %v560_v31 = vsel %vm477_vm4, %v559_v2, %v558_v52  ;;  %v2832_v32 = vsub.s32 %v743_v28, %v746_v43 }
  0xfd   :  { %vm196_vm1 = vcmp.lt.s32.totalorder %v2272_v44, 2  ;;  %v200_v53 = vsel %vm198_vm6, %v188_v57, 2102212464  ;;  %v563_v12 = vsel %vm2693_vm9, %v2221_v34, %v560_v31  ;;  %v654_v58 = vor.u32 %v653_v9, %v652_v3 }
  0xfe   :  { %v657_v60 = vshll.u32 %v656_v38, 23  ;;  %v769_v30 = vsub.s32 4, %v745_v63  ;;  %1961 = vcosq.f32 %v563_v12  ;;  %v749_v14 = vsub.s32 0, %v2832_v32 }
  0xff   :  { %vm197_vm3 = vcmp.lt.s32.totalorder %v2272_v44, 3  ;;  %v199_v2 = vsel %vm195_vm15, %v179_v19, %v182_v41  ;;  %1963 = vsinq.f32 %v563_v12  ;;  %v203_v24 = vsel %vm195_vm15, %v182_v41, %v185_v18 }
 0x100   :  { %v658_v28 = vor.u32 4788187, %v657_v60  ;;  %v201_v20 = vsel %vm197_vm3, %v185_v18, %v200_v53  ;;  %v661_v23 = vcvt.s32.f32 %v654_v58  ;;  %v1846_v42 = vmin.u32 %v749_v14, %v2832_v32 }
 0x101   :  { %v205_v3 = vsel %vm197_vm3, %v188_v57, %v2318_v13  ;;  %v207_v9 = vsel %vm195_vm15, %v185_v18, %v188_v57  ;;  %v209_v52 = vsel %vm197_vm3, %v4249_v48, %v2322_v27  ;;  %v211_v55 = vshll.u32 %v171_v5, 8 }
 0x102   :  { %v659_v16 = vand.u32 2147483647, %v658_v28  ;;  %v206_v22 = vsel %vm196_vm1, %v203_v24, %v205_v3  ;;  %v672_v47 = vadd.s32 3, %v668_v0  ;;  %v4250_v8 = vand.u32 2147483647, %v2308_v49 }
 0x103   :  { %v751_v19 = vclz %v1846_v42  ;;  %v770_v13 = vsel %vm685_vm13, %v769_v30, %v745_v63  ;;  %v210_v57 = vsel %vm196_vm1, %v207_v9, %v209_v52  ;;  %v202_v0 = vsel %vm196_vm1, %v199_v2, %v201_v20 }
 0x104   :  { %vm2856_vm6 = vcmp.le.f32.partialorder %v4250_v8, 0.7853982  ;;  %v662_v18 = vmul.f32 %v661_v23, %v659_v16  ;;  %v2864_v43 = vmul.u32.u64.low %v211_v55, %v206_v22  ;;  %v2865_v38 = vmul.u32.u64.high %v211_v55, %v206_v22, %v2864_v43  ;;  %v4253_v23 = vld [vmem:[#allocation6_spill] sm:$0xff] }
 0x105   :  { %v1847_v27 = vadd.s32 4294967294, %v751_v19  ;;  %v2870_v5 = vmul.u32.u64.low %v211_v55, %v210_v57  ;;  %v2871_v31 = vmul.u32.u64.high %v211_v55, %v210_v57, %v2870_v5  ;;  %vm567_vm4 = vweird.f32 %v2221_v34 }
 0x106   :  { %vm570_vm9 = vcmp.lt.s32.totalorder %v2797_v29, 2  ;;  %vm571_vm10 = vcmp.eq.s32.totalorder %v2797_v29, 0  ;;  %vm574_vm15 = vcmp.eq.s32.totalorder %v2797_v29, 2  ;;  %v663_v63 = vxor.u32 2147483648, %v662_v18  ;;  %v2908_v5 = vpop.permute.xlu1 %1735 }
 0x107   :  { %v2877_v53 = vand.u32 3, %v672_v47  ;;  %v739_v12 = vadd.s32 %v2750_v61, %v2745_v36  ;;  %vm1848_vm3 = vcmp.lt.s32.totalorder %v1847_v27, 0  ;;  %v772_v44 = vsel %vm2856_vm6, 0, %v770_v13 }
 0x108   :  { %v664_v58 = vsel %vm581_vm0, %v663_v63, %v662_v18  ;;  %v754_v60 = vsel %vm1848_vm3, 0, %v1847_v27  ;;  %v218_v30 = vmul.u32 %v211_v55, %v202_v0  ;;  %v221_v14 = vadd.s32 1, %v2865_v38  ;;  %v1962_v2 = vpop.eup %1961  ;;  %v4254_v55 = vld [vmem:[#allocation12_spill] sm:$0xff]  ;;  %v4255_v0 = vld [vmem:[#allocation11_spill] sm:$0xff] }
 0x109   :  { %v667_v28 = vsel %vm2801_vm5, %v2277_v50, %v664_v58  ;;  %v755_v20 = vsub.s32 32, %v754_v60  ;;  %v759_v24 = vsub.s32 4294967266, %v754_v60  ;;  %v267_v36 = vand.u32 2147483647, %v4253_v23  ;;  %v1964_v61 = vpop.eup %1963 }
 0x10a   :  { %v575_v42 = vxor.u32 2147483648, %v1962_v2  ;;  %1965 = vcosq.f32 %v667_v28  ;;  %v756_v3 = vshll.u32 %v2832_v32, %v754_v60  ;;  %vm220_vm0 = vc.u32 %v2871_v31, %v2864_v43 }
 0x10b   :  { %v572_v9 = vxor.u32 2147483648, %v1964_v61  ;;  %1967 = vsinq.f32 %v667_v28  ;;  %v757_v16 = vshrl.u32 %v739_v12, %v755_v20  ;;  %v760_v22 = vadd.s32 127, %v759_v24  ;;  %v4256_v20 = vld [vmem:[#allocation26_spill] sm:$0xff] }
 0x10c   :  { %v576_v54 = vsel %vm574_vm15, %v575_v42, %v1964_v61  ;;  %v776_v48 = vadd.s32 3, %v772_v44  ;;  %v222_v52 = vsel %vm220_vm0, %v221_v14, %v2865_v38  ;;  %v288_v47 = vshrl.u32 %v4238_v11, %v4254_v55 }
 0x10d   :  { %v573_v8 = vsel %vm571_vm10, %v1962_v2, %v572_v9  ;;  %v758_v32 = vor.u32 %v757_v16, %v756_v3  ;;  %v761_v19 = vshll.u32 %v760_v22, 23  ;;  %v223_v13 = vadd.s32 %v222_v52, %v218_v30  ;;  %v4257_v3 = vld [vmem:[#allocation32_spill] sm:$0xff]  ;;  %v4258_v9 = vld [vmem:[#allocation29_spill] sm:$0xff] }
 0x10e   :  { %v577_v18 = vsel %vm570_vm9, %v573_v8, %v576_v54  ;;  %v274_v57 = vand.u32 8388607, %v267_v36  ;;  %v285_v27 = vshrl.u32 %v4236_v17, %v4254_v55  ;;  %v287_v38 = vshll.u32 %v4236_v17, %v4255_v0 }
 0x10f   :  { %v578_v63 = vsel %vm567_vm4, nan, %v577_v18  ;;  %v762_v12 = vor.u32 4788187, %v761_v19  ;;  %v224_v44 = vadd.s32 536870912, %v223_v13  ;;  %v284_v29 = vshll.u32 %v4239_v35, %v4255_v0 }
 0x110   :  { %vm674_vm5 = vcmp.lt.s32.totalorder %v2877_v53, 2  ;;  %v1756_v58 = vmul.f32 %v2908_v5, %v578_v63  ;;  %v289_v60 = vor.u32 %v288_v47, %v287_v38  ;;  %v290_v30 = vshll.u32 %v4238_v11, %v4255_v0  ;;  %v4259_v38 = vld [vmem:[#allocation31_spill] sm:$0xff] }
 0x111   :  { %v291_v14 = vshrl.u32 %v4227_v39, %v4254_v55  ;;  %vm671_vm1 = vweird.f32 %v2277_v50  ;;  %v763_v34 = vand.u32 2147483647, %v762_v12  ;;  %v765_v2 = vcvt.s32.f32 %v758_v32 }
 0x112   :  { %v225_v28 = vshrl.u32 %v224_v44, 30  ;;  %vm301_vm4 = vcmp.lt.s32.totalorder %v4256_v20, 3  ;;  %1797 = vst [vmem:[#allocation3 + $0x18] sm:$0xff] %v1756_v58  ;;  %v275_v24 = vor.u32 8388608, %v274_v57  ;;  %v286_v61 = vor.u32 %v285_v27, %v284_v29 }
 0x113   :  { %v292_v42 = vor.u32 %v291_v14, %v290_v30  ;;  %v313_v16 = vsel %vm301_vm4, %v4258_v9, %v4257_v3  ;;  %vm165_vm9 = vcmp.lt.s32.totalorder %v2141_v37, 0  ;;  %vm675_vm10 = vcmp.eq.s32.totalorder %v2877_v53, 0 }
 0x114   :  { %vm678_vm15 = vcmp.eq.s32.totalorder %v2877_v53, 2  ;;  %v766_v22 = vmul.f32 %v765_v2, %v763_v34  ;;  %v226_v54 = vshll.u32 %v225_v28, 30  ;;  %v1966_v52 = vpop.eup %1965  ;;  %v2929_v47 = vand.u32 3, %v776_v48 }
 0x115   :  { %v283_v8 = vshrl.u32 %v4239_v35, %v4254_v55  ;;  %vm299_vm3 = vcmp.lt.s32.totalorder %v4256_v20, 1  ;;  %vm300_vm0 = vcmp.lt.s32.totalorder %v4256_v20, 2  ;;  %v1968_v32 = vpop.eup %1967  ;;  %v679_v19 = vxor.u32 2147483648, %v1966_v52 }
 0x116   :  { %v767_v18 = vxor.u32 2147483648, %v766_v22  ;;  %v2935_v57 = vsub.s32 %v223_v13, %v226_v54  ;;  %v311_v27 = vsel %vm299_vm3, %v289_v60, %v292_v42  ;;  %v676_v0 = vxor.u32 2147483648, %v1968_v32 }
 0x117   :  { %v307_v48 = vsel %vm299_vm3, %v286_v61, %v289_v60  ;;  %v309_v55 = vsel %vm301_vm4, %v292_v42, %v4259_v38  ;;  %v315_v63 = vshll.u32 %v275_v24, 8  ;;  %v680_v12 = vsel %vm678_vm15, %v679_v19, %v1968_v32  ;;  %v4260_v19 = vld [vmem:[#allocation7_spill] sm:$0xff] }
 0x118   :  { %v768_v44 = vsel %vm685_vm13, %v767_v18, %v766_v22  ;;  %v229_v13 = vsub.s32 0, %v2935_v57  ;;  %v249_v29 = vsub.s32 4, %v225_v28  ;;  %v677_v58 = vsel %vm675_vm10, %v1966_v52, %v676_v0 }
 0x119   :  { %v771_v30 = vsel %vm2856_vm6, %v2308_v49, %v768_v44  ;;  %v304_v14 = vsel %vm302_vm7, %v292_v42, 2102212464  ;;  %v314_v34 = vsel %vm300_vm0, %v311_v27, %v313_v16  ;;  %v681_v2 = vsel %vm674_vm5, %v677_v58, %v680_v12 }
 0x11a   :  { %1969 = vcosq.f32 %v771_v30  ;;  %v1826_v24 = vmin.u32 %v229_v13, %v2935_v57  ;;  %v310_v3 = vsel %vm300_vm0, %v307_v48, %v309_v55  ;;  %v682_v9 = vsel %vm671_vm1, nan, %v681_v2  ;;  %v4264_v48 = vld [vmem:[#allocation14_spill] sm:$0xff] }
 0x11b   :  { %1971 = vsinq.f32 %v771_v30  ;;  %v2965_v41 = vmul.u32.u64.low %v315_v63, %v314_v34  ;;  %v2966_v22 = vmul.u32.u64.high %v315_v63, %v314_v34, %v2965_v41  ;;  %v1757_v42 = vmul.f32 %v2908_v5, %v682_v9 }
 0x11c   :  { %v231_v54 = vclz %v1826_v24  ;;  %v303_v53 = vsel %vm299_vm3, %v283_v8, %v286_v61  ;;  %v305_v16 = vsel %vm301_vm4, %v289_v60, %v304_v14  ;;  %v2975_v52 = vsel %vm165_vm9, %v249_v29, %v225_v28 }
 0x11d   :  { %v2977_v32 = vmul.u32.u64.low %v315_v63, %v310_v3  ;;  %v2978_v50 = vmul.u32.u64.high %v315_v63, %v310_v3, %v2977_v32  ;;  %v371_v18 = vand.u32 2147483647, %v4260_v19  ;;  %vm782_vm7 = vcmp.eq.s32.totalorder %v2929_v47, 2  ;;  %1798 = vst [vmem:[#allocation3 + $0x20] sm:$0xff] %v1757_v42 }
 0x11e   :  { %v4261_v27 = vand.u32 2147483647, %v2141_v37  ;;  %v219_v60 = vadd.s32 %v2864_v43, %v2871_v31  ;;  %v1827_v61 = vadd.s32 4294967294, %v231_v54  ;;  %vm779_vm6 = vcmp.eq.s32.totalorder %v2929_v47, 0  ;;  %v4265_v31 = vld [vmem:[#allocation13_spill] sm:$0xff] }
 0x11f   :  { %v306_v28 = vsel %vm300_vm0, %v303_v53, %v305_v16  ;;  %v2994_v8 = vadd.s32 %v2977_v32, %v2966_v22  ;;  %vm324_vm5 = vc.u32 %v2966_v22, %v2977_v32  ;;  %v389_v38 = vshrl.u32 %v4236_v17, %v4264_v48 }
 0x120   :  { %vm2984_vm13 = vcmp.le.f32.partialorder %v4261_v27, 0.7853982  ;;  %vm778_vm1 = vcmp.lt.s32.totalorder %v2929_v47, 2  ;;  %vm1828_vm4 = vcmp.lt.s32.totalorder %v1827_v61, 0  ;;  %v388_v55 = vshll.u32 %v4239_v35, %v4265_v31 }
 0x121   :  { %v252_v43 = vsel %vm2984_vm13, 0, %v2975_v52  ;;  %v392_v20 = vshrl.u32 %v4238_v11, %v4264_v48  ;;  %vm775_vm10 = vweird.f32 %v2308_v49  ;;  %v234_v12 = vsel %vm1828_vm4, 0, %v1827_v61 }
 0x122   :  { %v325_v44 = vadd.s32 1, %v2978_v50  ;;  %v378_v13 = vand.u32 8388607, %v371_v18  ;;  %v391_v29 = vshll.u32 %v4236_v17, %v4265_v31  ;;  %v235_v58 = vsub.s32 32, %v234_v12 }
 0x123   :  { %v239_v30 = vsub.s32 4294967266, %v234_v12  ;;  %v322_v14 = vmul.u32 %v315_v63, %v306_v28  ;;  %v390_v34 = vor.u32 %v389_v38, %v388_v55  ;;  %v394_v3 = vshll.u32 %v4238_v11, %v4265_v31  ;;  %v4266_v28 = vld [vmem:[#allocation27_spill] sm:$0xff] }
 0x124   :  { %v326_v2 = vsel %vm324_vm5, %v325_v44, %v2978_v50  ;;  %v393_v24 = vor.u32 %v392_v20, %v391_v29  ;;  %v395_v9 = vshrl.u32 %v4227_v39, %v4264_v48  ;;  %v1970_v41 = vpop.eup %1969  ;;  %v236_v42 = vshll.u32 %v2935_v57, %v234_v12  ;;  %v4267_v29 = vld [vmem:[#allocation34_spill] sm:$0xff] }
 0x125   :  { %v237_v54 = vshrl.u32 %v219_v60, %v235_v58  ;;  %v240_v53 = vadd.s32 127, %v239_v30  ;;  %v327_v16 = vadd.s32 %v326_v2, %v322_v14  ;;  %v1972_v52 = vpop.eup %1971  ;;  %v783_v63 = vxor.u32 2147483648, %v1970_v41  ;;  %v4268_v30 = vld [vmem:[#allocation36_spill] sm:$0xff]  ;;  %v4269_v14 = vld [vmem:[#allocation30_spill] sm:$0xff] }
 0x126   :  { %v379_v27 = vor.u32 8388608, %v378_v13  ;;  %v396_v61 = vor.u32 %v395_v9, %v394_v3  ;;  %vm403_vm15 = vcmp.lt.s32.totalorder %v4266_v28, 1  ;;  %v780_v22 = vxor.u32 2147483648, %v1972_v52 }
 0x127   :  { %v238_v32 = vor.u32 %v237_v54, %v236_v42  ;;  %v241_v50 = vshll.u32 %v240_v53, 23  ;;  %v328_v38 = vadd.s32 536870912, %v327_v16  ;;  %v784_v31 = vsel %vm782_vm7, %v783_v63, %v1972_v52 }
 0x128   :  { %vm404_vm3 = vcmp.lt.s32.totalorder %v4266_v28, 2  ;;  %vm405_vm0 = vcmp.lt.s32.totalorder %v4266_v28, 3  ;;  %v411_v57 = vsel %vm403_vm15, %v390_v34, %v393_v24  ;;  %v781_v60 = vsel %vm779_vm6, %v1970_v41, %v780_v22 }
 0x129   :  { %v242_v55 = vor.u32 4788187, %v241_v50  ;;  %v329_v20 = vshrl.u32 %v328_v38, 30  ;;  %v415_v12 = vsel %vm403_vm15, %v393_v24, %v396_v61  ;;  %vm269_vm5 = vcmp.lt.s32.totalorder %v4253_v23, 0 }
 0x12a   :  { %v785_v44 = vsel %vm778_vm1, %v781_v60, %v784_v31  ;;  %v408_v13 = vsel %vm406_vm8, %v396_v61, 2102212464  ;;  %v413_v58 = vsel %vm405_vm0, %v396_v61, %v4267_v29  ;;  %v417_v2 = vsel %vm405_vm0, %v4269_v14, %v4268_v30 }
 0x12b   :  { %v786_v3 = vsel %vm775_vm10, nan, %v785_v44  ;;  %v243_v9 = vand.u32 2147483647, %v242_v55  ;;  %v245_v41 = vcvt.s32.f32 %v238_v32  ;;  %v330_v42 = vshll.u32 %v329_v20, 30 }
 0x12c   :  { %v1758_v47 = vmul.f32 %v2908_v5, %v786_v3  ;;  %v387_v54 = vshrl.u32 %v4239_v35, %v4264_v48  ;;  %v418_v53 = vsel %vm404_vm3, %v415_v12, %v417_v2  ;;  %v419_v52 = vshll.u32 %v379_v27, 8  ;;  %v4270_v12 = vld [vmem:[#allocation49_spill] sm:$0xff] }
 0x12d   :  { %v1768_v63 = vlaneseq  ;;  %v246_v61 = vmul.f32 %v245_v41, %v243_v9  ;;  %v3051_v22 = vsub.s32 %v327_v16, %v330_v42  ;;  %v414_v49 = vsel %vm404_vm3, %v411_v57, %v413_v58 }
 0x12e   :  { %1799 = vst [vmem:[#allocation3 + $0x28] sm:$0xff] %v1758_v47  ;;  %v407_v32 = vsel %vm403_vm15, %v387_v54, %v390_v34  ;;  %v409_v5 = vsel %vm405_vm0, %v393_v24, %v408_v13  ;;  %v3059_v50 = vmul.u32.u64.low %v419_v52, %v418_v53  ;;  %v3060_v48 = vmul.u32.u64.high %v419_v52, %v418_v53, %v3059_v50 }
 0x12f   :  { %v247_v38 = vxor.u32 2147483648, %v246_v61  ;;  %v256_v31 = vadd.s32 3, %v252_v43  ;;  %v333_v27 = vsub.s32 0, %v3051_v22  ;;  %v353_v60 = vsub.s32 4, %v329_v20 }
 0x130   :  { %v3065_v16 = vor.u32 %v2762_v6, %v2723_v45  ;;  %v3067_v57 = vmul.u32.u64.low %v419_v52, %v414_v49  ;;  %v3068_v55 = vmul.u32.u64.high %v419_v52, %v414_v49, %v3067_v57  ;;  %v1099_v34 = vand.u32 2147483647, %v4270_v12 }
 0x131   :  { %v3073_v24 = vor.u32 %v2793_v25, %v2766_v46  ;;  %v248_v44 = vsel %vm165_vm9, %v247_v38, %v246_v61  ;;  %v1830_v43 = vmin.u32 %v333_v27, %v3051_v22  ;;  %v410_v13 = vsel %vm404_vm3, %v407_v32, %v409_v5 }
 0x132   :  { %v3080_v29 = vshrl.u32 %v1768_v63, 7  ;;  %v251_v45 = vsel %vm2984_vm13, %v2141_v37, %v248_v44  ;;  %v3086_v6 = vadd.s32 %v3067_v57, %v3060_v48  ;;  %vm428_vm8 = vc.u32 %v3060_v48, %v3067_v57 }
 0x133   :  { %1973 = vcosq.f32 %v251_v45  ;;  %v3089_v46 = vand.u32 3, %v256_v31  ;;  %v335_v25 = vclz %v1830_v43  ;;  %v3093_v58 = vsel %vm269_vm5, %v353_v60, %v329_v20 }
 0x134   :  { %1975 = vsinq.f32 %v251_v45  ;;  %v426_v28 = vmul.u32 %v419_v52, %v410_v13  ;;  %v429_v30 = vadd.s32 1, %v3068_v55  ;;  %v1106_v0 = vand.u32 8388607, %v1099_v34 }
 0x135   :  { %v1831_v14 = vadd.s32 4294967294, %v335_v25  ;;  %v1116_v2 = vshll.u32 %v4239_v35, %v2500_v40  ;;  %v1117_v3 = vshrl.u32 %v4236_v17, %v2515_v15  ;;  %v1119_v9 = vshll.u32 %v4236_v17, %v2500_v40 }
 0x136   :  { %v430_v20 = vsel %vm428_vm8, %v429_v30, %v3068_v55  ;;  %v1120_v41 = vshrl.u32 %v4238_v11, %v2515_v15  ;;  %v1122_v42 = vshll.u32 %v4238_v11, %v2500_v40  ;;  %v1123_v47 = vshrl.u32 %v4227_v39, %v2515_v15 }
 0x137   :  { %vm262_vm9 = vcmp.eq.s32.totalorder %v3089_v46, 2  ;;  %vm3114_vm7 = vcmp.le.f32.partialorder %v267_v36, 0.7853982  ;;  %vm1832_vm13 = vcmp.lt.s32.totalorder %v1831_v14, 0  ;;  %v431_v53 = vadd.s32 %v430_v20, %v426_v28 }
 0x138   :  { %vm259_vm6 = vcmp.eq.s32.totalorder %v3089_v46, 0  ;;  %v338_v52 = vsel %vm1832_vm13, 0, %v1831_v14  ;;  %v1118_v63 = vor.u32 %v1117_v3, %v1116_v2  ;;  %v1121_v61 = vor.u32 %v1120_v41, %v1119_v9 }
 0x139   :  { %v1124_v49 = vor.u32 %v1123_v47, %v1122_v42  ;;  %vm258_vm1 = vcmp.lt.s32.totalorder %v3089_v46, 2  ;;  %v339_v40 = vsub.s32 32, %v338_v52  ;;  %v343_v32 = vsub.s32 4294967266, %v338_v52 }
 0x13a   :  { %v356_v5 = vsel %vm3114_vm7, 0, %v3093_v58  ;;  %v432_v36 = vadd.s32 536870912, %v431_v53  ;;  %vm255_vm4 = vweird.f32 %v2141_v37  ;;  %v340_v50 = vshll.u32 %v3051_v22, %v338_v52 }
 0x13b   :  { %v1107_v48 = vor.u32 8388608, %v1106_v0  ;;  %v1115_v38 = vshrl.u32 %v4239_v35, %v2515_v15  ;;  %vm1131_vm10 = vcmp.lt.s32.totalorder %v2702_v51, 1  ;;  %v341_v31 = vshrl.u32 %v2994_v8, %v339_v40 }
 0x13c   :  { %v344_v27 = vadd.s32 127, %v343_v32  ;;  %v3129_v60 = vshrl.u32 %v432_v36, 30  ;;  %vm1133_vm15 = vcmp.lt.s32.totalorder %v2702_v51, 3  ;;  %v1139_v57 = vsel %vm1131_vm10, %v1118_v63, %v1121_v61 }
 0x13d   :  { %v1141_v22 = vsel %vm1133_vm15, %v1124_v49, %v2782_v7  ;;  %v1143_v55 = vsel %vm1131_vm10, %v1121_v61, %v1124_v49  ;;  %v1145_v15 = vsel %vm1133_vm15, %v2754_v21, %v2789_v33  ;;  %v1974_v8 = vpop.eup %1973  ;;  %vm1238_vm3 = vcmp.lt.s32.totalorder %v2711_v56, 4 }
 0x13e   :  { %v342_v44 = vor.u32 %v341_v31, %v340_v50  ;;  %v345_v43 = vshll.u32 %v344_v27, 23  ;;  %v434_v13 = vshll.u32 %v3129_v60, 30  ;;  %vm1132_vm0 = vcmp.lt.s32.totalorder %v2702_v51, 2  ;;  %v1976_v45 = vpop.eup %1975 }
 0x13f   :  { %v263_v25 = vxor.u32 2147483648, %v1974_v8  ;;  %v1136_v7 = vsel %vm1134_vm14, %v1124_v49, 2102212464  ;;  %v1146_v58 = vsel %vm1132_vm0, %v1143_v55, %v1145_v15  ;;  %v1147_v28 = vshll.u32 %v1107_v48, 8  ;;  %v4273_v55 = vld [vmem:[#allocation50_spill] sm:$0xff] }
 0x140   :  { %v260_v30 = vxor.u32 2147483648, %v1976_v45  ;;  %v346_v21 = vor.u32 4788187, %v345_v43  ;;  %v3150_v33 = vsub.s32 %v431_v53, %v434_v13  ;;  %v1142_v0 = vsel %vm1132_vm0, %v1139_v57, %v1141_v22 }
 0x141   :  { %vm373_vm8 = vcmp.lt.s32.totalorder %v4260_v19, 0  ;;  %v264_v14 = vsel %vm262_vm9, %v263_v25, %v1976_v45  ;;  %v1135_v2 = vsel %vm1131_vm10, %v1115_v38, %v1118_v63  ;;  %v349_v42 = vcvt.s32.f32 %v342_v44  ;;  %v3173_v63 = vpop.permute.xlu0 %1730 }
 0x142   :  { %v3159_v3 = vmul.u32.u64.low %v1147_v28, %v1146_v58  ;;  %v3160_v9 = vmul.u32.u64.high %v1147_v28, %v1146_v58, %v3159_v3  ;;  %v261_v20 = vsel %vm259_vm6, %v1974_v8, %v260_v30  ;;  %v347_v41 = vand.u32 2147483647, %v346_v21 }
 0x143   :  { %v437_v47 = vsub.s32 0, %v3150_v33  ;;  %v265_v53 = vsel %vm258_vm1, %v261_v20, %v264_v14  ;;  %v1137_v52 = vsel %vm1133_vm15, %v1121_v61, %v1136_v7  ;;  %vm1774_vm14 = vcmp.lt.s32.totalorder %v3080_v29, 4 }
 0x144   :  { %v3169_v49 = vmul.u32.u64.low %v1147_v28, %v1142_v0  ;;  %v3170_v40 = vmul.u32.u64.high %v1147_v28, %v1142_v0, %v3169_v49  ;;  %v266_v32 = vsel %vm255_vm4, nan, %v265_v53  ;;  %v350_v36 = vmul.f32 %v349_v42, %v347_v41 }
 0x145   :  { %v1834_v50 = vmin.u32 %v437_v47, %v3150_v33  ;;  %v360_v48 = vadd.s32 3, %v356_v5  ;;  %v1753_v46 = vmul.f32 %v3173_v63, %v266_v32  ;;  %v457_v27 = vsub.s32 4, %v3129_v60  ;;  %v2021_v5 = vld [vmem:[#allocation2] sm:$0xff] }
 0x146   :  { %v3180_v38 = vadd.s32 %v3169_v49, %v3160_v9  ;;  %vm1156_vm9 = vc.u32 %v3160_v9, %v3169_v49  ;;  %v351_v61 = vxor.u32 2147483648, %v350_v36  ;;  %v1138_v57 = vsel %vm1132_vm0, %v1135_v2, %v1137_v52 }
 0x147   :  { %v439_v31 = vclz %v1834_v50  ;;  %v3189_v37 = vsel %vm1238_vm3, %v3065_v16, 920167782  ;;  %vm1342_vm13 = vcmp.lt.s32.totalorder %v2714_v10, 4  ;;  %v1779_v22 = vsel %vm1774_vm14, %v2021_v5, %v1753_v46 }
 0x148   :  { %v1203_v15 = vand.u32 2147483647, %v4273_v55  ;;  %v4274_v8 = vor.u32 %v2569_v1, %v2565_v26  ;;  %v352_v44 = vsel %vm269_vm5, %v351_v61, %v350_v36  ;;  %1794 = vst [vmem:[#allocation3] sm:$0xff] %v1779_v22  ;;  %v1157_v13 = vadd.s32 1, %v3170_v40 }
 0x149   :  { %v1835_v43 = vadd.s32 4294967294, %v439_v31  ;;  %v3206_v45 = vsel %vm1342_vm13, %v3073_v24, 920167782  ;;  %v355_v25 = vsel %vm3114_vm7, %v4253_v23, %v352_v44  ;;  %v3211_v1 = vand.u32 3, %v360_v48 }
 0x14a   :  { %v1248_v51 = vsel %vm1238_vm3, %v4274_v8, 1326507024  ;;  %v1154_v26 = vmul.u32 %v1147_v28, %v1138_v57  ;;  %1977 = vcosq.f32 %v355_v25  ;;  %v3216_v7 = vsel %vm373_vm8, %v457_v27, %v3129_v60 }
 0x14b   :  { %vm1836_vm6 = vcmp.lt.s32.totalorder %v1835_v43, 0  ;;  %v1158_v58 = vsel %vm1156_vm9, %v1157_v13, %v3170_v40  ;;  %1979 = vsinq.f32 %v355_v25  ;;  %v1210_v54 = vand.u32 8388607, %v1203_v15 }
 0x14c   :  { %v442_v30 = vsel %vm1836_vm6, 0, %v1835_v43  ;;  %v1159_v21 = vadd.s32 %v1158_v58, %v1154_v26  ;;  %v1220_v28 = vshll.u32 %v4239_v35, %v2520_v62  ;;  %v1221_v2 = vshrl.u32 %v4236_v17, %v2544_v59 }
 0x14d   :  { %v443_v0 = vsub.s32 32, %v442_v30  ;;  %v447_v14 = vsub.s32 4294967266, %v442_v30  ;;  %v444_v60 = vshll.u32 %v3150_v33, %v442_v30  ;;  %v1223_v9 = vshll.u32 %v4236_v17, %v2520_v62 }
 0x14e   :  { %v1160_v3 = vadd.s32 536870912, %v1159_v21  ;;  %v1224_v20 = vshrl.u32 %v4238_v11, %v2544_v59  ;;  %v1226_v47 = vshll.u32 %v4238_v11, %v2520_v62  ;;  %v1227_v53 = vshrl.u32 %v4227_v39, %v2544_v59 }
 0x14f   :  { %v445_v41 = vshrl.u32 %v3086_v6, %v443_v0  ;;  %v448_v42 = vadd.s32 127, %v447_v14  ;;  %vm3239_vm5 = vcmp.le.f32.partialorder %v371_v18, 0.7853982  ;;  %v1222_v49 = vor.u32 %v1221_v2, %v1220_v28 }
 0x150   :  { %v1161_v52 = vshrl.u32 %v1160_v3, 30  ;;  %v1225_v40 = vor.u32 %v1224_v20, %v1223_v9  ;;  %vm362_vm7 = vcmp.lt.s32.totalorder %v3211_v1, 2  ;;  %vm363_vm1 = vcmp.eq.s32.totalorder %v3211_v1, 0 }
 0x151   :  { %v446_v6 = vor.u32 %v445_v41, %v444_v60  ;;  %v449_v32 = vshll.u32 %v448_v42, 23  ;;  %v1228_v36 = vor.u32 %v1227_v53, %v1226_v47  ;;  %vm359_vm4 = vweird.f32 %v4253_v23  ;;  %v4277_v41 = vld [vmem:[#allocation65_spill] sm:$0xff] }
 0x152   :  { %vm366_vm10 = vcmp.eq.s32.totalorder %v3211_v1, 2  ;;  %v460_v62 = vsel %vm3239_vm5, 0, %v3216_v7  ;;  %vm1101_vm15 = vcmp.lt.s32.totalorder %v4270_v12, 0  ;;  %v1162_v18 = vshll.u32 %v1161_v52, 30 }
 0x153   :  { %v1219_v50 = vshrl.u32 %v4239_v35, %v2544_v59  ;;  %v450_v48 = vor.u32 4788187, %v449_v32  ;;  %v1211_v46 = vor.u32 8388608, %v1210_v54  ;;  %vm1235_vm0 = vcmp.lt.s32.totalorder %v2711_v56, 1 }
 0x154   :  { %vm1236_vm9 = vcmp.lt.s32.totalorder %v2711_v56, 2  ;;  %v3255_v61 = vsub.s32 %v1159_v21, %v1162_v18  ;;  %v1185_v31 = vsub.s32 4, %v1161_v52  ;;  %vm1237_vm6 = vcmp.lt.s32.totalorder %v2711_v56, 3  ;;  %v1978_v57 = vpop.eup %1977 }
 0x155   :  { %v1243_v27 = vsel %vm1235_vm0, %v1222_v49, %v1225_v40  ;;  %v451_v5 = vand.u32 2147483647, %v450_v48  ;;  %v453_v22 = vcvt.s32.f32 %v446_v6  ;;  %v1240_v59 = vsel %vm1238_vm3, %v1228_v36, 2102212464  ;;  %v1980_v44 = vpop.eup %1979 }
 0x156   :  { %v1247_v8 = vsel %vm1235_vm0, %v1225_v40, %v1228_v36  ;;  %v367_v43 = vxor.u32 2147483648, %v1978_v57  ;;  %v1165_v13 = vsub.s32 0, %v3255_v61  ;;  %v1245_v25 = vsel %vm1237_vm6, %v1228_v36, %v3189_v37 }
 0x157   :  { %v1249_v26 = vsel %vm1237_vm6, %v3065_v16, %v1248_v51  ;;  %v364_v7 = vxor.u32 2147483648, %v1980_v44  ;;  %v454_v58 = vmul.f32 %v453_v22, %v451_v5  ;;  %v1251_v21 = vshll.u32 %v1211_v46, 8 }
 0x158   :  { %v1250_v30 = vsel %vm1236_vm9, %v1247_v8, %v1249_v26  ;;  %v368_v54 = vsel %vm366_vm10, %v367_v43, %v1980_v44  ;;  %v1862_v0 = vmin.u32 %v1165_v13, %v3255_v61  ;;  %v1239_v14 = vsel %vm1235_vm0, %v1219_v50, %v1222_v49  ;;  %v4282_v8 = vld [vmem:[#allocation64_spill] sm:$0xff] }
 0x159   :  { %v1241_v37 = vsel %vm1237_vm6, %v1225_v40, %v1240_v59  ;;  %v365_v16 = vsel %vm363_vm1, %v1978_v57, %v364_v7  ;;  %v455_v51 = vxor.u32 2147483648, %v454_v58  ;;  %v464_v3 = vadd.s32 3, %v460_v62  ;;  %v4279_v62 = vld [vmem:[#allocation52_spill] sm:$0xff] }
 0x15a   :  { %v3282_v28 = vmul.u32.u64.low %v1251_v21, %v1250_v30  ;;  %v3283_v2 = vmul.u32.u64.high %v1251_v21, %v1250_v30, %v3282_v28  ;;  %v369_v60 = vsel %vm362_vm7, %v365_v16, %v368_v54  ;;  %v1167_v9 = vclz %v1862_v0 }
 0x15b   :  { %v1246_v20 = vsel %vm1236_vm9, %v1243_v27, %v1245_v25  ;;  %v4278_v42 = vor.u32 %v2577_v4, %v4277_v41  ;;  %v370_v53 = vsel %vm359_vm4, nan, %v369_v60  ;;  %v456_v49 = vsel %vm373_vm8, %v455_v51, %v454_v58  ;;  %v4283_v25 = vld [vmem:[#allocation63_spill] sm:$0xff] }
 0x15c   :  { %v1186_v1 = vsel %vm1101_vm15, %v1185_v31, %v1161_v52  ;;  %v459_v40 = vsel %vm3239_vm5, %v4260_v19, %v456_v49  ;;  %v1754_v6 = vmul.f32 %v3173_v63, %v370_v53  ;;  %v1863_v4 = vadd.s32 4294967294, %v1167_v9  ;;  %v2022_v52 = vld [vmem:[#allocation2 + $0x8] sm:$0xff] }
 0x15d   :  { %v3294_v47 = vsel %vm1342_vm13, %v4278_v42, 1326507024  ;;  %v1242_v32 = vsel %vm1236_vm9, %v1239_v14, %v1241_v37  ;;  %1981 = vcosq.f32 %v459_v40  ;;  %v1307_v18 = vand.u32 2147483647, %v4279_v62 }
 0x15e   :  { %v3308_v36 = vmul.u32.u64.low %v1251_v21, %v1246_v20  ;;  %v3309_v23 = vmul.u32.u64.high %v1251_v21, %v1246_v20, %v3308_v36  ;;  %1983 = vsinq.f32 %v459_v40  ;;  %v3312_v50 = vand.u32 3, %v464_v3 }
 0x15f   :  { %v1780_v33 = vsel %vm1774_vm14, %v2022_v52, %v1754_v6  ;;  %vm1864_vm3 = vcmp.lt.s32.totalorder %v1863_v4, 0  ;;  %vm3318_vm8 = vcmp.le.f32.partialorder %v1099_v34, 0.7853982  ;;  %v1258_v5 = vmul.u32 %v1251_v21, %v1242_v32 }
 0x160   :  { %1795 = vst [vmem:[#allocation3 + $0x8] sm:$0xff] %v1780_v33  ;;  %v1170_v48 = vsel %vm1864_vm3, 0, %v1863_v4  ;;  %v3323_v46 = vadd.s32 %v3308_v36, %v3283_v2  ;;  %vm1260_vm5 = vc.u32 %v3283_v2, %v3308_v36  ;;  %v1188_v57 = vsel %vm3318_vm8, 0, %v1186_v1 }
 0x161   :  { %v1171_v31 = vsub.s32 32, %v1170_v48  ;;  %v1175_v27 = vsub.s32 4294967266, %v1170_v48  ;;  %v1172_v22 = vshll.u32 %v3255_v61, %v1170_v48  ;;  %v1261_v59 = vadd.s32 1, %v3309_v23 }
 0x162   :  { %v1314_v34 = vand.u32 8388607, %v1307_v18  ;;  %v1325_v44 = vshrl.u32 %v4236_v17, %v4282_v8  ;;  %vm467_vm7 = vcmp.eq.s32.totalorder %v3312_v50, 0  ;;  %v1327_v26 = vshll.u32 %v4236_v17, %v4283_v25 }
 0x163   :  { %v1173_v43 = vshrl.u32 %v3180_v38, %v1171_v31  ;;  %v1176_v13 = vadd.s32 127, %v1175_v27  ;;  %v1328_v7 = vshrl.u32 %v4238_v11, %v4282_v8  ;;  %vm466_vm1 = vcmp.lt.s32.totalorder %v3312_v50, 2 }
 0x164   :  { %v1262_v61 = vsel %vm1260_vm5, %v1261_v59, %v3309_v23  ;;  %v1324_v58 = vshll.u32 %v4239_v35, %v4283_v25  ;;  %v1330_v30 = vshll.u32 %v4238_v11, %v4283_v25  ;;  %v1331_v38 = vshrl.u32 %v4227_v39, %v4282_v8 }
 0x165   :  { %vm463_vm4 = vweird.f32 %v4260_v19  ;;  %v1174_v21 = vor.u32 %v1173_v43, %v1172_v22  ;;  %v1177_v54 = vshll.u32 %v1176_v13, 23  ;;  %v1263_v0 = vadd.s32 %v1262_v61, %v1258_v5  ;;  %v4285_v43 = vld [vmem:[#allocation21_spill] sm:$0xff] }
 0x166   :  { %v1329_v14 = vor.u32 %v1328_v7, %v1327_v26  ;;  %vm470_vm10 = vcmp.eq.s32.totalorder %v3312_v50, 2  ;;  %v1192_v37 = vadd.s32 3, %v1188_v57  ;;  %v1326_v16 = vor.u32 %v1325_v44, %v1324_v58  ;;  %v4284_v44 = vld [vmem:[#allocation22_spill] sm:$0xff]  ;;  %v4287_v50 = vld [vmem:[#allocation41_spill] sm:$0xff] }
 0x167   :  { %v1332_v51 = vor.u32 %v1331_v38, %v1330_v30  ;;  %v1178_v28 = vor.u32 4788187, %v1177_v54  ;;  %v1264_v2 = vadd.s32 536870912, %v1263_v0  ;;  %v1315_v60 = vor.u32 8388608, %v1314_v34  ;;  %v1982_v9 = vpop.eup %1981 }
 0x168   :  { %v1323_v3 = vshrl.u32 %v4239_v35, %v4282_v8  ;;  %v1181_v20 = vcvt.s32.f32 %v1174_v21  ;;  %vm1339_vm0 = vcmp.lt.s32.totalorder %v2714_v10, 1  ;;  %vm1340_vm9 = vcmp.lt.s32.totalorder %v2714_v10, 2  ;;  %v1984_v41 = vpop.eup %1983  ;;  %v2023_v21 = vld [vmem:[#allocation2 + $0x10] sm:$0xff] }
 0x169   :  { %vm1341_vm6 = vcmp.lt.s32.totalorder %v2714_v10, 3  ;;  %v471_v42 = vxor.u32 2147483648, %v1982_v9  ;;  %v1179_v53 = vand.u32 2147483647, %v1178_v28  ;;  %v1265_v49 = vshrl.u32 %v1264_v2, 30  ;;  %v4290_v28 = vld [vmem:[#allocation42_spill] sm:$0xff] }
 0x16a   :  { %v1351_v1 = vsel %vm1339_vm0, %v1329_v14, %v1332_v51  ;;  %v468_v40 = vxor.u32 2147483648, %v1984_v41  ;;  %v1347_v6 = vsel %vm1339_vm0, %v1326_v16, %v1329_v14  ;;  %v1349_v4 = vsel %vm1341_vm6, %v1332_v51, %v3206_v45 }
 0x16b   :  { %v1353_v32 = vsel %vm1341_vm6, %v3073_v24, %v3294_v47  ;;  %v472_v36 = vsel %vm470_vm10, %v471_v42, %v1984_v41  ;;  %v1182_v23 = vmul.f32 %v1181_v20, %v1179_v53  ;;  %v1266_v52 = vshll.u32 %v1265_v49, 30  ;;  %v4295_v42 = vld [vmem:[#allocation8_spill] sm:$0xff]  ;;  %v4306_v20 = vld [vmem:[#allocation18_spill] sm:$0xff] }
 0x16c   :  { %v1344_v33 = vsel %vm1342_vm13, %v1332_v51, 2102212464  ;;  %v469_v48 = vsel %vm467_vm7, %v1982_v9, %v468_v40  ;;  %v1343_v31 = vsel %vm1339_vm0, %v1323_v3, %v1326_v16  ;;  %v1354_v45 = vsel %vm1340_vm9, %v1351_v1, %v1353_v32  ;;  %v4289_v51 = vld [vmem:[#allocation39_spill] sm:$0xff]  ;;  %v4292_v3 = vld [vmem:[#allocation44_spill] sm:$0xff] }
 0x16d   :  { %v1355_v27 = vshll.u32 %v1315_v60, 8  ;;  %v473_v24 = vsel %vm466_vm1, %v469_v48, %v472_v36  ;;  %v1183_v47 = vxor.u32 2147483648, %v1182_v23  ;;  %v3378_v57 = vsub.s32 %v1263_v0, %v1266_v52  ;;  %v4297_v52 = vld [vmem:[#allocation15_spill] sm:$0xff] }
 0x16e   :  { %v1350_v5 = vsel %vm1340_vm9, %v1347_v6, %v1349_v4  ;;  %v474_v22 = vsel %vm463_vm4, nan, %v473_v24  ;;  %v1345_v59 = vsel %vm1341_vm6, %v1329_v14, %v1344_v33  ;;  %v4286_v13 = vor.u32 %v4284_v44, %v4285_v43  ;;  %v4296_v6 = vld [vmem:[#allocation17_spill] sm:$0xff] }
 0x16f   :  { %v3386_v34 = vmul.u32.u64.low %v1355_v27, %v1354_v45  ;;  %v3387_v8 = vmul.u32.u64.high %v1355_v27, %v1354_v45, %v3386_v34  ;;  %v1755_v26 = vmul.f32 %v3173_v63, %v474_v22  ;;  %v1184_v7 = vsel %vm1101_vm15, %v1183_v47, %v1182_v23  ;;  %v4298_v44 = vld [vmem:[#allocation33_spill] sm:$0xff] }
 0x170   :  { %v3394_v25 = vsel %vm1030_vm2, %v4286_v13, 1326507024  ;;  %v1269_v19 = vsub.s32 0, %v3378_v57  ;;  %v1187_v61 = vsel %vm3318_vm8, %v4270_v12, %v1184_v7  ;;  %v3403_v58 = vand.u32 3, %v1192_v37  ;;  %v4288_v37 = vld [vmem:[#allocation38_spill] sm:$0xff] }
 0x171   :  { %v3405_v30 = vmul.u32.u64.low %v1355_v27, %v1350_v5  ;;  %v3406_v38 = vmul.u32.u64.high %v1355_v27, %v1350_v5, %v3405_v30  ;;  %v1781_v54 = vsel %vm1774_vm14, %v2023_v21, %v1755_v26  ;;  %1985 = vcosq.f32 %v1187_v61 }
 0x172   :  { %v1866_v63 = vmin.u32 %v1269_v19, %v3378_v57  ;;  %v1346_v0 = vsel %vm1340_vm9, %v1343_v31, %v1345_v59  ;;  %1796 = vst [vmem:[#allocation3 + $0x10] sm:$0xff] %v1781_v54  ;;  %1987 = vsinq.f32 %v1187_v61  ;;  %v1289_v14 = vsub.s32 4, %v1265_v49  ;;  %v4299_v19 = vld [vmem:[#allocation48_spill] sm:$0xff]  ;;  %v4300_v61 = vld [vmem:[#allocation37_spill] sm:$0xff] }
 0x173   :  { %v3414_v56 = vadd.s32 %v3405_v30, %v3387_v8  ;;  %vm1364_vm13 = vc.u32 %v3387_v8, %v3405_v30  ;;  %v3418_v16 = vshrl.u32 %v4288_v37, 5  ;;  %v3422_v29 = vshll.u32 %v4227_v39, %v4289_v51 }
 0x174   :  { %v4291_v2 = vmov 920167782   ;;  %v1271_v10 = vclz %v1866_v63  ;;  %v3429_v9 = vshrl.u32 %v4292_v3, 5  ;;  %vm3433_vm14 = vcmp.le.f32.partialorder %v1203_v15, 0.7853982 }
 0x175   :  { %v3426_v60 = vshrl.u32 %v4291_v2, %v4290_v28  ;;  %v1365_v41 = vadd.s32 1, %v3406_v38  ;;  %v787_v53 = vand.u32 2147483647, %v4295_v42  ;;  %vm1205_vm15 = vcmp.lt.s32.totalorder %v4273_v55, 0 }
 0x176   :  { %v1867_v1 = vadd.s32 4294967294, %v1271_v10  ;;  %v1362_v40 = vmul.u32 %v1355_v27, %v1346_v0  ;;  %v805_v4 = vshrl.u32 %v4236_v17, %v4296_v6  ;;  %vm1195_vm3 = vcmp.eq.s32.totalorder %v3403_v58, 0 }
 0x177   :  { %vm1198_vm8 = vcmp.eq.s32.totalorder %v3403_v58, 2  ;;  %v1290_v15 = vsel %vm1205_vm15, %v1289_v14, %v1265_v49  ;;  %v1366_v32 = vsel %vm1364_vm13, %v1365_v41, %v3406_v38  ;;  %v808_v36 = vshrl.u32 %v4238_v11, %v4296_v6 }
 0x178   :  { %vm1194_vm5 = vcmp.lt.s32.totalorder %v3403_v58, 2  ;;  %vm1868_vm7 = vcmp.lt.s32.totalorder %v1867_v1, 0  ;;  %v1367_v23 = vadd.s32 %v1366_v32, %v1362_v40  ;;  %v804_v33 = vshll.u32 %v4239_v35, %v4297_v52 }
 0x179   :  { %v811_v48 = vshrl.u32 %v4227_v39, %v4296_v6  ;;  %vm1191_vm1 = vweird.f32 %v4270_v12  ;;  %v1274_v49 = vsel %vm1868_vm7, 0, %v1867_v1  ;;  %v794_v31 = vand.u32 8388607, %v787_v53 }
 0x17a   :  { %v807_v45 = vshll.u32 %v4236_v17, %v4297_v52  ;;  %v810_v27 = vshll.u32 %v4238_v11, %v4297_v52  ;;  %v1275_v24 = vsub.s32 32, %v1274_v49  ;;  %v1279_v47 = vsub.s32 4294967266, %v1274_v49 }
 0x17b   :  { %v1368_v5 = vadd.s32 536870912, %v1367_v23  ;;  %v806_v22 = vor.u32 %v805_v4, %v804_v33  ;;  %v1276_v59 = vshll.u32 %v3378_v57, %v1274_v49  ;;  %vm821_vm4 = vcmp.lt.s32.totalorder %v4298_v44, 3  ;;  %v1986_v43 = vpop.eup %1985  ;;  %v4301_v4 = vld [vmem:[#allocation43_spill] sm:$0xff]  ;;  %v3493_v33 = vpop.permute.xlu1 %1745 }
 0x17c   :  { %v809_v34 = vor.u32 %v808_v36, %v807_v45  ;;  %v812_v8 = vor.u32 %v811_v48, %v810_v27  ;;  %v1277_v13 = vshrl.u32 %v3323_v46, %v1275_v24  ;;  %v1280_v26 = vadd.s32 127, %v1279_v47  ;;  %v1988_v38 = vpop.eup %1987 }
 0x17d   :  { %v1369_v7 = vshrl.u32 %v1368_v5, 30  ;;  %v833_v30 = vsel %vm821_vm4, %v4300_v61, %v4299_v19  ;;  %v1199_v21 = vxor.u32 2147483648, %v1986_v43  ;;  %v1292_v54 = vsel %vm3433_vm14, 0, %v1290_v15 }
 0x17e   :  { %v803_v57 = vshrl.u32 %v4239_v35, %v4296_v6  ;;  %vm819_vm10 = vcmp.lt.s32.totalorder %v4298_v44, 1  ;;  %v1196_v63 = vxor.u32 2147483648, %v1988_v38  ;;  %v1278_v0 = vor.u32 %v1277_v13, %v1276_v59 }
 0x17f   :  { %v1281_v46 = vshll.u32 %v1280_v26, 23  ;;  %v1370_v14 = vshll.u32 %v1369_v7, 30  ;;  %v1200_v37 = vsel %vm1198_vm8, %v1199_v21, %v1988_v38  ;;  %v795_v10 = vor.u32 8388608, %v794_v31  ;;  %v4302_v21 = vld [vmem:[#allocation47_spill] sm:$0xff] }
 0x180   :  { %v827_v3 = vsel %vm819_vm10, %v806_v22, %v809_v34  ;;  %v831_v41 = vsel %vm819_vm10, %v809_v34, %v812_v8  ;;  %v1197_v1 = vsel %vm1195_vm3, %v1986_v43, %v1196_v63  ;;  %v829_v15 = vsel %vm821_vm4, %v812_v8, %v4301_v4  ;;  %v4307_v4 = vld [vmem:[#allocation16_spill] sm:$0xff] }
 0x181   :  { %v1282_v40 = vor.u32 4788187, %v1281_v46  ;;  %v3483_v6 = vsub.s32 %v1367_v23, %v1370_v14  ;;  %v1201_v32 = vsel %vm1194_vm5, %v1197_v1, %v1200_v37  ;;  %v1285_v36 = vcvt.s32.f32 %v1278_v0 }
 0x182   :  { %vm820_vm0 = vcmp.lt.s32.totalorder %v4298_v44, 2  ;;  %v824_v52 = vsel %vm822_vm11, %v812_v8, 2102212464  ;;  %v1202_v48 = vsel %vm1191_vm1, nan, %v1201_v32  ;;  %v1296_v45 = vadd.s32 3, %v1292_v54 }
 0x183   :  { %v1283_v23 = vand.u32 2147483647, %v1282_v40  ;;  %v1373_v49 = vsub.s32 0, %v3483_v6  ;;  %v834_v31 = vsel %vm820_vm0, %v831_v41, %v833_v30  ;;  %v1762_v58 = vmul.f32 %v3493_v33, %v1202_v48 }
 0x184   :  { %v830_v27 = vsel %vm820_vm0, %v827_v3, %v829_v15  ;;  %v835_v24 = vshll.u32 %v795_v10, 8  ;;  %v823_v12 = vsel %vm819_vm10, %v803_v57, %v806_v22  ;;  %v825_v59 = vsel %vm821_vm4, %v809_v34, %v824_v52 }
 0x185   :  { %v1286_v47 = vmul.f32 %v1285_v36, %v1283_v23  ;;  %v1870_v5 = vmin.u32 %v1373_v49, %v3483_v6  ;;  %v3510_v8 = vor.u32 %v3426_v60, %v3422_v29  ;;  %v1393_v43 = vsub.s32 4, %v1369_v7  ;;  %1803 = vst [vmem:[#allocation3 + $0x48] sm:$0xff] %v1762_v58  ;;  %v4303_v60 = vld [vmem:[#allocation9_spill] sm:$0xff] }
 0x186   :  { %v3512_v13 = vmul.u32.u64.low %v835_v24, %v834_v31  ;;  %v3513_v26 = vmul.u32.u64.high %v835_v24, %v834_v31, %v3512_v13  ;;  %v3515_v30 = vmul.u32.u64.low %v835_v24, %v830_v27  ;;  %v3516_v38 = vmul.u32.u64.high %v835_v24, %v830_v27, %v3515_v30 }
 0x187   :  { %v1287_v19 = vxor.u32 2147483648, %v1286_v47  ;;  %v1375_v61 = vclz %v1870_v5  ;;  %v3520_v22 = vshll.u32 %v4227_v39, %v4302_v21  ;;  %vm1309_vm11 = vcmp.lt.s32.totalorder %v4279_v62, 0  ;;  %v4310_v13 = vld [vmem:[#allocation40_spill] sm:$0xff] }
 0x188   :  { %v826_v29 = vsel %vm820_vm0, %v823_v12, %v825_v59  ;;  %v891_v34 = vand.u32 2147483647, %v4303_v60  ;;  %v3528_v57 = vand.u32 3, %v1296_v45  ;;  %vm3532_vm9 = vcmp.le.f32.partialorder %v1307_v18, 0.7853982 }
 0x189   :  { %v1288_v54 = vsel %vm1205_vm15, %v1287_v19, %v1286_v47  ;;  %v1871_v0 = vadd.s32 4294967294, %v1375_v61  ;;  %v1394_v44 = vsel %vm1309_vm11, %v1393_v43, %v1369_v7  ;;  %v3542_v14 = vadd.s32 %v3515_v30, %v3513_v26  ;;  %v4308_v47 = vld [vmem:[#allocation35_spill] sm:$0xff]  ;;  %v4309_v43 = vld [vmem:[#allocation54_spill] sm:$0xff] }
 0x18a   :  { %v1291_v46 = vsel %vm3433_vm14, %v4273_v55, %v1288_v54  ;;  %vm844_vm6 = vc.u32 %v3513_v26, %v3515_v30  ;;  %v842_v37 = vmul.u32 %v835_v24, %v826_v29  ;;  %v845_v18 = vadd.s32 1, %v3516_v38 }
 0x18b   :  { %1989 = vcosq.f32 %v1291_v46  ;;  %vm1872_vm13 = vcmp.lt.s32.totalorder %v1871_v0, 0  ;;  %v898_v3 = vand.u32 8388607, %v891_v34  ;;  %v909_v41 = vshrl.u32 %v4236_v17, %v4306_v20 }
 0x18c   :  { %1991 = vsinq.f32 %v1291_v46  ;;  %v1378_v10 = vsel %vm1872_vm13, 0, %v1871_v0  ;;  %v846_v40 = vsel %vm844_vm6, %v845_v18, %v3516_v38  ;;  %v911_v15 = vshll.u32 %v4236_v17, %v4307_v4  ;;  %v4311_v18 = vld [vmem:[#allocation53_spill] sm:$0xff] }
 0x18d   :  { %v1379_v1 = vsub.s32 32, %v1378_v10  ;;  %v1383_v7 = vsub.s32 4294967266, %v1378_v10  ;;  %v847_v32 = vadd.s32 %v846_v40, %v842_v37  ;;  %v912_v36 = vshrl.u32 %v4238_v11, %v4306_v20 }
 0x18e   :  { %v914_v52 = vshll.u32 %v4238_v11, %v4307_v4  ;;  %v915_v48 = vshrl.u32 %v4227_v39, %v4306_v20  ;;  %v1380_v23 = vshll.u32 %v3483_v6, %v1378_v10  ;;  %v908_v45 = vshll.u32 %v4239_v35, %v4307_v4 }
 0x18f   :  { %v1381_v49 = vshrl.u32 %v3414_v56, %v1379_v1  ;;  %v1384_v31 = vadd.s32 127, %v1383_v7  ;;  %v848_v58 = vadd.s32 536870912, %v847_v32  ;;  %v913_v27 = vor.u32 %v912_v36, %v911_v15 }
 0x190   :  { %v916_v24 = vor.u32 %v915_v48, %v914_v52  ;;  %vm925_vm14 = vcmp.lt.s32.totalorder %v4308_v47, 3  ;;  %vm1298_vm15 = vcmp.lt.s32.totalorder %v3528_v57, 2  ;;  %v910_v59 = vor.u32 %v909_v41, %v908_v45 }
 0x191   :  { %v1382_v5 = vor.u32 %v1381_v49, %v1380_v23  ;;  %v1385_v12 = vshll.u32 %v1384_v31, 23  ;;  %v937_v6 = vsel %vm925_vm14, %v4310_v13, %v4309_v43  ;;  %vm1295_vm3 = vweird.f32 %v4273_v55 }
 0x192   :  { %vm1299_vm8 = vcmp.eq.s32.totalorder %v3528_v57, 0  ;;  %vm1302_vm5 = vcmp.eq.s32.totalorder %v3528_v57, 2  ;;  %v1396_v56 = vsel %vm3532_vm9, 0, %v1394_v44  ;;  %v3574_v26 = vshrl.u32 %v848_v58, 30  ;;  %v4313_v57 = vld [vmem:[#allocation51_spill] sm:$0xff] }
 0x193   :  { %v1386_v19 = vor.u32 4788187, %v1385_v12  ;;  %v899_v61 = vor.u32 8388608, %v898_v3  ;;  %v907_v30 = vshrl.u32 %v4239_v35, %v4306_v20  ;;  %vm923_vm7 = vcmp.lt.s32.totalorder %v4308_v47, 1  ;;  %v4312_v12 = vld [vmem:[#allocation10_spill] sm:$0xff] }
 0x194   :  { %v850_v38 = vshll.u32 %v3574_v26, 30  ;;  %vm924_vm1 = vcmp.lt.s32.totalorder %v4308_v47, 2  ;;  %v928_v29 = vsel %vm926_vm12, %v916_v24, 2102212464  ;;  %v935_v54 = vsel %vm923_vm7, %v913_v27, %v916_v24 }
 0x195   :  { %v1990_v0 = vpop.eup %1989  ;;  %v1387_v46 = vand.u32 2147483647, %v1386_v19  ;;  %v1389_v44 = vcvt.s32.f32 %v1382_v5  ;;  %v931_v37 = vsel %vm923_vm7, %v910_v59, %v913_v27  ;;  %v933_v10 = vsel %vm925_vm14, %v916_v24, %v4311_v18  ;;  %v4315_v18 = vld [vmem:[#allocation20_spill] sm:$0xff] }
 0x196   :  { %v1992_v3 = vpop.eup %1991  ;;  %v1303_v20 = vxor.u32 2147483648, %v1990_v0  ;;  %v3586_v41 = vsub.s32 %v847_v32, %v850_v38  ;;  %v927_v1 = vsel %vm923_vm7, %v907_v30, %v910_v59  ;;  %v938_v7 = vsel %vm924_vm1, %v935_v54, %v937_v6 }
 0x197   :  { %v1300_v40 = vxor.u32 2147483648, %v1992_v3  ;;  %v1390_v4 = vmul.f32 %v1389_v44, %v1387_v46  ;;  %v929_v15 = vsel %vm925_vm14, %v913_v27, %v928_v29  ;;  %v939_v36 = vshll.u32 %v899_v61, 8  ;;  %v4314_v44 = vld [vmem:[#allocation19_spill] sm:$0xff] }
 0x198   :  { %v1304_v52 = vsel %vm1302_vm5, %v1303_v20, %v1992_v3  ;;  %v1400_v48 = vadd.s32 3, %v1396_v56  ;;  %v853_v23 = vsub.s32 0, %v3586_v41  ;;  %v934_v32 = vsel %vm924_vm1, %v931_v37, %v933_v10 }
 0x199   :  { %v1301_v49 = vsel %vm1299_vm8, %v1990_v0, %v1300_v40  ;;  %v1391_v31 = vxor.u32 2147483648, %v1390_v4  ;;  %v3599_v45 = vmul.u32.u64.low %v939_v36, %v938_v7  ;;  %v3600_v58 = vmul.u32.u64.high %v939_v36, %v938_v7, %v3599_v45 }
 0x19a   :  { %v1305_v27 = vsel %vm1298_vm15, %v1301_v49, %v1304_v52  ;;  %v1850_v24 = vmin.u32 %v853_v23, %v3586_v41  ;;  %v930_v5 = vsel %vm924_vm1, %v927_v1, %v929_v15  ;;  %v995_v59 = vand.u32 2147483647, %v4312_v12 }
 0x19b   :  { %v1306_v43 = vsel %vm1295_vm3, nan, %v1305_v27  ;;  %v1392_v13 = vsel %vm1309_vm11, %v1391_v31, %v1390_v4  ;;  %v3612_v6 = vmul.u32.u64.low %v939_v36, %v934_v32  ;;  %v3613_v56 = vmul.u32.u64.high %v939_v36, %v934_v32, %v3612_v6 }
 0x19c   :  { %vm789_vm12 = vcmp.lt.s32.totalorder %v4295_v42, 0  ;;  %v3618_v19 = vshrl.u32 %v4291_v2, %v4313_v57  ;;  %v1395_v47 = vsel %vm3532_vm9, %v4279_v62, %v1392_v13  ;;  %v1763_v61 = vmul.f32 %v3493_v33, %v1306_v43 }
 0x19d   :  { %v855_v55 = vclz %v1850_v24  ;;  %1993 = vcosq.f32 %v1395_v47  ;;  %v3624_v30 = vand.u32 3, %v1400_v48  ;;  %v873_v38 = vsub.s32 4, %v3574_v26 }
 0x19e   :  { %v3628_v29 = vadd.s32 %v3612_v6, %v3600_v58  ;;  %1995 = vsinq.f32 %v1395_v47  ;;  %1804 = vst [vmem:[#allocation3 + $0x50] sm:$0xff] %v1763_v61  ;;  %v946_v0 = vmul.u32 %v939_v36, %v930_v5  ;;  %vm948_vm4 = vc.u32 %v3600_v58, %v3612_v6  ;;  %v4319_v61 = vld [vmem:[#allocation62_spill] sm:$0xff] }
 0x19f   :  { %v1851_v54 = vadd.s32 4294967294, %v855_v55  ;;  %v949_v63 = vadd.s32 1, %v3613_v56  ;;  %v1002_v46 = vand.u32 8388607, %v995_v59  ;;  %v1012_v37 = vshll.u32 %v4239_v35, %v4314_v44 }
 0x1a0   :  { %v1013_v10 = vshrl.u32 %v4236_v17, %v4315_v18  ;;  %v1015_v3 = vshll.u32 %v4236_v17, %v4314_v44  ;;  %v1016_v20 = vshrl.u32 %v4238_v11, %v4315_v18  ;;  %v1018_v1 = vshll.u32 %v4238_v11, %v4314_v44 }
 0x1a1   :  { %vm1852_vm10 = vcmp.lt.s32.totalorder %v1851_v54, 0  ;;  %v950_v40 = vsel %vm948_vm4, %v949_v63, %v3613_v56  ;;  %v1019_v15 = vshrl.u32 %v4227_v39, %v4315_v18  ;;  %vm1403_vm0 = vcmp.eq.s32.totalorder %v3624_v30, 0 }
 0x1a2   :  { %v858_v7 = vsel %vm1852_vm10, 0, %v1851_v54  ;;  %v1014_v4 = vor.u32 %v1013_v10, %v1012_v37  ;;  %vm3650_vm11 = vcmp.le.f32.partialorder %v787_v53, 0.7853982  ;;  %v951_v23 = vadd.s32 %v950_v40, %v946_v0 }
 0x1a3   :  { %v859_v52 = vsub.s32 32, %v858_v7  ;;  %v863_v48 = vsub.s32 4294967266, %v858_v7  ;;  %vm1402_vm9 = vcmp.lt.s32.totalorder %v3624_v30, 2  ;;  %vm1406_vm6 = vcmp.eq.s32.totalorder %v3624_v30, 2 }
 0x1a4   :  { %v860_v32 = vshll.u32 %v3586_v41, %v858_v7  ;;  %v1017_v49 = vor.u32 %v1016_v20, %v1015_v3  ;;  %v1020_v31 = vor.u32 %v1019_v15, %v1018_v1  ;;  %vm1399_vm13 = vweird.f32 %v4279_v62 }
 0x1a5   :  { %v861_v45 = vshrl.u32 %v3542_v14, %v859_v52  ;;  %v864_v58 = vadd.s32 127, %v863_v48  ;;  %v952_v53 = vadd.s32 536870912, %v951_v23  ;;  %vm1027_vm14 = vcmp.lt.s32.totalorder %v4287_v50, 1  ;;  %v4318_v14 = vld [vmem:[#allocation66_spill] sm:$0xff] }
 0x1a6   :  { %v874_v27 = vsel %vm789_vm12, %v873_v38, %v3574_v26  ;;  %v1003_v24 = vor.u32 8388608, %v1002_v46  ;;  %vm1029_vm15 = vcmp.lt.s32.totalorder %v4287_v50, 3  ;;  %v1035_v41 = vsel %vm1027_vm14, %v1014_v4, %v1017_v49 }
 0x1a7   :  { %vm1446_vm3 = vcmp.lt.s32.totalorder %v3418_v16, 4  ;;  %v862_v5 = vor.u32 %v861_v45, %v860_v32  ;;  %v865_v43 = vshll.u32 %v864_v58, 23  ;;  %v953_v13 = vshrl.u32 %v952_v53, 30  ;;  %v1994_v56 = vpop.eup %1993 }
 0x1a8   :  { %v1037_v6 = vsel %vm1029_vm15, %v1020_v31, %v4318_v14  ;;  %v1011_v47 = vshrl.u32 %v4239_v35, %v4315_v18  ;;  %vm1028_vm8 = vcmp.lt.s32.totalorder %v4287_v50, 2  ;;  %v1039_v26 = vsel %vm1027_vm14, %v1017_v49, %v1020_v31  ;;  %v1996_v38 = vpop.eup %1995  ;;  %v4321_v14 = vld [vmem:[#allocation45_spill] sm:$0xff] }
 0x1a9   :  { %v1041_v55 = vsel %vm1029_vm15, %v4319_v61, %v3394_v25  ;;  %v1407_v54 = vxor.u32 2147483648, %v1994_v56  ;;  %v866_v0 = vor.u32 4788187, %v865_v43  ;;  %v954_v63 = vshll.u32 %v953_v13, 30 }
 0x1aa   :  { %v1032_v46 = vsel %vm1030_vm2, %v1020_v31, 2102212464  ;;  %v1404_v44 = vxor.u32 2147483648, %v1996_v38  ;;  %v1038_v37 = vsel %vm1028_vm8, %v1035_v41, %v1037_v6  ;;  %v1042_v18 = vsel %vm1028_vm8, %v1039_v26, %v1041_v55  ;;  %v4323_v55 = vld [vmem:[#allocation55_spill] sm:$0xff] }
 0x1ab   :  { %v1043_v10 = vshll.u32 %v1003_v24, 8  ;;  %vm893_vm5 = vcmp.lt.s32.totalorder %v4303_v60, 0  ;;  %v1408_v25 = vsel %vm1406_vm6, %v1407_v54, %v1996_v38  ;;  %v867_v3 = vand.u32 2147483647, %v866_v0  ;;  %v4324_v0 = vld [vmem:[#allocation23_spill] sm:$0xff] }
 0x1ac   :  { %v869_v20 = vcvt.s32.f32 %v862_v5  ;;  %v3688_v1 = vsub.s32 %v951_v23, %v954_v63  ;;  %v1405_v7 = vsel %vm1403_vm0, %v1994_v56, %v1404_v44  ;;  %v876_v40 = vsel %vm3650_vm11, 0, %v874_v27 }
 0x1ad   :  { %v3694_v15 = vmul.u32.u64.low %v1043_v10, %v1042_v18  ;;  %v3695_v52 = vmul.u32.u64.high %v1043_v10, %v1042_v18, %v3694_v15  ;;  %v1409_v48 = vsel %vm1402_vm9, %v1405_v7, %v1408_v25  ;;  %v1031_v45 = vsel %vm1027_vm14, %v1011_v47, %v1014_v4 }
 0x1ae   :  { %v870_v32 = vmul.f32 %v869_v20, %v867_v3  ;;  %v957_v31 = vsub.s32 0, %v3688_v1  ;;  %v1410_v23 = vsel %vm1399_vm13, nan, %v1409_v48  ;;  %v1033_v58 = vsel %vm1029_vm15, %v1017_v49, %v1032_v46  ;;  %v4320_v49 = vld [vmem:[#allocation46_spill] sm:$0xff] }
 0x1af   :  { %v3706_v53 = vmul.u32.u64.low %v1043_v10, %v1038_v37  ;;  %v3707_v27 = vmul.u32.u64.high %v1043_v10, %v1038_v37, %v3706_v53  ;;  %v1764_v24 = vmul.f32 %v3493_v33, %v1410_v23  ;;  %v880_v30 = vadd.s32 3, %v876_v40 }
 0x1b0   :  { %v871_v41 = vxor.u32 2147483648, %v870_v32  ;;  %v1854_v5 = vmin.u32 %v957_v31, %v3688_v1  ;;  %v3714_v43 = vsel %vm1446_vm3, %v3510_v8, 920167782  ;;  %v977_v4 = vsub.s32 4, %v953_v13 }
 0x1b1   :  { %v3717_v62 = vadd.s32 %v3706_v53, %v3695_v52  ;;  %vm1052_vm2 = vc.u32 %v3695_v52, %v3706_v53  ;;  %v4322_v6 = vor.u32 %v4320_v49, %v4321_v14  ;;  %1805 = vst [vmem:[#allocation3 + $0x58] sm:$0xff] %v1764_v24  ;;  %v1034_v26 = vsel %vm1028_vm8, %v1031_v45, %v1033_v58 }
 0x1b2   :  { %v872_v56 = vsel %vm789_vm12, %v871_v41, %v870_v32  ;;  %v959_v47 = vclz %v1854_v5  ;;  %v3731_v61 = vor.u32 %v3618_v19, %v3520_v22  ;;  %v3734_v38 = vshrl.u32 %v4323_v55, 5 }
 0x1b3   :  { %v1456_v33 = vsel %vm1446_vm3, %v4322_v6, 1326507024  ;;  %v875_v54 = vsel %vm3650_vm11, %v4295_v42, %v872_v56  ;;  %v1411_v63 = vand.u32 2147483647, %v4324_v0  ;;  %v3740_v46 = vand.u32 3, %v880_v30 }
 0x1b4   :  { %1997 = vcosq.f32 %v875_v54  ;;  %v1855_v44 = vadd.s32 4294967294, %v959_v47  ;;  %v1053_v50 = vadd.s32 1, %v3707_v27  ;;  %v3745_v22 = vsel %vm893_vm5, %v977_v4, %v953_v13 }
 0x1b5   :  { %1999 = vsinq.f32 %v875_v54  ;;  %v1050_v19 = vmul.u32 %v1043_v10, %v1034_v26  ;;  %v1429_v37 = vshrl.u32 %v4236_v17, %v4290_v28  ;;  %vm3751_vm7 = vcmp.le.f32.partialorder %v891_v34, 0.7853982 }
 0x1b6   :  { %vm1856_vm1 = vcmp.lt.s32.totalorder %v1855_v44, 0  ;;  %v1054_v18 = vsel %vm1052_vm2, %v1053_v50, %v3707_v27  ;;  %v1432_v25 = vshrl.u32 %v4238_v11, %v4290_v28  ;;  %v1418_v10 = vand.u32 8388607, %v1411_v63 }
 0x1b7   :  { %v962_v13 = vsel %vm1856_vm1, 0, %v1855_v44  ;;  %v1055_v3 = vadd.s32 %v1054_v18, %v1050_v19  ;;  %v1428_v20 = vshll.u32 %v4239_v35, %v4289_v51  ;;  %vm886_vm12 = vcmp.eq.s32.totalorder %v3740_v46, 2 }
 0x1b8   :  { %v963_v34 = vsub.s32 32, %v962_v13  ;;  %v967_v7 = vsub.s32 4294967266, %v962_v13  ;;  %v980_v40 = vsel %vm3751_vm7, 0, %v3745_v22  ;;  %v1431_v15 = vshll.u32 %v4236_v17, %v4289_v51 }
 0x1b9   :  { %vm883_vm4 = vcmp.eq.s32.totalorder %v3740_v46, 0  ;;  %v1056_v52 = vadd.s32 536870912, %v1055_v3  ;;  %v1430_v48 = vor.u32 %v1429_v37, %v1428_v20  ;;  %v1434_v32 = vshll.u32 %v4238_v11, %v4289_v51  ;;  %v4327_v20 = vld [vmem:[#allocation58_spill] sm:$0xff] }
 0x1ba   :  { %v1435_v31 = vshrl.u32 %v4227_v39, %v4290_v28  ;;  %vm882_vm10 = vcmp.lt.s32.totalorder %v3740_v46, 2  ;;  %v964_v45 = vshll.u32 %v3688_v1, %v962_v13  ;;  %v965_v23 = vshrl.u32 %v3628_v29, %v963_v34 }
 0x1bb   :  { %v968_v58 = vadd.s32 127, %v967_v7  ;;  %v1433_v53 = vor.u32 %v1432_v25, %v1431_v15  ;;  %v3778_v27 = vshrl.u32 %v1056_v52, 30  ;;  %v1419_v24 = vor.u32 8388608, %v1418_v10 }
 0x1bc   :  { %v1436_v41 = vor.u32 %v1435_v31, %v1434_v32  ;;  %vm1445_vm0 = vcmp.lt.s32.totalorder %v3418_v16, 3  ;;  %v966_v30 = vor.u32 %v965_v23, %v964_v45  ;;  %v1427_v51 = vshrl.u32 %v4239_v35, %v4290_v28  ;;  %v4328_v45 = vld [vmem:[#allocation59_spill] sm:$0xff] }
 0x1bd   :  { %v969_v5 = vshll.u32 %v968_v58, 23  ;;  %v1457_v4 = vsel %vm1445_vm0, %v3510_v8, %v1456_v33  ;;  %v1058_v1 = vshll.u32 %v3778_v27, 30  ;;  %vm1443_vm11 = vcmp.lt.s32.totalorder %v3418_v16, 1  ;;  %v3829_v58 = vpop.permute.xlu0 %1740 }
 0x1be   :  { %vm1444_vm9 = vcmp.lt.s32.totalorder %v3418_v16, 2  ;;  %v1448_v29 = vsel %vm1446_vm3, %v1436_v41, 2102212464  ;;  %v1998_v49 = vpop.eup %1997  ;;  %vm1550_vm6 = vcmp.lt.s32.totalorder %v3429_v9, 4  ;;  %v1447_v28 = vsel %vm1443_vm11, %v1427_v51, %v1430_v48  ;;  %v4329_v51 = vld [vmem:[#allocation57_spill] sm:$0xff] }
 0x1bf   :  { %v970_v14 = vor.u32 4788187, %v969_v5  ;;  %v1451_v6 = vsel %vm1443_vm11, %v1430_v48, %v1433_v53  ;;  %v1453_v8 = vsel %vm1445_vm0, %v1436_v41, %v3714_v43  ;;  %v2000_v33 = vpop.eup %1999  ;;  %v887_v56 = vxor.u32 2147483648, %v1998_v49 }
 0x1c0   :  { %v973_v47 = vcvt.s32.f32 %v966_v30  ;;  %v3799_v26 = vsub.s32 %v1055_v3, %v1058_v1  ;;  %v1459_v55 = vshll.u32 %v1419_v24, 8  ;;  %v884_v54 = vxor.u32 2147483648, %v2000_v33 }
 0x1c1   :  { %v971_v44 = vand.u32 2147483647, %v970_v14  ;;  %v1449_v50 = vsel %vm1445_vm0, %v1433_v53, %v1448_v29  ;;  %v1455_v22 = vsel %vm1443_vm11, %v1433_v53, %v1436_v41  ;;  %v888_v19 = vsel %vm886_vm12, %v887_v56, %v2000_v33  ;;  %v4332_v14 = vld [vmem:[#allocation24_spill] sm:$0xff] }
 0x1c2   :  { %v1061_v37 = vsub.s32 0, %v3799_v26  ;;  %v1454_v43 = vsel %vm1444_vm9, %v1451_v6, %v1453_v8  ;;  %v1458_v18 = vsel %vm1444_vm9, %v1455_v22, %v1457_v4  ;;  %vm997_vm13 = vcmp.lt.s32.totalorder %v4312_v12, 0  ;;  %v4330_v4 = vld [vmem:[#allocation56_spill] sm:$0xff] }
 0x1c3   :  { %v885_v25 = vsel %vm883_vm4, %v1998_v49, %v884_v54  ;;  %v974_v13 = vmul.f32 %v973_v47, %v971_v44  ;;  %v3815_v3 = vmul.u32.u64.low %v1459_v55, %v1458_v18  ;;  %v3816_v10 = vmul.u32.u64.high %v1459_v55, %v1458_v18, %v3815_v3 }
 0x1c4   :  { %v1645_v34 = vshll.u32 %v4227_v39, %v4327_v20  ;;  %vm879_vm14 = vweird.f32 %v4295_v42  ;;  %v889_v7 = vsel %vm882_vm10, %v885_v25, %v888_v19  ;;  %v1858_v15 = vmin.u32 %v1061_v37, %v3799_v26 }
 0x1c5   :  { %v890_v52 = vsel %vm879_vm14, nan, %v889_v7  ;;  %v975_v48 = vxor.u32 2147483648, %v974_v13  ;;  %v3824_v32 = vmul.u32.u64.low %v1459_v55, %v1454_v43  ;;  %v3825_v31 = vmul.u32.u64.high %v1459_v55, %v1454_v43, %v3824_v32 }
 0x1c6   :  { %v1646_v23 = vshrl.u32 %v4291_v2, %v4328_v45  ;;  %v984_v53 = vadd.s32 3, %v980_v40  ;;  %v1063_v24 = vclz %v1858_v15  ;;  %v1450_v42 = vsel %vm1444_vm9, %v1447_v28, %v1449_v50 }
 0x1c7   :  { %v976_v46 = vsel %vm893_vm5, %v975_v48, %v974_v13  ;;  %v1759_v41 = vmul.f32 %v3829_v58, %v890_v52  ;;  %v3837_v30 = vadd.s32 %v3824_v32, %v3816_v10  ;;  %vm1468_vm15 = vc.u32 %v3816_v10, %v3824_v32 }
 0x1c8   :  { %v3843_v2 = vsel %vm1550_vm6, %v3731_v61, 920167782  ;;  %v979_v16 = vsel %vm3751_vm7, %v4303_v60, %v976_v46  ;;  %v1859_v40 = vadd.s32 4294967294, %v1063_v24  ;;  %v1081_v5 = vsub.s32 4, %v3778_v27 }
 0x1c9   :  { %v4331_v1 = vor.u32 %v4329_v51, %v4330_v4  ;;  %2001 = vcosq.f32 %v979_v16  ;;  %1800 = vst [vmem:[#allocation3 + $0x30] sm:$0xff] %v1759_v41  ;;  %v1469_v49 = vadd.s32 1, %v3825_v31  ;;  %v1515_v28 = vand.u32 2147483647, %v4332_v14 }
 0x1ca   :  { %v3856_v6 = vor.u32 %v1646_v23, %v1645_v34  ;;  %2003 = vsinq.f32 %v979_v16  ;;  %vm1860_vm3 = vcmp.lt.s32.totalorder %v1859_v40, 0  ;;  %v1466_v36 = vmul.u32 %v1459_v55, %v1450_v42 }
 0x1cb   :  { %v1560_v29 = vsel %vm1550_vm6, %v4331_v1, 1326507024  ;;  %v985_v8 = vand.u32 3, %v984_v53  ;;  %vm3860_vm8 = vcmp.le.f32.partialorder %v995_v59, 0.7853982  ;;  %v1066_v56 = vsel %vm1860_vm3, 0, %v1859_v40 }
 0x1cc   :  { %v1470_v47 = vsel %vm1468_vm15, %v1469_v49, %v3825_v31  ;;  %v1067_v54 = vsub.s32 32, %v1066_v56  ;;  %v1071_v44 = vsub.s32 4294967266, %v1066_v56  ;;  %v3870_v50 = vsel %vm997_vm13, %v1081_v5, %v3778_v27 }
 0x1cd   :  { %v1471_v55 = vadd.s32 %v1470_v47, %v1466_v36  ;;  %v1522_v22 = vand.u32 8388607, %v1515_v28  ;;  %v1533_v59 = vshrl.u32 %v4236_v17, %v4313_v57  ;;  %v1535_v19 = vshll.u32 %v4236_v17, %v4302_v21 }
 0x1ce   :  { %v1536_v37 = vshrl.u32 %v4238_v11, %v4313_v57  ;;  %v1068_v43 = vshll.u32 %v3799_v26, %v1066_v56  ;;  %v1069_v18 = vshrl.u32 %v3717_v62, %v1067_v54  ;;  %v1072_v25 = vadd.s32 127, %v1071_v44 }
 0x1cf   :  { %v1472_v27 = vadd.s32 536870912, %v1471_v55  ;;  %vm986_vm5 = vcmp.lt.s32.totalorder %v985_v8, 2  ;;  %v1532_v13 = vshll.u32 %v4239_v35, %v4302_v21  ;;  %v1538_v10 = vshll.u32 %v4238_v11, %v4302_v21 }
 0x1d0   :  { %v1537_v3 = vor.u32 %v1536_v37, %v1535_v19  ;;  %v1539_v34 = vshrl.u32 %v4227_v39, %v4313_v57  ;;  %vm983_vm2 = vweird.f32 %v4303_v60  ;;  %v1070_v7 = vor.u32 %v1069_v18, %v1068_v43 }
 0x1d1   :  { %v1073_v15 = vshll.u32 %v1072_v25, 23  ;;  %v3889_v26 = vshrl.u32 %v1472_v27, 30  ;;  %vm1549_vm7 = vcmp.lt.s32.totalorder %v3429_v9, 3  ;;  %vm987_vm1 = vcmp.eq.s32.totalorder %v985_v8, 0 }
 0x1d2   :  { %v1534_v62 = vor.u32 %v1533_v59, %v1532_v13  ;;  %v1540_v52 = vor.u32 %v1539_v34, %v1538_v10  ;;  %v1561_v48 = vsel %vm1549_vm7, %v3731_v61, %v1560_v29  ;;  %vm990_vm12 = vcmp.eq.s32.totalorder %v985_v8, 2 }
 0x1d3   :  { %v1074_v21 = vor.u32 4788187, %v1073_v15  ;;  %v1084_v32 = vsel %vm3860_vm8, 0, %v3870_v50  ;;  %v1474_v31 = vshll.u32 %v3889_v26, 30  ;;  %v2002_v23 = vpop.eup %2001  ;;  %v1077_v53 = vcvt.s32.f32 %v1070_v7  ;;  %v4335_v7 = vld [vmem:[#allocation61_spill] sm:$0xff]  ;;  %v4336_v15 = vld [vmem:[#allocation60_spill] sm:$0xff] }
 0x1d4   :  { %v1523_v24 = vor.u32 8388608, %v1522_v22  ;;  %v1531_v42 = vshrl.u32 %v4239_v35, %v4313_v57  ;;  %vm1547_vm4 = vcmp.lt.s32.totalorder %v3429_v9, 1  ;;  %v2004_v46 = vpop.eup %2003  ;;  %v991_v41 = vxor.u32 2147483648, %v2002_v23 }
 0x1d5   :  { %v1075_v16 = vand.u32 2147483647, %v1074_v21  ;;  %v1475_v61 = vsub.s32 %v1471_v55, %v1474_v31  ;;  %v1559_v40 = vsel %vm1547_vm4, %v1537_v3, %v1540_v52  ;;  %v988_v5 = vxor.u32 2147483648, %v2004_v46 }
 0x1d6   :  { %vm1548_vm10 = vcmp.lt.s32.totalorder %v3429_v9, 2  ;;  %v1552_v51 = vsel %vm1550_vm6, %v1540_v52, 2102212464  ;;  %v1555_v4 = vsel %vm1547_vm4, %v1534_v62, %v1537_v3  ;;  %v992_v1 = vsel %vm990_vm12, %v991_v41, %v2004_v46 }
 0x1d7   :  { %v1078_v29 = vmul.f32 %v1077_v53, %v1075_v16  ;;  %v1477_v49 = vsub.s32 0, %v1475_v61  ;;  %v1557_v57 = vsel %vm1549_vm7, %v1540_v52, %v3843_v2  ;;  %v989_v36 = vsel %vm987_vm1, %v2002_v23, %v988_v5 }
 0x1d8   :  { %v1551_v56 = vsel %vm1547_vm4, %v1531_v42, %v1534_v62  ;;  %v1562_v47 = vsel %vm1548_vm10, %v1559_v40, %v1561_v48  ;;  %v1563_v54 = vshll.u32 %v1523_v24, 8  ;;  %v993_v44 = vsel %vm986_vm5, %v989_v36, %v992_v1 }
 0x1d9   :  { %v1079_v50 = vxor.u32 2147483648, %v1078_v29  ;;  %v1874_v55 = vmin.u32 %v1477_v49, %v1475_v61  ;;  %v1553_v22 = vsel %vm1549_vm7, %v1537_v3, %v1552_v51  ;;  %v994_v59 = vsel %vm983_vm2, nan, %v993_v44 }
 0x1da   :  { %v1558_v2 = vsel %vm1548_vm10, %v1555_v4, %v1557_v57  ;;  %v3919_v19 = vmul.u32.u64.low %v1563_v54, %v1562_v47  ;;  %v3920_v37 = vmul.u32.u64.high %v1563_v54, %v1562_v47, %v3919_v19  ;;  %v1760_v8 = vmul.f32 %v3829_v58, %v994_v59 }
 0x1db   :  { %v1080_v43 = vsel %vm997_vm13, %v1079_v50, %v1078_v29  ;;  %v1479_v18 = vclz %v1874_v55  ;;  %vm1654_vm0 = vcmp.lt.s32.totalorder %v3734_v38, 4  ;;  %v1088_v60 = vadd.s32 3, %v1084_v32  ;;  %v4338_v32 = vld [vmem:[#allocation25_spill] sm:$0xff] }
 0x1dc   :  { %v1083_v25 = vsel %vm3860_vm8, %v4312_v12, %v1080_v43  ;;  %v1554_v27 = vsel %vm1548_vm10, %v1551_v56, %v1553_v22  ;;  %1801 = vst [vmem:[#allocation3 + $0x38] sm:$0xff] %v1760_v8  ;;  %v3931_v3 = vmul.u32.u64.low %v1563_v54, %v1558_v2  ;;  %v3932_v10 = vmul.u32.u64.high %v1563_v54, %v1558_v2, %v3931_v3 }
 0x1dd   :  { %2005 = vcosq.f32 %v1083_v25  ;;  %v1875_v13 = vadd.s32 4294967294, %v1479_v18  ;;  %v1660_v34 = vsel %vm1654_vm0, %v3856_v6, 920167782  ;;  %v4337_v62 = vor.u32 %v4335_v7, %v4336_v15 }
 0x1de   :  { %2007 = vsinq.f32 %v1083_v25  ;;  %v3943_v9 = vadd.s32 %v3931_v3, %v3920_v37  ;;  %vm1572_vm9 = vc.u32 %v3920_v37, %v3931_v3  ;;  %v1089_v52 = vand.u32 3, %v1088_v60 }
 0x1df   :  { %v1664_v33 = vsel %vm1654_vm0, %v4337_v62, 1326507024  ;;  %vm1876_vm11 = vcmp.lt.s32.totalorder %v1875_v13, 0  ;;  %v1570_v21 = vmul.u32 %v1563_v54, %v1554_v27  ;;  %v1619_v31 = vand.u32 2147483647, %v4338_v32 }
 0x1e0   :  { %v1482_v48 = vsel %vm1876_vm11, 0, %v1875_v13  ;;  %v1573_v24 = vadd.s32 1, %v3932_v10  ;;  %v1637_v42 = vshrl.u32 %v4236_v17, %v4328_v45  ;;  %v1639_v41 = vshll.u32 %v4236_v17, %v4327_v20 }
 0x1e1   :  { %v1483_v23 = vsub.s32 32, %v1482_v48  ;;  %v1487_v53 = vsub.s32 4294967266, %v1482_v48  ;;  %v1484_v46 = vshll.u32 %v1475_v61, %v1482_v48  ;;  %v1640_v16 = vshrl.u32 %v4238_v11, %v4328_v45 }
 0x1e2   :  { %v1642_v40 = vshll.u32 %v4238_v11, %v4327_v20  ;;  %v1574_v4 = vsel %vm1572_vm9, %v1573_v24, %v3932_v10  ;;  %v1643_v1 = vshrl.u32 %v4227_v39, %v4328_v45  ;;  %vm1087_vm6 = vweird.f32 %v4312_v12 }
 0x1e3   :  { %v1485_v5 = vshrl.u32 %v3837_v30, %v1483_v23  ;;  %v1488_v51 = vadd.s32 127, %v1487_v53  ;;  %v1575_v61 = vadd.s32 %v1574_v4, %v1570_v21  ;;  %v1626_v17 = vand.u32 8388607, %v1619_v31 }
 0x1e4   :  { %v1636_v29 = vshll.u32 %v4239_v35, %v4327_v20  ;;  %v1641_v49 = vor.u32 %v1640_v16, %v1639_v41  ;;  %v1644_v36 = vor.u32 %v1643_v1, %v1642_v40  ;;  %vm1653_vm13 = vcmp.lt.s32.totalorder %v3734_v38, 3 }
 0x1e5   :  { %v1486_v57 = vor.u32 %v1485_v5, %v1484_v46  ;;  %v1489_v11 = vshll.u32 %v1488_v51, 23  ;;  %vm1090_vm14 = vcmp.lt.s32.totalorder %v1089_v52, 2  ;;  %vm1413_vm15 = vcmp.lt.s32.totalorder %v4324_v0, 0 }
 0x1e6   :  { %v1576_v30 = vadd.s32 536870912, %v1575_v61  ;;  %v1665_v39 = vsel %vm1653_vm13, %v3856_v6, %v1664_v33  ;;  %vm1091_vm3 = vcmp.eq.s32.totalorder %v1089_v52, 0  ;;  %vm1094_vm8 = vcmp.eq.s32.totalorder %v1089_v52, 2 }
 0x1e7   :  { %v2006_v56 = vpop.eup %2005  ;;  %v1490_v47 = vor.u32 4788187, %v1489_v11  ;;  %v1638_v54 = vor.u32 %v1637_v42, %v1636_v29  ;;  %v1627_v55 = vor.u32 8388608, %v1626_v17  ;;  %vm1651_vm5 = vcmp.lt.s32.totalorder %v3734_v38, 1 }
 0x1e8   :  { %v2008_v20 = vpop.eup %2007  ;;  %v1095_v44 = vxor.u32 2147483648, %v2006_v56  ;;  %v3970_v50 = vshrl.u32 %v1576_v30, 30  ;;  %v1493_v2 = vcvt.s32.f32 %v1486_v57  ;;  %v1663_v19 = vsel %vm1651_vm5, %v1641_v49, %v1644_v36 }
 0x1e9   :  { %v1092_v22 = vxor.u32 2147483648, %v2008_v20  ;;  %v1491_v59 = vand.u32 2147483647, %v1490_v47  ;;  %v1497_v6 = vsub.s32 4, %v3889_v26  ;;  %vm1652_vm2 = vcmp.lt.s32.totalorder %v3734_v38, 2 }
 0x1ea   :  { %v1096_v37 = vsel %vm1094_vm8, %v1095_v44, %v2008_v20  ;;  %v1578_v43 = vshll.u32 %v3970_v50, 30  ;;  %v1659_v25 = vsel %vm1651_vm5, %v1638_v54, %v1641_v49  ;;  %v1661_v60 = vsel %vm1653_vm13, %v1644_v36, %v1660_v34 }
 0x1eb   :  { %v1093_v8 = vsel %vm1091_vm3, %v2006_v56, %v1092_v22  ;;  %v1494_v18 = vmul.f32 %v1493_v2, %v1491_v59  ;;  %vm3986_vm7 = vcmp.le.f32.partialorder %v1411_v63, 0.7853982  ;;  %v1666_v10 = vsel %vm1652_vm2, %v1663_v19, %v1665_v39 }
 0x1ec   :  { %v1097_v27 = vsel %vm1090_vm14, %v1093_v8, %v1096_v37  ;;  %v1579_v3 = vsub.s32 %v1575_v61, %v1578_v43  ;;  %v1656_v62 = vsel %vm1654_vm0, %v1644_v36, 2102212464  ;;  %v1667_v34 = vshll.u32 %v1627_v55, 8 }
 0x1ed   :  { %v1098_v7 = vsel %vm1087_vm6, nan, %v1097_v27  ;;  %v1495_v15 = vxor.u32 2147483648, %v1494_v18  ;;  %v1635_v63 = vshrl.u32 %v4239_v35, %v4328_v45  ;;  %v1662_v48 = vsel %vm1652_vm2, %v1659_v25, %v1661_v60 }
 0x1ee   :  { %v1761_v33 = vmul.f32 %v3829_v58, %v1098_v7  ;;  %v1581_v52 = vsub.s32 0, %v1579_v3  ;;  %v1498_v12 = vsel %vm1413_vm15, %v1497_v6, %v3889_v26  ;;  %v1657_v45 = vsel %vm1653_vm13, %v1641_v49, %v1656_v62 }
 0x1ef   :  { %v1496_v21 = vsel %vm1413_vm15, %v1495_v15, %v1494_v18  ;;  %v4006_v23 = vmul.u32.u64.low %v1667_v34, %v1666_v10  ;;  %v4007_v53 = vmul.u32.u64.high %v1667_v34, %v1666_v10, %v4006_v23  ;;  %v1655_v35 = vsel %vm1651_vm5, %v1635_v63, %v1638_v54  ;;  %v4032_v18 = vpop.permute.xlu0 %1750 }
 0x1f0   :  { %1802 = vst [vmem:[#allocation3 + $0x40] sm:$0xff] %v1761_v33  ;;  %v1499_v58 = vsel %vm3986_vm7, %v4324_v0, %v1496_v21  ;;  %v1878_v24 = vmin.u32 %v1581_v52, %v1579_v3  ;;  %v4016_v42 = vmul.u32.u64.low %v1667_v34, %v1662_v48  ;;  %v4017_v46 = vmul.u32.u64.high %v1667_v34, %v1662_v48, %v4016_v42 }
 0x1f1   :  { %2009 = vcosq.f32 %v1499_v58  ;;  %v1500_v26 = vsel %vm3986_vm7, 0, %v1498_v12  ;;  %v1658_v16 = vsel %vm1652_vm2, %v1655_v35, %v1657_v45  ;;  %vm1503_vm0 = vweird.f32 %v4324_v0 }
 0x1f2   :  { %2011 = vsinq.f32 %v1499_v58  ;;  %v1583_v41 = vclz %v1878_v24  ;;  %v1675_v40 = vadd.s32 %v4016_v42, %v4007_v53  ;;  %vm1676_vm1 = vc.u32 %v4007_v53, %v4016_v42 }
 0x1f3   :  { %v1504_v51 = vadd.s32 3, %v1500_v26  ;;  %v1677_v4 = vadd.s32 1, %v4017_v46  ;;  %v1674_v1 = vmul.u32 %v1667_v34, %v1658_v16  ;;  %v1601_v27 = vsub.s32 4, %v3970_v50 }
 0x1f4   :  { %v1879_v5 = vadd.s32 4294967294, %v1583_v41  ;;  %vm1517_vm9 = vcmp.lt.s32.totalorder %v4332_v14, 0  ;;  %vm1516_vm6 = vcmp.le.f32.partialorder %v1515_v28, 0.7853982  ;;  %vm1607_vm8 = vweird.f32 %v4332_v14 }
 0x1f5   :  { %v1678_v17 = vsel %vm1676_vm1, %v1677_v4, %v4017_v46  ;;  %v1505_v11 = vand.u32 3, %v1504_v51  ;;  %v1602_v15 = vsel %vm1517_vm9, %v1601_v27, %v3970_v50  ;;  %vm1621_vm5 = vcmp.lt.s32.totalorder %v4338_v32, 0 }
 0x1f6   :  { %vm1880_vm12 = vcmp.lt.s32.totalorder %v1879_v5, 0  ;;  %v1679_v57 = vadd.s32 %v1678_v17, %v1674_v1  ;;  %v1604_v52 = vsel %vm1516_vm6, 0, %v1602_v15  ;;  %vm1620_vm2 = vcmp.le.f32.partialorder %v1619_v31, 0.7853982 }
 0x1f7   :  { %v1586_v61 = vsel %vm1880_vm12, 0, %v1879_v5  ;;  %vm1510_vm4 = vcmp.eq.s32.totalorder %v1505_v11, 2  ;;  %vm1507_vm10 = vcmp.eq.s32.totalorder %v1505_v11, 0  ;;  %vm1506_vm11 = vcmp.lt.s32.totalorder %v1505_v11, 2 }
 0x1f8   :  { %v1587_v29 = vsub.s32 32, %v1586_v61  ;;  %v1591_v49 = vsub.s32 4294967266, %v1586_v61  ;;  %v1588_v36 = vshll.u32 %v1579_v3, %v1586_v61  ;;  %v1680_v39 = vadd.s32 536870912, %v1679_v57 }
 0x1f9   :  { %v1608_v48 = vadd.s32 3, %v1604_v52 }
 0x1fa   :  { %v1589_v38 = vshrl.u32 %v3943_v9, %v1587_v29  ;;  %v1592_v30 = vadd.s32 127, %v1591_v49  ;;  %v4028_v55 = vshrl.u32 %v1680_v39, 30 }
 0x1fb   :  { %v2010_v56 = vpop.eup %2009  ;;  %v1609_v24 = vand.u32 3, %v1608_v48 }
 0x1fc   :  { %v2012_v47 = vpop.eup %2011  ;;  %v1511_v54 = vxor.u32 2147483648, %v2010_v56  ;;  %v1590_v20 = vor.u32 %v1589_v38, %v1588_v36  ;;  %v1593_v44 = vshll.u32 %v1592_v30, 23  ;;  %v1682_v19 = vshll.u32 %v4028_v55, 30 }
 0x1fd   :  { %v1508_v22 = vxor.u32 2147483648, %v2012_v47  ;;  %vm1614_vm14 = vcmp.eq.s32.totalorder %v1609_v24, 2  ;;  %vm1611_vm15 = vcmp.eq.s32.totalorder %v1609_v24, 0  ;;  %vm1610_vm3 = vcmp.lt.s32.totalorder %v1609_v24, 2 }
 0x1fe   :  { %v1512_v59 = vsel %vm1510_vm4, %v1511_v54, %v2012_v47  ;;  %v1594_v2 = vor.u32 4788187, %v1593_v44  ;;  %v1597_v43 = vcvt.s32.f32 %v1590_v20  ;;  %v1683_v8 = vsub.s32 %v1679_v57, %v1682_v19 }
 0x1ff   :  { %v1509_v9 = vsel %vm1507_vm10, %v2010_v56, %v1508_v22  ;;  %v1705_v1 = vsub.s32 4, %v4028_v55  ;;  %vm1711_vm4 = vweird.f32 %v4338_v32 }
 0x200   :  { %v1513_v37 = vsel %vm1506_vm11, %v1509_v9, %v1512_v59  ;;  %v1595_v6 = vand.u32 2147483647, %v1594_v2  ;;  %v1685_v13 = vsub.s32 0, %v1683_v8 }
 0x201   :  { %v1514_v25 = vsel %vm1503_vm0, nan, %v1513_v37  ;;  %v1706_v57 = vsel %vm1621_vm5, %v1705_v1, %v4028_v55 }
 0x202   :  { %v1598_v60 = vmul.f32 %v1597_v43, %v1595_v6  ;;  %v1765_v3 = vmul.f32 %v4032_v18, %v1514_v25  ;;  %v1882_v7 = vmin.u32 %v1685_v13, %v1683_v8  ;;  %v1708_v36 = vsel %vm1620_vm2, 0, %v1706_v57 }
 0x204   :  { %v1599_v10 = vxor.u32 2147483648, %v1598_v60  ;;  %1806 = vst [vmem:[#allocation3 + $0x60] sm:$0xf] %v1765_v3  ;;  %v1687_v62 = vclz %v1882_v7 }
 0x206   :  { %v1600_v0 = vsel %vm1517_vm9, %v1599_v10, %v1598_v60  ;;  %v1883_v33 = vadd.s32 4294967294, %v1687_v62 }
 0x207   :  { %v1603_v34 = vsel %vm1516_vm6, %v4332_v14, %v1600_v0  ;;  %v1712_v14 = vadd.s32 3, %v1708_v36 }
 0x208   :  { %2013 = vcosq.f32 %v1603_v34  ;;  %vm1884_vm13 = vcmp.lt.s32.totalorder %v1883_v33, 0 }
 0x209   :  { %2015 = vsinq.f32 %v1603_v34  ;;  %v1690_v63 = vsel %vm1884_vm13, 0, %v1883_v33  ;;  %v1713_v38 = vand.u32 3, %v1712_v14 }
 0x20a   :  { %v1691_v21 = vsub.s32 32, %v1690_v63  ;;  %v1695_v12 = vsub.s32 4294967266, %v1690_v63  ;;  %v1692_v23 = vshll.u32 %v1683_v8, %v1690_v63 }
 0x20b   :  { %vm1718_vm7 = vcmp.eq.s32.totalorder %v1713_v38, 2  ;;  %vm1715_vm1 = vcmp.eq.s32.totalorder %v1713_v38, 0  ;;  %vm1714_vm12 = vcmp.lt.s32.totalorder %v1713_v38, 2 }
 0x20c   :  { %v1693_v53 = vshrl.u32 %v1675_v40, %v1691_v21  ;;  %v1696_v58 = vadd.s32 127, %v1695_v12 }
 0x20e   :  { %v1694_v28 = vor.u32 %v1693_v53, %v1692_v23  ;;  %v1697_v35 = vshll.u32 %v1696_v58, 23 }
 0x210   :  { %v1698_v50 = vor.u32 4788187, %v1697_v35  ;;  %v1701_v16 = vcvt.s32.f32 %v1694_v28 }
 0x212   :  { %v2014_v45 = vpop.eup %2013  ;;  %v1699_v41 = vand.u32 2147483647, %v1698_v50 }
 0x213   :  { %v2016_v42 = vpop.eup %2015  ;;  %v1615_v46 = vxor.u32 2147483648, %v2014_v45 }
 0x214   :  { %v1612_v26 = vxor.u32 2147483648, %v2016_v42  ;;  %v1702_v4 = vmul.f32 %v1701_v16, %v1699_v41 }
 0x215   :  { %v1616_v5 = vsel %vm1614_vm14, %v1615_v46, %v2016_v42 }
 0x216   :  { %v1613_v51 = vsel %vm1611_vm15, %v2014_v45, %v1612_v26  ;;  %v1703_v17 = vxor.u32 2147483648, %v1702_v4 }
 0x217   :  { %v1617_v40 = vsel %vm1610_vm3, %v1613_v51, %v1616_v5 }
 0x218   :  { %v1618_v61 = vsel %vm1607_vm8, nan, %v1617_v40  ;;  %v1704_v49 = vsel %vm1621_vm5, %v1703_v17, %v1702_v4 }
 0x219   :  { %v1766_v29 = vmul.f32 %v4032_v18, %v1618_v61  ;;  %v1707_v11 = vsel %vm1620_vm2, %v4338_v32, %v1704_v49 }
 0x21a   :  { %2017 = vcosq.f32 %v1707_v11 }
 0x21b   :  { %1807 = vst [vmem:[#allocation3 + $0x68] sm:$0xf] %v1766_v29  ;;  %2019 = vsinq.f32 %v1707_v11 }
 0x224   :  { %v2018_v30 = vpop.eup %2017 }
 0x225   :  { %v2020_v39 = vpop.eup %2019  ;;  %v1719_v56 = vxor.u32 2147483648, %v2018_v30 }
 0x226   :  { %v1716_v47 = vxor.u32 2147483648, %v2020_v39 }
 0x227   :  { %v1720_v54 = vsel %vm1718_vm7, %v1719_v56, %v2020_v39 }
 0x228   :  { %v1717_v31 = vsel %vm1715_vm1, %v2018_v30, %v1716_v47 }
 0x229   :  { %v1721_v20 = vsel %vm1714_vm12, %v1717_v31, %v1720_v54 }
 0x22a   :  { %v1722_v44 = vsel %vm1711_vm4, nan, %v1721_v20 }
 0x22b   :  { %v1767_v55 = vmul.f32 %v4032_v18, %v1722_v44 }
 0x22d   :  { %1808 = vst [vmem:[#allocation3 + $0x70] sm:$0xf] %v1767_v55 }
 0x22e   :  { %2035 = shalt.err (!%p2032_p4)
}
 0x22f   :  { %s2036_s24 = scalar_lea.hbm %s4067_s4, 1920 }
 0x230   :  { %p2037_p5 = scmp.ne.s32.totalorder %s4067_s4, %s2036_s24  ;;  %p2040_p6 = scmp.lt.u32.totalorder %s2036_s24, %s4067_s4 }
 0x232   :  { %p2042_p7 = pnand %p2040_p6, %p2037_p5 }
 0x234   :  { %2045 = shalt.err (!%p2042_p7)
}
 0x235   :  { %s2057_s28 = smov 384   ;;  %s2058_s29 = smov 24  }
 0x236   :  { %1820 = dma.vmem_to_hbm [thread:$0]  %s1815_s20, 1920, %s4067_s4, [#allocation4], %s2057_s28, %s2057_s28, %s2058_s29  }
 0x237   :  { %2046 = dma.done.wait [#allocation4], 1920  }
 0x238   :  { %2047 = vsyncadd [#allocation4], 4294965376 }
 0x239   :  { %1824 = vsyncpa [#allocation4], 1 }

</bundles_post_ra>
